<compile_context>
chip_gen: v7x
topology: tpu7x:2x2x1
jax: 0.10.0
libtpu: 0.0.40
codegen_flags: <defaults>
</compile_context>

<pallas_src>
import jax
import jax.numpy as jnp
from jax.experimental import pallas as pl
from jax.experimental.pallas import tpu as pltpu


def _make_fused_basic_block_kernel(H, W, C, compute_dtype):
    """Fused kernel: relu(conv2(relu(conv1(x)+b1)) + b2 + x), BN scales pre-folded."""
    HW = H * W

    def im2col_into(p_ref, pad_ref):
        # One im2col materialization in VMEM (no per-tap matmuls): each of the 9
        # shifted windows is written into its own lane-column block of the slab.
        for dy in range(3):
            for dx in range(3):
                k = dy * 3 + dx
                patch = pad_ref[dy:dy + H, dx:dx + W, :]              # (H, W, C)
                p_ref[:, k * C:(k + 1) * C] = patch.reshape(HW, C)    # lane dim unchanged

    def kernel(x_ref, xres_ref, w1_ref, b1_ref, w2_ref, b2_ref, out_ref,
               xpad_ref, ypad_ref, p_ref):
        # x_ref    : (1, H, W, C)   NHWC input tile (one image), f32
        # xres_ref : (1, C, H*W)    same image, NCHW-flat (residual add), f32
        # w1_ref   : (9*C, C)       conv1 weights (HWIO flattened, bn1 scale folded in)
        # b1_ref   : (1, C)         bn1 shift
        # w2_ref   : (C, 9*C)       conv2 weights, transposed, bn2 scale folded in
        # b2_ref   : (C, 1)         bn2 shift
        # out_ref  : (1, C, H*W)    output tile, NCHW-flat -> lane-dense store
        # xpad_ref : (H+2, W+2, C)  VMEM halo buffer for the input
        # ypad_ref : (H+2, W+2, C)  VMEM halo buffer for the intermediate y1 (never in HBM)
        # p_ref    : (H*W, 9*C)     VMEM im2col slab, reused by both stages

        # ---- stage 1: conv1 + bn1 + relu ------------------------------------------
        xpad_ref[...] = jnp.zeros_like(xpad_ref)                       # zero the halo
        xpad_ref[1:H + 1, 1:W + 1, :] = x_ref[0].astype(compute_dtype)
        im2col_into(p_ref, xpad_ref)
        acc1 = jnp.dot(p_ref[...], w1_ref[...],                        # one K=9*C matmul
                       preferred_element_type=jnp.float32)             # (H*W, C), f32 acc
        y1 = jnp.maximum(acc1 + b1_ref[0], 0.0)

        ypad_ref[...] = jnp.zeros_like(ypad_ref)
        ypad_ref[1:H + 1, 1:W + 1, :] = y1.reshape(H, W, C).astype(compute_dtype)

        # ---- stage 2: conv2 + bn2 + residual + relu, in (C, H*W) orientation -------
        im2col_into(p_ref, ypad_ref)
        acc2 = jnp.einsum("ok,pk->op", w2_ref[...], p_ref[...],        # (C, H*W), f32 acc
                          preferred_element_type=jnp.float32)
        out = jnp.maximum(acc2 + b2_ref[...] + xres_ref[0], 0.0)
        out_ref[0] = out.astype(out_ref.dtype)                         # lane-dense (C, 256)

    return kernel


def fold_bn(gamma, beta, running_mean, running_var, eps=1e-5):
    scale = gamma / jnp.sqrt(running_var + eps)
    shift = beta - running_mean * scale
    return scale, shift


def basic_block_forward(x_nchw, params, *, compute_dtype=jnp.float32):
    """BasicBlock.forward (stride=1, downsample=None).  Input/output NCHW.

    compute_dtype is what the MXU sees (accumulation and epilogue stay f32).
    Use jnp.bfloat16 on v6e/v7x for higher matmul throughput (looser tolerance).
    """
    N, C, H, W = x_nchw.shape
    assert params["w1"].shape == (3, 3, C, C) and params["w2"].shape == (3, 3, C, C), \
        "identity residual requires inplanes == planes"

    s1, b1 = fold_bn(*params["bn1"])
    s2, b2 = fold_bn(*params["bn2"])

    # Fold BN scale into the conv weights (free at trace time) and reshape to 2-D
    # MXU-friendly slabs.  w2 is stored transposed so stage 2 is computed directly in
    # the lane-dense (C, H*W) output orientation (no in-kernel output transpose).
    w1 = (params["w1"] * s1).reshape(9 * C, C).astype(compute_dtype)
    w2 = jnp.transpose((params["w2"] * s2).reshape(9 * C, C)).astype(compute_dtype)

    x_nhwc = jnp.transpose(x_nchw, (0, 2, 3, 1))   # conv-patch layout (channels on lanes)
    x_res = x_nchw.reshape(N, C, H * W)            # free reshape; residual in output layout

    kernel = _make_fused_basic_block_kernel(H, W, C, compute_dtype)

    out = pl.pallas_call(
        kernel,
        out_shape=jax.ShapeDtypeStruct((N, C, H * W), jnp.float32),
        grid=(N,),
        in_specs=[
            pl.BlockSpec((1, H, W, C), lambda n: (n, 0, 0, 0)),
            pl.BlockSpec((1, C, H * W), lambda n: (n, 0, 0)),
            pl.BlockSpec((9 * C, C), lambda n: (0, 0)),
            pl.BlockSpec((1, C), lambda n: (0, 0)),
            pl.BlockSpec((C, 9 * C), lambda n: (0, 0)),
            pl.BlockSpec((C, 1), lambda n: (0, 0)),
        ],
        out_specs=pl.BlockSpec((1, C, H * W), lambda n: (n, 0, 0)),
        scratch_shapes=[
            pltpu.VMEM((H + 2, W + 2, C), compute_dtype),   # padded input
            pltpu.VMEM((H + 2, W + 2, C), compute_dtype),   # padded y1 (fused intermediate)
            pltpu.VMEM((H * W, 9 * C), compute_dtype),      # im2col slab (reused)
        ],
        compiler_params=pltpu.CompilerParams(
            dimension_semantics=("parallel",),              # batch axis sharded on megacore
        ),
    )(x_nhwc, x_res, w1, b1.reshape(1, C), w2, b2.reshape(C, 1))

    return out.reshape(N, C, H, W)                 # free metadata reshape back to NCHW


def reference_forward(x_nchw, params):
    """Pure-JAX reference (same math, via lax.conv) for verification."""
    x = jnp.transpose(x_nchw, (0, 2, 3, 1))
    dn = ("NHWC", "HWIO", "NHWC")

    def conv(a, w):
        return jax.lax.conv_general_dilated(a, w, (1, 1), "SAME",
                                            dimension_numbers=dn)

    s1, b1 = fold_bn(*params["bn1"])
    s2, b2 = fold_bn(*params["bn2"])
    out = jnp.maximum(conv(x, params["w1"]) * s1 + b1, 0.0)
    out = conv(out, params["w2"]) * s2 + b2 + x
    out = jnp.maximum(out, 0.0)
    return jnp.transpose(out, (0, 3, 1, 2))


if __name__ == "__main__":
    N, C, H, W = 2, 4, 16, 16   # inplanes == planes == 4, stride=1, no downsample
    key = jax.random.PRNGKey(0)
    kx, kw1, kw2, kg1, kb1, km1, kv1, kg2, kb2, km2, kv2 = jax.random.split(key, 11)

    x = jax.random.normal(kx, (N, C, H, W), jnp.float32)

    params = {
        # conv weights in HWIO layout: (3, 3, Cin, Cout)
        "w1": jax.random.normal(kw1, (3, 3, C, C), jnp.float32) * 0.1,
        "w2": jax.random.normal(kw2, (3, 3, C, C), jnp.float32) * 0.1,
        # BN params: (gamma, beta, running_mean, running_var)
        "bn1": (jax.random.normal(kg1, (C,)) * 0.1 + 1.0,
                jax.random.normal(kb1, (C,)) * 0.1,
                jax.random.normal(km1, (C,)) * 0.1,
                jax.random.uniform(kv1, (C,), minval=0.5, maxval=1.5)),
        "bn2": (jax.random.normal(kg2, (C,)) * 0.1 + 1.0,
                jax.random.normal(kb2, (C,)) * 0.1,
                jax.random.normal(km2, (C,)) * 0.1,
                jax.random.uniform(kv2, (C,), minval=0.5, maxval=1.5)),
    }

    ref = jax.block_until_ready(reference_forward(x, params))

    # f32 MXU inputs: close to the pure-JAX reference.
    out = jax.block_until_ready(basic_block_forward(x, params))
    assert out.shape == (N, C, H, W), out.shape
    assert jnp.allclose(out, ref, atol=1e-3, rtol=1e-3), float(jnp.abs(out - ref).max())

    # bf16 MXU inputs (recommended on v6e/v7x): f32 accumulation/epilogue, looser check.
    out_bf16 = jax.block_until_ready(
        basic_block_forward(x, params, compute_dtype=jnp.bfloat16))
    assert jnp.allclose(out_bf16, ref, atol=5e-2, rtol=5e-2), \
        float(jnp.abs(out_bf16 - ref).max())

    print("KERNEL_OK")
</pallas_src>

<mosaic_0001>
module attributes {stable_mosaic.version = 11 : i64} {
  func.func @kernel(%arg0: i32, %arg1: memref<1x16x16x4xf32, #tpu.memory_space<vmem>>, %arg2: memref<1x4x256xf32, #tpu.memory_space<vmem>>, %arg3: memref<36x4xf32, #tpu.memory_space<vmem>>, %arg4: memref<1x4xf32, #tpu.memory_space<vmem>>, %arg5: memref<4x36xf32, #tpu.memory_space<vmem>>, %arg6: memref<4x1xf32, #tpu.memory_space<vmem>>, %arg7: memref<1x4x256xf32, #tpu.memory_space<vmem>>, %arg8: memref<18x18x4xf32, #tpu.memory_space<vmem>>, %arg9: memref<18x18x4xf32, #tpu.memory_space<vmem>>, %arg10: memref<256x36xf32, #tpu.memory_space<vmem>>) attributes {dimension_semantics = [#tpu.dimension_semantics<parallel>], iteration_bounds = array<i64: 2>, scalar_prefetch = 0 : i64, scratch_operands = 3 : i64, tpu.core_type = #tpu.core_type<tc>, window_params = [{transform_indices = @transform_0, window_bounds = array<i64: 1, 16, 16, 4>}, {transform_indices = @transform_1, window_bounds = array<i64: 1, 4, 256>}, {pipeline_mode = #tpu.pipeline_mode<synchronous>, transform_indices = @transform_2, window_bounds = array<i64: 36, 4>}, {pipeline_mode = #tpu.pipeline_mode<synchronous>, transform_indices = @transform_3, window_bounds = array<i64: 1, 4>}, {pipeline_mode = #tpu.pipeline_mode<synchronous>, transform_indices = @transform_4, window_bounds = array<i64: 4, 36>}, {pipeline_mode = #tpu.pipeline_mode<synchronous>, transform_indices = @transform_5, window_bounds = array<i64: 4, 1>}, {transform_indices = @transform_6, window_bounds = array<i64: 1, 4, 256>}]} {
    %cst = arith.constant 0.000000e+00 : f32
    %0 = vector.broadcast %cst : f32 to vector<18x18x4xf32>
    %c0 = arith.constant 0 : index
    %c0_0 = arith.constant 0 : index
    %c0_1 = arith.constant 0 : index
    %1 = vector.load %arg8[%c0, %c0_0, %c0_1] : memref<18x18x4xf32, #tpu.memory_space<vmem>>, vector<18x18x4xf32>
    tpu.vector_store %arg8[%c0, %c0_0, %c0_1], %0 {strides = array<i32>} : memref<18x18x4xf32, #tpu.memory_space<vmem>>, vector<18x18x4xf32>,
    %c0_2 = arith.constant 0 : index
    %c0_3 = arith.constant 0 : index
    %c0_4 = arith.constant 0 : index
    %c0_5 = arith.constant 0 : index
    %2 = vector.load %arg1[%c0_2, %c0_3, %c0_4, %c0_5] : memref<1x16x16x4xf32, #tpu.memory_space<vmem>>, vector<1x16x16x4xf32>
    %3 = vector.shape_cast %2 : vector<1x16x16x4xf32> to vector<16x16x4xf32>
    %c1 = arith.constant 1 : index
    %c1_6 = arith.constant 1 : index
    %c0_7 = arith.constant 0 : index
    %4 = vector.load %arg8[%c1, %c1_6, %c0_7] : memref<18x18x4xf32, #tpu.memory_space<vmem>>, vector<16x16x4xf32>
    tpu.vector_store %arg8[%c1, %c1_6, %c0_7], %3 {strides = array<i32>} : memref<18x18x4xf32, #tpu.memory_space<vmem>>, vector<16x16x4xf32>,
    %c0_8 = arith.constant 0 : index
    %c0_9 = arith.constant 0 : index
    %c0_10 = arith.constant 0 : index
    %5 = vector.load %arg8[%c0_8, %c0_9, %c0_10] : memref<18x18x4xf32, #tpu.memory_space<vmem>>, vector<16x16x4xf32>
    %6 = vector.shape_cast %5 : vector<16x16x4xf32> to vector<256x4xf32>
    %c0_11 = arith.constant 0 : index
    %c0_12 = arith.constant 0 : index
    %7 = vector.load %arg10[%c0_11, %c0_12] : memref<256x36xf32, #tpu.memory_space<vmem>>, vector<256x4xf32>
    tpu.vector_store %arg10[%c0_11, %c0_12], %6 {strides = array<i32>} : memref<256x36xf32, #tpu.memory_space<vmem>>, vector<256x4xf32>,
    %c0_13 = arith.constant 0 : index
    %c1_14 = arith.constant 1 : index
    %c0_15 = arith.constant 0 : index
    %8 = vector.load %arg8[%c0_13, %c1_14, %c0_15] : memref<18x18x4xf32, #tpu.memory_space<vmem>>, vector<16x16x4xf32>
    %9 = vector.shape_cast %8 : vector<16x16x4xf32> to vector<256x4xf32>
    %c0_16 = arith.constant 0 : index
    %c4 = arith.constant 4 : index
    %10 = vector.load %arg10[%c0_16, %c4] : memref<256x36xf32, #tpu.memory_space<vmem>>, vector<256x4xf32>
    tpu.vector_store %arg10[%c0_16, %c4], %9 {strides = array<i32>} : memref<256x36xf32, #tpu.memory_space<vmem>>, vector<256x4xf32>,
    %c0_17 = arith.constant 0 : index
    %c2 = arith.constant 2 : index
    %c0_18 = arith.constant 0 : index
    %11 = vector.load %arg8[%c0_17, %c2, %c0_18] : memref<18x18x4xf32, #tpu.memory_space<vmem>>, vector<16x16x4xf32>
    %12 = vector.shape_cast %11 : vector<16x16x4xf32> to vector<256x4xf32>
    %c0_19 = arith.constant 0 : index
    %c8 = arith.constant 8 : index
    %13 = vector.load %arg10[%c0_19, %c8] : memref<256x36xf32, #tpu.memory_space<vmem>>, vector<256x4xf32>
    tpu.vector_store %arg10[%c0_19, %c8], %12 {strides = array<i32>} : memref<256x36xf32, #tpu.memory_space<vmem>>, vector<256x4xf32>,
    %c1_20 = arith.constant 1 : index
    %c0_21 = arith.constant 0 : index
    %c0_22 = arith.constant 0 : index
    %14 = vector.load %arg8[%c1_20, %c0_21, %c0_22] : memref<18x18x4xf32, #tpu.memory_space<vmem>>, vector<16x16x4xf32>
    %15 = vector.shape_cast %14 : vector<16x16x4xf32> to vector<256x4xf32>
    %c0_23 = arith.constant 0 : index
    %c12 = arith.constant 12 : index
    %16 = vector.load %arg10[%c0_23, %c12] : memref<256x36xf32, #tpu.memory_space<vmem>>, vector<256x4xf32>
    tpu.vector_store %arg10[%c0_23, %c12], %15 {strides = array<i32>} : memref<256x36xf32, #tpu.memory_space<vmem>>, vector<256x4xf32>,
    %c1_24 = arith.constant 1 : index
    %c1_25 = arith.constant 1 : index
    %c0_26 = arith.constant 0 : index
    %17 = vector.load %arg8[%c1_24, %c1_25, %c0_26] : memref<18x18x4xf32, #tpu.memory_space<vmem>>, vector<16x16x4xf32>
    %18 = vector.shape_cast %17 : vector<16x16x4xf32> to vector<256x4xf32>
    %c0_27 = arith.constant 0 : index
    %c16 = arith.constant 16 : index
    %19 = vector.load %arg10[%c0_27, %c16] : memref<256x36xf32, #tpu.memory_space<vmem>>, vector<256x4xf32>
    tpu.vector_store %arg10[%c0_27, %c16], %18 {strides = array<i32>} : memref<256x36xf32, #tpu.memory_space<vmem>>, vector<256x4xf32>,
    %c1_28 = arith.constant 1 : index
    %c2_29 = arith.constant 2 : index
    %c0_30 = arith.constant 0 : index
    %20 = vector.load %arg8[%c1_28, %c2_29, %c0_30] : memref<18x18x4xf32, #tpu.memory_space<vmem>>, vector<16x16x4xf32>
    %21 = vector.shape_cast %20 : vector<16x16x4xf32> to vector<256x4xf32>
    %c0_31 = arith.constant 0 : index
    %c20 = arith.constant 20 : index
    %22 = vector.load %arg10[%c0_31, %c20] : memref<256x36xf32, #tpu.memory_space<vmem>>, vector<256x4xf32>
    tpu.vector_store %arg10[%c0_31, %c20], %21 {strides = array<i32>} : memref<256x36xf32, #tpu.memory_space<vmem>>, vector<256x4xf32>,
    %c2_32 = arith.constant 2 : index
    %c0_33 = arith.constant 0 : index
    %c0_34 = arith.constant 0 : index
    %23 = vector.load %arg8[%c2_32, %c0_33, %c0_34] : memref<18x18x4xf32, #tpu.memory_space<vmem>>, vector<16x16x4xf32>
    %24 = vector.shape_cast %23 : vector<16x16x4xf32> to vector<256x4xf32>
    %c0_35 = arith.constant 0 : index
    %c24 = arith.constant 24 : index
    %25 = vector.load %arg10[%c0_35, %c24] : memref<256x36xf32, #tpu.memory_space<vmem>>, vector<256x4xf32>
    tpu.vector_store %arg10[%c0_35, %c24], %24 {strides = array<i32>} : memref<256x36xf32, #tpu.memory_space<vmem>>, vector<256x4xf32>,
    %c2_36 = arith.constant 2 : index
    %c1_37 = arith.constant 1 : index
    %c0_38 = arith.constant 0 : index
    %26 = vector.load %arg8[%c2_36, %c1_37, %c0_38] : memref<18x18x4xf32, #tpu.memory_space<vmem>>, vector<16x16x4xf32>
    %27 = vector.shape_cast %26 : vector<16x16x4xf32> to vector<256x4xf32>
    %c0_39 = arith.constant 0 : index
    %c28 = arith.constant 28 : index
    %28 = vector.load %arg10[%c0_39, %c28] : memref<256x36xf32, #tpu.memory_space<vmem>>, vector<256x4xf32>
    tpu.vector_store %arg10[%c0_39, %c28], %27 {strides = array<i32>} : memref<256x36xf32, #tpu.memory_space<vmem>>, vector<256x4xf32>,
    %c2_40 = arith.constant 2 : index
    %c2_41 = arith.constant 2 : index
    %c0_42 = arith.constant 0 : index
    %29 = vector.load %arg8[%c2_40, %c2_41, %c0_42] : memref<18x18x4xf32, #tpu.memory_space<vmem>>, vector<16x16x4xf32>
    %30 = vector.shape_cast %29 : vector<16x16x4xf32> to vector<256x4xf32>
    %c0_43 = arith.constant 0 : index
    %c32 = arith.constant 32 : index
    %31 = vector.load %arg10[%c0_43, %c32] : memref<256x36xf32, #tpu.memory_space<vmem>>, vector<256x4xf32>
    tpu.vector_store %arg10[%c0_43, %c32], %30 {strides = array<i32>} : memref<256x36xf32, #tpu.memory_space<vmem>>, vector<256x4xf32>,
    %c0_44 = arith.constant 0 : index
    %c0_45 = arith.constant 0 : index
    %32 = vector.load %arg10[%c0_44, %c0_45] : memref<256x36xf32, #tpu.memory_space<vmem>>, vector<256x36xf32>
    %c0_46 = arith.constant 0 : index
    %c0_47 = arith.constant 0 : index
    %33 = vector.load %arg3[%c0_46, %c0_47] : memref<36x4xf32, #tpu.memory_space<vmem>>, vector<36x4xf32>
    %cst_48 = arith.constant dense<0.000000e+00> : vector<256x4xf32>
    %34 = tpu.matmul %32, %33, %cst_48 {dimension_numbers = #tpu.dot_dimension_numbers<[1], [0], [0], [1], [0, 0, 1, 1], [], []>} : vector<256x36xf32>, vector<36x4xf32>, vector<256x4xf32> -> vector<256x4xf32>
    %c0_49 = arith.constant 0 : index
    %c0_50 = arith.constant 0 : index
    %35 = vector.load %arg4[%c0_49, %c0_50] : memref<1x4xf32, #tpu.memory_space<vmem>>, vector<1x4xf32>
    %36 = vector.shape_cast %35 : vector<1x4xf32> to vector<4xf32>
    %37 = vector.shape_cast %36 : vector<4xf32> to vector<1x4xf32>
    %38 = vector.broadcast %37 : vector<1x4xf32> to vector<256x4xf32>
    %39 = arith.addf %34, %38 : vector<256x4xf32>
    %cst_51 = arith.constant 0.000000e+00 : f32
    %40 = vector.broadcast %cst_51 : f32 to vector<256x4xf32>
    %41 = arith.maximumf %39, %40 : vector<256x4xf32>
    %cst_52 = arith.constant 0.000000e+00 : f32
    %42 = vector.broadcast %cst_52 : f32 to vector<18x18x4xf32>
    %c0_53 = arith.constant 0 : index
    %c0_54 = arith.constant 0 : index
    %c0_55 = arith.constant 0 : index
    %43 = vector.load %arg9[%c0_53, %c0_54, %c0_55] : memref<18x18x4xf32, #tpu.memory_space<vmem>>, vector<18x18x4xf32>
    tpu.vector_store %arg9[%c0_53, %c0_54, %c0_55], %42 {strides = array<i32>} : memref<18x18x4xf32, #tpu.memory_space<vmem>>, vector<18x18x4xf32>,
    %44 = vector.shape_cast %41 : vector<256x4xf32> to vector<16x16x4xf32>
    %c1_56 = arith.constant 1 : index
    %c1_57 = arith.constant 1 : index
    %c0_58 = arith.constant 0 : index
    %45 = vector.load %arg9[%c1_56, %c1_57, %c0_58] : memref<18x18x4xf32, #tpu.memory_space<vmem>>, vector<16x16x4xf32>
    tpu.vector_store %arg9[%c1_56, %c1_57, %c0_58], %44 {strides = array<i32>} : memref<18x18x4xf32, #tpu.memory_space<vmem>>, vector<16x16x4xf32>,
    %c0_59 = arith.constant 0 : index
    %c0_60 = arith.constant 0 : index
    %c0_61 = arith.constant 0 : index
    %46 = vector.load %arg9[%c0_59, %c0_60, %c0_61] : memref<18x18x4xf32, #tpu.memory_space<vmem>>, vector<16x16x4xf32>
    %47 = vector.shape_cast %46 : vector<16x16x4xf32> to vector<256x4xf32>
    %c0_62 = arith.constant 0 : index
    %c0_63 = arith.constant 0 : index
    %48 = vector.load %arg10[%c0_62, %c0_63] : memref<256x36xf32, #tpu.memory_space<vmem>>, vector<256x4xf32>
    tpu.vector_store %arg10[%c0_62, %c0_63], %47 {strides = array<i32>} : memref<256x36xf32, #tpu.memory_space<vmem>>, vector<256x4xf32>,
    %c0_64 = arith.constant 0 : index
    %c1_65 = arith.constant 1 : index
    %c0_66 = arith.constant 0 : index
    %49 = vector.load %arg9[%c0_64, %c1_65, %c0_66] : memref<18x18x4xf32, #tpu.memory_space<vmem>>, vector<16x16x4xf32>
    %50 = vector.shape_cast %49 : vector<16x16x4xf32> to vector<256x4xf32>
    %c0_67 = arith.constant 0 : index
    %c4_68 = arith.constant 4 : index
    %51 = vector.load %arg10[%c0_67, %c4_68] : memref<256x36xf32, #tpu.memory_space<vmem>>, vector<256x4xf32>
    tpu.vector_store %arg10[%c0_67, %c4_68], %50 {strides = array<i32>} : memref<256x36xf32, #tpu.memory_space<vmem>>, vector<256x4xf32>,
    %c0_69 = arith.constant 0 : index
    %c2_70 = arith.constant 2 : index
    %c0_71 = arith.constant 0 : index
    %52 = vector.load %arg9[%c0_69, %c2_70, %c0_71] : memref<18x18x4xf32, #tpu.memory_space<vmem>>, vector<16x16x4xf32>
    %53 = vector.shape_cast %52 : vector<16x16x4xf32> to vector<256x4xf32>
    %c0_72 = arith.constant 0 : index
    %c8_73 = arith.constant 8 : index
    %54 = vector.load %arg10[%c0_72, %c8_73] : memref<256x36xf32, #tpu.memory_space<vmem>>, vector<256x4xf32>
    tpu.vector_store %arg10[%c0_72, %c8_73], %53 {strides = array<i32>} : memref<256x36xf32, #tpu.memory_space<vmem>>, vector<256x4xf32>,
    %c1_74 = arith.constant 1 : index
    %c0_75 = arith.constant 0 : index
    %c0_76 = arith.constant 0 : index
    %55 = vector.load %arg9[%c1_74, %c0_75, %c0_76] : memref<18x18x4xf32, #tpu.memory_space<vmem>>, vector<16x16x4xf32>
    %56 = vector.shape_cast %55 : vector<16x16x4xf32> to vector<256x4xf32>
    %c0_77 = arith.constant 0 : index
    %c12_78 = arith.constant 12 : index
    %57 = vector.load %arg10[%c0_77, %c12_78] : memref<256x36xf32, #tpu.memory_space<vmem>>, vector<256x4xf32>
    tpu.vector_store %arg10[%c0_77, %c12_78], %56 {strides = array<i32>} : memref<256x36xf32, #tpu.memory_space<vmem>>, vector<256x4xf32>,
    %c1_79 = arith.constant 1 : index
    %c1_80 = arith.constant 1 : index
    %c0_81 = arith.constant 0 : index
    %58 = vector.load %arg9[%c1_79, %c1_80, %c0_81] : memref<18x18x4xf32, #tpu.memory_space<vmem>>, vector<16x16x4xf32>
    %59 = vector.shape_cast %58 : vector<16x16x4xf32> to vector<256x4xf32>
    %c0_82 = arith.constant 0 : index
    %c16_83 = arith.constant 16 : index
    %60 = vector.load %arg10[%c0_82, %c16_83] : memref<256x36xf32, #tpu.memory_space<vmem>>, vector<256x4xf32>
    tpu.vector_store %arg10[%c0_82, %c16_83], %59 {strides = array<i32>} : memref<256x36xf32, #tpu.memory_space<vmem>>, vector<256x4xf32>,
    %c1_84 = arith.constant 1 : index
    %c2_85 = arith.constant 2 : index
    %c0_86 = arith.constant 0 : index
    %61 = vector.load %arg9[%c1_84, %c2_85, %c0_86] : memref<18x18x4xf32, #tpu.memory_space<vmem>>, vector<16x16x4xf32>
    %62 = vector.shape_cast %61 : vector<16x16x4xf32> to vector<256x4xf32>
    %c0_87 = arith.constant 0 : index
    %c20_88 = arith.constant 20 : index
    %63 = vector.load %arg10[%c0_87, %c20_88] : memref<256x36xf32, #tpu.memory_space<vmem>>, vector<256x4xf32>
    tpu.vector_store %arg10[%c0_87, %c20_88], %62 {strides = array<i32>} : memref<256x36xf32, #tpu.memory_space<vmem>>, vector<256x4xf32>,
    %c2_89 = arith.constant 2 : index
    %c0_90 = arith.constant 0 : index
    %c0_91 = arith.constant 0 : index
    %64 = vector.load %arg9[%c2_89, %c0_90, %c0_91] : memref<18x18x4xf32, #tpu.memory_space<vmem>>, vector<16x16x4xf32>
    %65 = vector.shape_cast %64 : vector<16x16x4xf32> to vector<256x4xf32>
    %c0_92 = arith.constant 0 : index
    %c24_93 = arith.constant 24 : index
    %66 = vector.load %arg10[%c0_92, %c24_93] : memref<256x36xf32, #tpu.memory_space<vmem>>, vector<256x4xf32>
    tpu.vector_store %arg10[%c0_92, %c24_93], %65 {strides = array<i32>} : memref<256x36xf32, #tpu.memory_space<vmem>>, vector<256x4xf32>,
    %c2_94 = arith.constant 2 : index
    %c1_95 = arith.constant 1 : index
    %c0_96 = arith.constant 0 : index
    %67 = vector.load %arg9[%c2_94, %c1_95, %c0_96] : memref<18x18x4xf32, #tpu.memory_space<vmem>>, vector<16x16x4xf32>
    %68 = vector.shape_cast %67 : vector<16x16x4xf32> to vector<256x4xf32>
    %c0_97 = arith.constant 0 : index
    %c28_98 = arith.constant 28 : index
    %69 = vector.load %arg10[%c0_97, %c28_98] : memref<256x36xf32, #tpu.memory_space<vmem>>, vector<256x4xf32>
    tpu.vector_store %arg10[%c0_97, %c28_98], %68 {strides = array<i32>} : memref<256x36xf32, #tpu.memory_space<vmem>>, vector<256x4xf32>,
    %c2_99 = arith.constant 2 : index
    %c2_100 = arith.constant 2 : index
    %c0_101 = arith.constant 0 : index
    %70 = vector.load %arg9[%c2_99, %c2_100, %c0_101] : memref<18x18x4xf32, #tpu.memory_space<vmem>>, vector<16x16x4xf32>
    %71 = vector.shape_cast %70 : vector<16x16x4xf32> to vector<256x4xf32>
    %c0_102 = arith.constant 0 : index
    %c32_103 = arith.constant 32 : index
    %72 = vector.load %arg10[%c0_102, %c32_103] : memref<256x36xf32, #tpu.memory_space<vmem>>, vector<256x4xf32>
    tpu.vector_store %arg10[%c0_102, %c32_103], %71 {strides = array<i32>} : memref<256x36xf32, #tpu.memory_space<vmem>>, vector<256x4xf32>,
    %c0_104 = arith.constant 0 : index
    %c0_105 = arith.constant 0 : index
    %73 = vector.load %arg5[%c0_104, %c0_105] : memref<4x36xf32, #tpu.memory_space<vmem>>, vector<4x36xf32>
    %c0_106 = arith.constant 0 : index
    %c0_107 = arith.constant 0 : index
    %74 = vector.load %arg10[%c0_106, %c0_107] : memref<256x36xf32, #tpu.memory_space<vmem>>, vector<256x36xf32>
    "tpu.trace_start"() <{level = 10 : i32, message = "ok,pk->op"}> : () -> ()
    %cst_108 = arith.constant dense<0.000000e+00> : vector<4x256xf32>
    %75 = tpu.matmul %73, %74, %cst_108 {dimension_numbers = #tpu.dot_dimension_numbers<[1], [1], [0], [0], [0, 0, 1, 0], [], []>} : vector<4x36xf32>, vector<256x36xf32>, vector<4x256xf32> -> vector<4x256xf32>
    "tpu.trace_stop"() : () -> ()
    %c0_109 = arith.constant 0 : index
    %c0_110 = arith.constant 0 : index
    %76 = vector.load %arg6[%c0_109, %c0_110] : memref<4x1xf32, #tpu.memory_space<vmem>>, vector<4x1xf32>
    %77 = vector.broadcast %76 : vector<4x1xf32> to vector<4x256xf32>
    %78 = arith.addf %75, %77 : vector<4x256xf32>
    %c0_111 = arith.constant 0 : index
    %c0_112 = arith.constant 0 : index
    %c0_113 = arith.constant 0 : index
    %79 = vector.load %arg2[%c0_111, %c0_112, %c0_113] : memref<1x4x256xf32, #tpu.memory_space<vmem>>, vector<1x4x256xf32>
    %80 = vector.shape_cast %79 : vector<1x4x256xf32> to vector<4x256xf32>
    %81 = arith.addf %78, %80 : vector<4x256xf32>
    %cst_114 = arith.constant 0.000000e+00 : f32
    %82 = vector.broadcast %cst_114 : f32 to vector<4x256xf32>
    %83 = arith.maximumf %81, %82 : vector<4x256xf32>
    %c0_115 = arith.constant 0 : index
    %c0_116 = arith.constant 0 : index
    %c0_117 = arith.constant 0 : index
    %84 = vector.load %arg7[%c0_115, %c0_116, %c0_117] : memref<1x4x256xf32, #tpu.memory_space<vmem>>, vector<1x4x256xf32>
    %85 = vector.shape_cast %84 : vector<1x4x256xf32> to vector<4x256xf32>
    %86 = vector.shape_cast %83 : vector<4x256xf32> to vector<1x4x256xf32>
    tpu.vector_store %arg7[%c0_115, %c0_116, %c0_117], %86 {strides = array<i32>} : memref<1x4x256xf32, #tpu.memory_space<vmem>>, vector<1x4x256xf32>,
    return
  }
  func.func @transform_0(%arg0: i32) -> (i32, i32, i32, i32) {
    %c0_i32 = arith.constant 0 : i32
    %c0_i32_0 = arith.constant 0 : i32
    %c0_i32_1 = arith.constant 0 : i32
    %c0_i32_2 = arith.constant 0 : i32
    return %arg0, %c0_i32, %c0_i32_0, %c0_i32_1 : i32, i32, i32, i32
  }
  func.func @transform_1(%arg0: i32) -> (i32, i32, i32) {
    %c0_i32 = arith.constant 0 : i32
    %c0_i32_0 = arith.constant 0 : i32
    %c0_i32_1 = arith.constant 0 : i32
    return %arg0, %c0_i32, %c0_i32_0 : i32, i32, i32
  }
  func.func @transform_2(%arg0: i32) -> (i32, i32) {
    %c0_i32 = arith.constant 0 : i32
    %c0_i32_0 = arith.constant 0 : i32
    %c0_i32_1 = arith.constant 0 : i32
    return %c0_i32, %c0_i32_0 : i32, i32
  }
  func.func @transform_3(%arg0: i32) -> (i32, i32) {
    %c0_i32 = arith.constant 0 : i32
    %c0_i32_0 = arith.constant 0 : i32
    %c0_i32_1 = arith.constant 0 : i32
    return %c0_i32, %c0_i32_0 : i32, i32
  }
  func.func @transform_4(%arg0: i32) -> (i32, i32) {
    %c0_i32 = arith.constant 0 : i32
    %c0_i32_0 = arith.constant 0 : i32
    %c0_i32_1 = arith.constant 0 : i32
    return %c0_i32, %c0_i32_0 : i32, i32
  }
  func.func @transform_5(%arg0: i32) -> (i32, i32) {
    %c0_i32 = arith.constant 0 : i32
    %c0_i32_0 = arith.constant 0 : i32
    %c0_i32_1 = arith.constant 0 : i32
    return %c0_i32, %c0_i32_0 : i32, i32
  }
  func.func @transform_6(%arg0: i32) -> (i32, i32, i32) {
    %c0_i32 = arith.constant 0 : i32
    %c0_i32_0 = arith.constant 0 : i32
    %c0_i32_1 = arith.constant 0 : i32
    return %arg0, %c0_i32, %c0_i32_0 : i32, i32, i32
  }
}

</mosaic_0001>

<bundles_post_ra>
// kernel: tpu_custom_call.1
= control target key start
LH: loop header
LB: loop body
LE: loop exit
PB: predicated region body
PF: predicated region fallthrough
CT: control target
= control target key end

     0   :  { %11 = vsyncpa [#allocation6], 0  ;;  %s7144_s0 = inlined_call_operand.vmem [shape: f32[2,16,16,4], index: 0, kind: input, shape index: {}]   ;;  %s7145_s1 = inlined_call_operand.vmem [shape: f32[2,4,256], index: 1, kind: input, shape index: {}]   ;;  %s7146_s2 = inlined_call_operand.vmem [shape: f32[36,4], index: 2, kind: input, shape index: {}]   ;;  %s7147_s3 = inlined_call_operand.vmem [shape: f32[1,4], index: 3, kind: input, shape index: {}]   ;;  %s7148_s4 = inlined_call_operand.vmem [shape: f32[4,36], index: 4, kind: input, shape index: {}]   ;;  %s7149_s5 = inlined_call_operand.vmem [shape: f32[4,1], index: 5, kind: input, shape index: {}]   ;;  %s7150_s6 = inlined_call_operand.hbm [shape: f32[2,4,256], index: 6, kind: output, shape index: {}]  }
   0x1   :  { %13 = vsyncpa [#allocation6 + $0x1], 0  ;;  %s4828_s21 = smov 0   ;;  %s4830_s22 = smov 0  }
   0x2   :  { %s4832_s23 = smov 0   ;;  %s4834_s24 = smov 0  }
   0x3 LB: > { %s4849_s25 = sadd.s32 4294967295, %s4780_s24   ;;  %s4398_s26 = sadd.s32 4294967294, %s4780_s24   ;;  %s4780_s24 = sphi %s4834_s24, %s7265_s24   ;;  %s4776_s23 = sphi %s4832_s23, %s7264_s23   ;;  %s4772_s22 = sphi %s4830_s22, %s7263_s22   ;;  %s4768_s21 = sphi %s4828_s21, %s7262_s21  }
   0x4   : > { %s4853_s27 = sadd.s32 1, %s4780_s24   ;;  %s162_s28 = sadd.s32 1, %s4776_s23 }
   0x5   : > { %s159_s29 = ssub.s32 %s4780_s24, %s4853_s27  ;;  %p172_p0 = scmp.ne.s32.totalorder %s4776_s23, %s4772_s22 }
   0x6   : > { %p160_p1 = scmp.eq.s32.totalorder %s159_s29, 0  ;;  %p173_p2 = scmp.eq.s32.totalorder %s4849_s25, 1 }
   0x7   : > { %p178_p3 = scmp.ne.s32.totalorder %s4772_s22, %s4768_s21  ;;  %p179_p4 = scmp.eq.s32.totalorder %s4398_s26, 1 }
   0x8   : > { %s4864_s30 = scalar_select %p160_p1, %s4776_s23, %s162_s28  }
   0x9   : > { %p4866_p5 = por %p173_p2, %p172_p0  ;;  %p4870_p6 = por %p179_p4, %p178_p3 }
   0xa   : > { %p4401_p7 = scmp.ge.s32.totalorder %s4780_s24, 1  ;;  %p225_p8 = scmp.lt.s32.totalorder %s4780_s24, 3 }
   0xc   : > { %p226_p9 = pnand %p4401_p7, %p225_p8 }
   0xe   : > { %229 = sbr.rel (%p226_p9) target bundleno = 1743 (0x6cf), region = 44 }
  0x15   : > { %vm270_vm0 = vcmask 31744   ;;  %p260_p10 = scmp.lt.s32.totalorder %s4849_s25, 1  ;;  %vm273_vm1 = vcmask 25600   ;;  %v4782_v0 = vmov 0.0   ;;  %s4783_s14 = smov 4   ;;  %vm615_vm2 = vcmask 64544  }
  0x16   : > { %271 = vst.msk [vmem:[#allocation2] sm:$0xff] %vm270_vm0, %v4782_v0  ;;  %272 = vst.msk [vmem:[#allocation2 + $0x8] sm:$0xff] %vm270_vm0, %v4782_v0  ;;  %s4784_s15 = smov 8   ;;  %s4785_s16 = smov 12   ;;  %vm808_vm3 = vcmask 97344   ;;  %vm1001_vm4 = vcmask 130144  }
  0x17   : > { %275 = vst.msk [vmem:[#allocation2 + $0x18] sm:$0xff] %vm270_vm0, %v4782_v0  ;;  %276 = vst.msk [vmem:[#allocation2 + $0x20] sm:$0xff] %vm270_vm0, %v4782_v0  ;;  %s5096_s9 = scalar_select %p260_p10, %s4849_s25, 1  ;;  %vm1194_vm5 = vcmask 162944   ;;  %vm2141_vm6 = vcmask 1043456   ;;  %vm1387_vm7 = vcmask 195744  }
  0x18   : > { %278 = vst.msk [vmem:[#allocation2 + $0x30] sm:$0xff] %vm270_vm0, %v4782_v0  ;;  %279 = vst.msk [vmem:[#allocation2 + $0x38] sm:$0xff] %vm270_vm0, %v4782_v0  ;;  %s4786_s17 = smov 16   ;;  %s4787_s18 = smov 20   ;;  %vm1581_vm8 = vcmask 228544   ;;  %vm1774_vm9 = vcmask 261344  }
  0x19   : > { %281 = vst.msk [vmem:[#allocation2 + $0x48] sm:$0xff] %vm270_vm0, %v4782_v0  ;;  %282 = vst.msk [vmem:[#allocation2 + $0x50] sm:$0xff] %vm270_vm0, %v4782_v0  ;;  %s4479_s10 = sshll.u32 %s5096_s9, 8  ;;  %s4788_s19 = smov 24   ;;  %vm1967_vm10 = vcmask 294144   ;;  %vm2044_vm11 = vcmask 293888  }
  0x1a   : > { %284 = vst.msk [vmem:[#allocation2 + $0x60] sm:$0xff] %vm270_vm0, %v4782_v0  ;;  %285 = vst.msk [vmem:[#allocation2 + $0x68] sm:$0xff] %vm270_vm0, %v4782_v0  ;;  %s5102_s13 = scalar_lea.vmem %s7144_s0, %s4479_s10  ;;  %s4789_s20 = smov 28  }
  0x1b   : > { %287 = vst.msk [vmem:[#allocation2 + $0x78] sm:$0xff] %vm270_vm0, %v4782_v0  ;;  %288 = vst.msk [vmem:[#allocation2 + $0x80] sm:$0xff] %vm270_vm0, %v4782_v0  ;;  %v326_v1 = vld [vmem:[%s5102_s13] sm:$0xff]  ;;  %v327_v2 = vld [vmem:[%s5102_s13 + $0x8] sm:$0xff]  ;;  %s4790_s29 = smov 32   ;;  %s4481_s28 = sshll.u32 %s4849_s25, 7 }
  0x1c   : > { %290 = vst.msk [vmem:[#allocation2 + $0x90] sm:$0xff] %vm270_vm0, %v4782_v0  ;;  %291 = vst.msk [vmem:[#allocation2 + $0x98] sm:$0xff] %vm270_vm0, %v4782_v0  ;;  %v328_v3 = vld [vmem:[%s5102_s13 + $0x10] sm:$0xff]  ;;  %v329_v4 = vld [vmem:[%s5102_s13 + $0x18] sm:$0xff]  ;;  %s4792_s25 = smov [#allocation5]  }
  0x1d   : > { %293 = vst.msk [vmem:[#allocation2 + $0xa8] sm:$0xff] %vm270_vm0, %v4782_v0  ;;  %294 = vst.msk [vmem:[#allocation2 + $0xb0] sm:$0xff] %vm270_vm0, %v4782_v0  ;;  %v330_v5 = vld [vmem:[%s5102_s13 + $0x20] sm:$0xff]  ;;  %v331_v6 = vld [vmem:[%s5102_s13 + $0x28] sm:$0xff] }
  0x1e   : > { %296 = vst.msk [vmem:[#allocation2 + $0xc0] sm:$0xff] %vm270_vm0, %v4782_v0  ;;  %297 = vst.msk [vmem:[#allocation2 + $0xc8] sm:$0xff] %vm270_vm0, %v4782_v0  ;;  %v455_v7 = vld [vmem:[#allocation2 + $0x1] sm:$0xff]  ;;  %v332_v9 = vld [vmem:[%s5102_s13 + $0x30] sm:$0xff] }
  0x1f   : > { %299 = vst.msk [vmem:[#allocation2 + $0xd8] sm:$0xff] %vm270_vm0, %v4782_v0  ;;  %300 = vst.msk [vmem:[#allocation2 + $0xe0] sm:$0xff] %vm270_vm0, %v4782_v0  ;;  %519 = vrot.lane.b32.xlu0 %v455_v7, %s4783_s14  ;;  %v333_v10 = vld [vmem:[%s5102_s13 + $0x38] sm:$0xff]  ;;  %v334_v11 = vld [vmem:[%s5102_s13 + $0x40] sm:$0xff] }
  0x20   : > { %302 = vst.msk [vmem:[#allocation2 + $0xf0] sm:$0xff] %vm270_vm0, %v4782_v0  ;;  %303 = vst.msk [vmem:[#allocation2 + $0xf8] sm:$0xff] %vm270_vm0, %v4782_v0  ;;  %v335_v12 = vld [vmem:[%s5102_s13 + $0x48] sm:$0xff]  ;;  %v336_v13 = vld [vmem:[%s5102_s13 + $0x50] sm:$0xff] }
  0x21   : > { %305 = vst.msk [vmem:[#allocation2 + $0x108] sm:$0xff] %vm270_vm0, %v4782_v0  ;;  %306 = vst.msk [vmem:[#allocation2 + $0x110] sm:$0xff] %vm270_vm0, %v4782_v0  ;;  %v337_v14 = vld [vmem:[%s5102_s13 + $0x58] sm:$0xff]  ;;  %v338_v15 = vld [vmem:[%s5102_s13 + $0x60] sm:$0xff] }
  0x22   : > { %308 = vst.msk [vmem:[#allocation2 + $0x120] sm:$0xff] %vm270_vm0, %v4782_v0  ;;  %309 = vst.msk [vmem:[#allocation2 + $0x128] sm:$0xff] %vm270_vm0, %v4782_v0  ;;  %v339_v16 = vld [vmem:[%s5102_s13 + $0x68] sm:$0xff]  ;;  %v340_v17 = vld [vmem:[%s5102_s13 + $0x70] sm:$0xff] }
  0x23   : > { %311 = vst.msk [vmem:[#allocation2 + $0x138] sm:$0xff] %vm270_vm0, %v4782_v0  ;;  %312 = vst.msk [vmem:[#allocation2 + $0x140] sm:$0xff] %vm270_vm0, %v4782_v0  ;;  %v341_v18 = vld [vmem:[%s5102_s13 + $0x78] sm:$0xff]  ;;  %v342_v19 = vld [vmem:[%s5102_s13 + $0x80] sm:$0xff] }
  0x24   : > { %314 = vst.msk [vmem:[#allocation2 + $0x150] sm:$0xff] %vm270_vm0, %v4782_v0  ;;  %315 = vst.msk [vmem:[#allocation2 + $0x158] sm:$0xff] %vm270_vm0, %v4782_v0  ;;  %v343_v20 = vld [vmem:[%s5102_s13 + $0x88] sm:$0xff]  ;;  %v344_v21 = vld [vmem:[%s5102_s13 + $0x90] sm:$0xff] }
  0x25   : > { %317 = vst.msk [vmem:[#allocation2 + $0x168] sm:$0xff] %vm270_vm0, %v4782_v0  ;;  %318 = vst.msk [vmem:[#allocation2 + $0x170] sm:$0xff] %vm270_vm0, %v4782_v0  ;;  %v345_v22 = vld [vmem:[%s5102_s13 + $0x98] sm:$0xff]  ;;  %v346_v23 = vld [vmem:[%s5102_s13 + $0xa0] sm:$0xff] }
  0x26   : > { %320 = vst.msk [vmem:[#allocation2 + $0x180] sm:$0xff] %vm270_vm0, %v4782_v0  ;;  %321 = vst.msk [vmem:[#allocation2 + $0x188] sm:$0xff] %vm270_vm0, %v4782_v0  ;;  %v347_v24 = vld [vmem:[%s5102_s13 + $0xa8] sm:$0xff]  ;;  %v348_v28 = vld [vmem:[%s5102_s13 + $0xb0] sm:$0xff] }
  0x27   : > { %323 = vst.msk [vmem:[#allocation2 + $0x198] sm:$0xff] %vm270_vm0, %v4782_v0  ;;  %324 = vst.msk [vmem:[#allocation2 + $0x1a0] sm:$0xff] %vm270_vm0, %v4782_v0  ;;  %v349_v29 = vld [vmem:[%s5102_s13 + $0xb8] sm:$0xff]  ;;  %v350_v33 = vld [vmem:[%s5102_s13 + $0xc0] sm:$0xff] }
  0x28   : > { %2402 = vst.msk [vmem:[#allocation3] sm:$0xff] %vm270_vm0, %v4782_v0  ;;  %2403 = vst.msk [vmem:[#allocation3 + $0x8] sm:$0xff] %vm270_vm0, %v4782_v0  ;;  %v351_v34 = vld [vmem:[%s5102_s13 + $0xc8] sm:$0xff]  ;;  %v352_v35 = vld [vmem:[%s5102_s13 + $0xd0] sm:$0xff] }
  0x29   : > { %2405 = vst.msk [vmem:[#allocation3 + $0x18] sm:$0xff] %vm270_vm0, %v4782_v0  ;;  %2406 = vst.msk [vmem:[#allocation3 + $0x20] sm:$0xff] %vm270_vm0, %v4782_v0  ;;  %v353_v36 = vld [vmem:[%s5102_s13 + $0xd8] sm:$0xff]  ;;  %v354_v37 = vld [vmem:[%s5102_s13 + $0xe0] sm:$0xff] }
  0x2a   : > { %2408 = vst.msk [vmem:[#allocation3 + $0x30] sm:$0xff] %vm270_vm0, %v4782_v0  ;;  %2409 = vst.msk [vmem:[#allocation3 + $0x38] sm:$0xff] %vm270_vm0, %v4782_v0  ;;  %v355_v38 = vld [vmem:[%s5102_s13 + $0xe8] sm:$0xff]  ;;  %v391_v45 = vld [vmem:[#allocation2] sm:$0xff] }
  0x2b   : > { %2411 = vst.msk [vmem:[#allocation3 + $0x48] sm:$0xff] %vm270_vm0, %v4782_v0  ;;  %2412 = vst.msk [vmem:[#allocation3 + $0x50] sm:$0xff] %vm270_vm0, %v4782_v0  ;;  %v392_v48 = vld [vmem:[#allocation2 + $0x8] sm:$0xff] }
  0x2c   : > { %2414 = vst.msk [vmem:[#allocation3 + $0x60] sm:$0xff] %vm270_vm0, %v4782_v0  ;;  %2415 = vst.msk [vmem:[#allocation3 + $0x68] sm:$0xff] %vm270_vm0, %v4782_v0 }
  0x2d   : > { %2417 = vst.msk [vmem:[#allocation3 + $0x78] sm:$0xff] %vm270_vm0, %v4782_v0  ;;  %2418 = vst.msk [vmem:[#allocation3 + $0x80] sm:$0xff] %vm270_vm0, %v4782_v0 }
  0x2e   : > { %2420 = vst.msk [vmem:[#allocation3 + $0x90] sm:$0xff] %vm270_vm0, %v4782_v0  ;;  %2421 = vst.msk [vmem:[#allocation3 + $0x98] sm:$0xff] %vm270_vm0, %v4782_v0 }
  0x2f   : > { %2423 = vst.msk [vmem:[#allocation3 + $0xa8] sm:$0xff] %vm270_vm0, %v4782_v0  ;;  %2424 = vst.msk [vmem:[#allocation3 + $0xb0] sm:$0xff] %vm270_vm0, %v4782_v0 }
  0x30   : > { %2426 = vst.msk [vmem:[#allocation3 + $0xc0] sm:$0xff] %vm270_vm0, %v4782_v0  ;;  %2427 = vst.msk [vmem:[#allocation3 + $0xc8] sm:$0xff] %vm270_vm0, %v4782_v0 }
  0x31   : > { %2429 = vst.msk [vmem:[#allocation3 + $0xd8] sm:$0xff] %vm270_vm0, %v4782_v0  ;;  %2430 = vst.msk [vmem:[#allocation3 + $0xe0] sm:$0xff] %vm270_vm0, %v4782_v0 }
  0x32   : > { %2432 = vst.msk [vmem:[#allocation3 + $0xf0] sm:$0xff] %vm270_vm0, %v4782_v0  ;;  %2433 = vst.msk [vmem:[#allocation3 + $0xf8] sm:$0xff] %vm270_vm0, %v4782_v0 }
  0x33   : > { %2435 = vst.msk [vmem:[#allocation3 + $0x108] sm:$0xff] %vm270_vm0, %v4782_v0  ;;  %2436 = vst.msk [vmem:[#allocation3 + $0x110] sm:$0xff] %vm270_vm0, %v4782_v0 }
  0x34   : > { %2438 = vst.msk [vmem:[#allocation3 + $0x120] sm:$0xff] %vm270_vm0, %v4782_v0  ;;  %2439 = vst.msk [vmem:[#allocation3 + $0x128] sm:$0xff] %vm270_vm0, %v4782_v0 }
  0x35   : > { %2441 = vst.msk [vmem:[#allocation3 + $0x138] sm:$0xff] %vm270_vm0, %v4782_v0  ;;  %2442 = vst.msk [vmem:[#allocation3 + $0x140] sm:$0xff] %vm270_vm0, %v4782_v0 }
  0x36   : > { %2444 = vst.msk [vmem:[#allocation3 + $0x150] sm:$0xff] %vm270_vm0, %v4782_v0  ;;  %2445 = vst.msk [vmem:[#allocation3 + $0x158] sm:$0xff] %vm270_vm0, %v4782_v0 }
  0x37   : > { %2447 = vst.msk [vmem:[#allocation3 + $0x168] sm:$0xff] %vm270_vm0, %v4782_v0  ;;  %2448 = vst.msk [vmem:[#allocation3 + $0x170] sm:$0xff] %vm270_vm0, %v4782_v0 }
  0x38   : > { %2450 = vst.msk [vmem:[#allocation3 + $0x180] sm:$0xff] %vm270_vm0, %v4782_v0  ;;  %2451 = vst.msk [vmem:[#allocation3 + $0x188] sm:$0xff] %vm270_vm0, %v4782_v0 }
  0x39   : > { %2453 = vst.msk [vmem:[#allocation3 + $0x198] sm:$0xff] %vm270_vm0, %v4782_v0  ;;  %2454 = vst.msk [vmem:[#allocation3 + $0x1a0] sm:$0xff] %vm270_vm0, %v4782_v0 }
  0x3a   : > { %274 = vst.msk [vmem:[#allocation2 + $0x10] sm:$0x3] %vm273_vm1, %v4782_v0  ;;  %277 = vst.msk [vmem:[#allocation2 + $0x28] sm:$0x3] %vm273_vm1, %v4782_v0 }
  0x3b   : > { %280 = vst.msk [vmem:[#allocation2 + $0x40] sm:$0x3] %vm273_vm1, %v4782_v0  ;;  %283 = vst.msk [vmem:[#allocation2 + $0x58] sm:$0x3] %vm273_vm1, %v4782_v0 }
  0x3c   : > { %286 = vst.msk [vmem:[#allocation2 + $0x70] sm:$0x3] %vm273_vm1, %v4782_v0  ;;  %289 = vst.msk [vmem:[#allocation2 + $0x88] sm:$0x3] %vm273_vm1, %v4782_v0 }
  0x3d   : > { %292 = vst.msk [vmem:[#allocation2 + $0xa0] sm:$0x3] %vm273_vm1, %v4782_v0  ;;  %295 = vst.msk [vmem:[#allocation2 + $0xb8] sm:$0x3] %vm273_vm1, %v4782_v0 }
  0x3e   : > { %298 = vst.msk [vmem:[#allocation2 + $0xd0] sm:$0x3] %vm273_vm1, %v4782_v0  ;;  %301 = vst.msk [vmem:[#allocation2 + $0xe8] sm:$0x3] %vm273_vm1, %v4782_v0 }
  0x3f   : > { %304 = vst.msk [vmem:[#allocation2 + $0x100] sm:$0x3] %vm273_vm1, %v4782_v0  ;;  %307 = vst.msk [vmem:[#allocation2 + $0x118] sm:$0x3] %vm273_vm1, %v4782_v0 }
  0x40   : > { %310 = vst.msk [vmem:[#allocation2 + $0x130] sm:$0x3] %vm273_vm1, %v4782_v0  ;;  %313 = vst.msk [vmem:[#allocation2 + $0x148] sm:$0x3] %vm273_vm1, %v4782_v0 }
  0x41   : > { %316 = vst.msk [vmem:[#allocation2 + $0x160] sm:$0x3] %vm273_vm1, %v4782_v0  ;;  %319 = vst.msk [vmem:[#allocation2 + $0x178] sm:$0x3] %vm273_vm1, %v4782_v0  ;;  %v456_v8 = vld [vmem:[#allocation2 + $0x9] sm:$0xff] }
  0x42   : > { %322 = vst.msk [vmem:[#allocation2 + $0x190] sm:$0x3] %vm273_vm1, %v4782_v0  ;;  %325 = vst.msk [vmem:[#allocation2 + $0x1a8] sm:$0x3] %vm273_vm1, %v4782_v0  ;;  %521 = vrot.lane.b32.xlu0 %v456_v8, %s4783_s14 }
  0x43   : > { %2404 = vst.msk [vmem:[#allocation3 + $0x10] sm:$0x3] %vm273_vm1, %v4782_v0  ;;  %2407 = vst.msk [vmem:[#allocation3 + $0x28] sm:$0x3] %vm273_vm1, %v4782_v0 }
  0x44   : > { %2410 = vst.msk [vmem:[#allocation3 + $0x40] sm:$0x3] %vm273_vm1, %v4782_v0  ;;  %2413 = vst.msk [vmem:[#allocation3 + $0x58] sm:$0x3] %vm273_vm1, %v4782_v0 }
  0x45   : > { %2416 = vst.msk [vmem:[#allocation3 + $0x70] sm:$0x3] %vm273_vm1, %v4782_v0  ;;  %2419 = vst.msk [vmem:[#allocation3 + $0x88] sm:$0x3] %vm273_vm1, %v4782_v0 }
  0x46   : > { %2422 = vst.msk [vmem:[#allocation3 + $0xa0] sm:$0x3] %vm273_vm1, %v4782_v0  ;;  %2425 = vst.msk [vmem:[#allocation3 + $0xb8] sm:$0x3] %vm273_vm1, %v4782_v0 }
  0x47   : > { %2428 = vst.msk [vmem:[#allocation3 + $0xd0] sm:$0x3] %vm273_vm1, %v4782_v0  ;;  %2431 = vst.msk [vmem:[#allocation3 + $0xe8] sm:$0x3] %vm273_vm1, %v4782_v0 }
  0x48   : > { %2434 = vst.msk [vmem:[#allocation3 + $0x100] sm:$0x3] %vm273_vm1, %v4782_v0  ;;  %2437 = vst.msk [vmem:[#allocation3 + $0x118] sm:$0x3] %vm273_vm1, %v4782_v0 }
  0x49   : > { %2440 = vst.msk [vmem:[#allocation3 + $0x130] sm:$0x3] %vm273_vm1, %v4782_v0  ;;  %2443 = vst.msk [vmem:[#allocation3 + $0x148] sm:$0x3] %vm273_vm1, %v4782_v0 }
  0x4a   : > { %2446 = vst.msk [vmem:[#allocation3 + $0x160] sm:$0x3] %vm273_vm1, %v4782_v0  ;;  %2449 = vst.msk [vmem:[#allocation3 + $0x178] sm:$0x3] %vm273_vm1, %v4782_v0 }
  0x4b   : > { %2452 = vst.msk [vmem:[#allocation3 + $0x190] sm:$0x3] %vm273_vm1, %v4782_v0  ;;  %2455 = vst.msk [vmem:[#allocation3 + $0x1a8] sm:$0x3] %vm273_vm1, %v4782_v0 }
  0x4c   : > { %359 = vst.msk [vmem:[#allocation2 + $0x19] sm:$0xff] %vm270_vm0, %v326_v1  ;;  %360 = vst.msk [vmem:[#allocation2 + $0x21] sm:$0xff] %vm270_vm0, %v327_v2 }
  0x4d   : > { %361 = vst.msk [vmem:[#allocation2 + $0x31] sm:$0xff] %vm270_vm0, %v328_v3  ;;  %362 = vst.msk [vmem:[#allocation2 + $0x39] sm:$0xff] %vm270_vm0, %v329_v4 }
  0x4e   : > { %363 = vst.msk [vmem:[#allocation2 + $0x49] sm:$0xff] %vm270_vm0, %v330_v5  ;;  %364 = vst.msk [vmem:[#allocation2 + $0x51] sm:$0xff] %vm270_vm0, %v331_v6 }
  0x4f   : > { %365 = vst.msk [vmem:[#allocation2 + $0x61] sm:$0xff] %vm270_vm0, %v332_v9  ;;  %366 = vst.msk [vmem:[#allocation2 + $0x69] sm:$0xff] %vm270_vm0, %v333_v10 }
  0x50   : > { %367 = vst.msk [vmem:[#allocation2 + $0x79] sm:$0xff] %vm270_vm0, %v334_v11  ;;  %368 = vst.msk [vmem:[#allocation2 + $0x81] sm:$0xff] %vm270_vm0, %v335_v12 }
  0x51   : > { %369 = vst.msk [vmem:[#allocation2 + $0x91] sm:$0xff] %vm270_vm0, %v336_v13  ;;  %370 = vst.msk [vmem:[#allocation2 + $0x99] sm:$0xff] %vm270_vm0, %v337_v14 }
  0x52   : > { %371 = vst.msk [vmem:[#allocation2 + $0xa9] sm:$0xff] %vm270_vm0, %v338_v15  ;;  %372 = vst.msk [vmem:[#allocation2 + $0xb1] sm:$0xff] %vm270_vm0, %v339_v16 }
  0x53   : > { %373 = vst.msk [vmem:[#allocation2 + $0xc1] sm:$0xff] %vm270_vm0, %v340_v17  ;;  %374 = vst.msk [vmem:[#allocation2 + $0xc9] sm:$0xff] %vm270_vm0, %v341_v18  ;;  %v5147_v25 = vld [vmem:[#allocation2 + $0x19] sm:$0xff]  ;;  %v5156_v27 = vld [vmem:[#allocation2 + $0x21] sm:$0xff] }
  0x54   : > { %375 = vst.msk [vmem:[#allocation2 + $0xd9] sm:$0xff] %vm270_vm0, %v342_v19  ;;  %376 = vst.msk [vmem:[#allocation2 + $0xe1] sm:$0xff] %vm270_vm0, %v343_v20  ;;  %v5149_v26 = vld [vmem:[#allocation2 + $0x31] sm:$0xff]  ;;  %523 = vrot.lane.b32.xlu1 %v5147_v25, %s4783_s14  ;;  %v5168_v31 = vld [vmem:[#allocation2 + $0x39] sm:$0xff] }
  0x55   : > { %377 = vst.msk [vmem:[#allocation2 + $0xf1] sm:$0xff] %vm270_vm0, %v344_v21  ;;  %378 = vst.msk [vmem:[#allocation2 + $0xf9] sm:$0xff] %vm270_vm0, %v345_v22  ;;  %527 = vrot.lane.b32.xlu0 %v5149_v26, %s4783_s14  ;;  %v5164_v30 = vld [vmem:[#allocation2 + $0x49] sm:$0xff]  ;;  %v5185_v39 = vld [vmem:[#allocation2 + $0x51] sm:$0xff] }
  0x56   : > { %379 = vst.msk [vmem:[#allocation2 + $0x109] sm:$0xff] %vm270_vm0, %v346_v23  ;;  %380 = vst.msk [vmem:[#allocation2 + $0x111] sm:$0xff] %vm270_vm0, %v347_v24  ;;  %v5172_v32 = vld [vmem:[#allocation2 + $0x61] sm:$0xff]  ;;  %v5196_v41 = vld [vmem:[#allocation2 + $0x69] sm:$0xff] }
  0x57   : > { %381 = vst.msk [vmem:[#allocation2 + $0x121] sm:$0xff] %vm270_vm0, %v348_v28  ;;  %382 = vst.msk [vmem:[#allocation2 + $0x129] sm:$0xff] %vm270_vm0, %v349_v29  ;;  %v5192_v40 = vld [vmem:[#allocation2 + $0x79] sm:$0xff]  ;;  %v5204_v43 = vld [vmem:[#allocation2 + $0x81] sm:$0xff] }
  0x58   : > { %525 = vrot.lane.b32.xlu1 %v5156_v27, %s4783_s14  ;;  %383 = vst.msk [vmem:[#allocation2 + $0x139] sm:$0xff] %vm270_vm0, %v350_v33  ;;  %384 = vst.msk [vmem:[#allocation2 + $0x141] sm:$0xff] %vm270_vm0, %v351_v34  ;;  %v5200_v42 = vld [vmem:[#allocation2 + $0x91] sm:$0xff]  ;;  %v5214_v47 = vld [vmem:[#allocation2 + $0x99] sm:$0xff] }
  0x59   : > { %531 = vrot.lane.b32.xlu0 %v5164_v30, %s4783_s14  ;;  %385 = vst.msk [vmem:[#allocation2 + $0x151] sm:$0xff] %vm270_vm0, %v352_v35  ;;  %386 = vst.msk [vmem:[#allocation2 + $0x159] sm:$0xff] %vm270_vm0, %v353_v36  ;;  %v5208_v44 = vld [vmem:[#allocation2 + $0xa9] sm:$0xff]  ;;  %v5212_v46 = vld [vmem:[#allocation2 + $0x18] sm:$0xff] }
  0x5a   : > { %387 = vst.msk [vmem:[#allocation2 + $0x169] sm:$0xff] %vm270_vm0, %v354_v37  ;;  %388 = vst.msk [vmem:[#allocation2 + $0x171] sm:$0xff] %vm270_vm0, %v355_v38  ;;  %v5222_v49 = vld [vmem:[#allocation2 + $0x20] sm:$0xff]  ;;  %v5228_v51 = vld [vmem:[#allocation2 + $0x30] sm:$0xff] }
  0x5b   : > { %423 = vst.msk [vmem:[#allocation4] sm:$0xff] %vm270_vm0, %v391_v45  ;;  %425 = vst.msk [vmem:[#allocation4 + $0x10] sm:$0xff] %vm270_vm0, %v5212_v46  ;;  %v5224_v50 = vld [vmem:[#allocation2 + $0xc1] sm:$0xff]  ;;  %v5230_v52 = vld [vmem:[#allocation2 + $0x38] sm:$0xff] }
  0x5c   : > { %529 = vrot.lane.b32.xlu1 %v5168_v31, %s4783_s14  ;;  %424 = vst.msk [vmem:[#allocation4 + $0x8] sm:$0xff] %vm270_vm0, %v392_v48  ;;  %426 = vst.msk [vmem:[#allocation4 + $0x18] sm:$0xff] %vm270_vm0, %v5222_v49  ;;  %v5234_v53 = vld [vmem:[#allocation2 + $0xb1] sm:$0xff]  ;;  %v5240_v54 = vld [vmem:[#allocation2 + $0x48] sm:$0xff] }
  0x5d   : > { %535 = vrot.lane.b32.xlu0 %v5172_v32, %s4783_s14  ;;  %427 = vst.msk [vmem:[#allocation4 + $0x20] sm:$0xff] %vm270_vm0, %v5228_v51  ;;  %428 = vst.msk [vmem:[#allocation4 + $0x28] sm:$0xff] %vm270_vm0, %v5230_v52  ;;  %v5242_v55 = vld [vmem:[#allocation2 + $0x50] sm:$0xff]  ;;  %v5244_v56 = vld [vmem:[#allocation2 + $0xd9] sm:$0xff] }
  0x5e   : > { %429 = vst.msk [vmem:[#allocation4 + $0x30] sm:$0xff] %vm270_vm0, %v5240_v54  ;;  %430 = vst.msk [vmem:[#allocation4 + $0x38] sm:$0xff] %vm270_vm0, %v5242_v55  ;;  %v5250_v57 = vld [vmem:[#allocation2 + $0x60] sm:$0xff]  ;;  %v5252_v58 = vld [vmem:[#allocation2 + $0x68] sm:$0xff] }
  0x5f   : > { %v5254_v59 = vld [vmem:[#allocation2 + $0x78] sm:$0xff]  ;;  %431 = vst.msk [vmem:[#allocation4 + $0x40] sm:$0xff] %vm270_vm0, %v5250_v57  ;;  %432 = vst.msk [vmem:[#allocation4 + $0x48] sm:$0xff] %vm270_vm0, %v5252_v58  ;;  %v5264_v60 = vld [vmem:[#allocation2 + $0x80] sm:$0xff] }
  0x60   : > { %533 = vrot.lane.b32.xlu1 %v5185_v39, %s4783_s14  ;;  %433 = vst.msk [vmem:[#allocation4 + $0x50] sm:$0xff] %vm270_vm0, %v5254_v59  ;;  %v5266_v61 = vld [vmem:[#allocation2 + $0x90] sm:$0xff]  ;;  %v5268_v62 = vld [vmem:[#allocation2 + $0x98] sm:$0xff]  ;;  %434 = vst.msk [vmem:[#allocation4 + $0x58] sm:$0xff] %vm270_vm0, %v5264_v60 }
  0x61   : > { %539 = vrot.lane.b32.xlu0 %v5192_v40, %s4783_s14  ;;  %v5270_v63 = vld [vmem:[#allocation2 + $0xc9] sm:$0xff]  ;;  %435 = vst.msk [vmem:[#allocation4 + $0x60] sm:$0xff] %vm270_vm0, %v5266_v61  ;;  %436 = vst.msk [vmem:[#allocation4 + $0x68] sm:$0xff] %vm270_vm0, %v5268_v62  ;;  %v5282_v2 = vld [vmem:[#allocation2 + $0xc0] sm:$0xff] }
  0x62   : > { %v5278_v0 = vld [vmem:[#allocation2 + $0xa8] sm:$0xff]  ;;  %v5280_v1 = vld [vmem:[#allocation2 + $0xb0] sm:$0xff]  ;;  %439 = vst.msk [vmem:[#allocation4 + $0x80] sm:$0xff] %vm270_vm0, %v5282_v2  ;;  %v5294_v4 = vld [vmem:[#allocation2 + $0xd8] sm:$0xff] }
  0x63   : > { %437 = vst.msk [vmem:[#allocation4 + $0x70] sm:$0xff] %vm270_vm0, %v5278_v0  ;;  %438 = vst.msk [vmem:[#allocation4 + $0x78] sm:$0xff] %vm270_vm0, %v5280_v1  ;;  %v5292_v3 = vld [vmem:[#allocation2 + $0xc8] sm:$0xff]  ;;  %v5296_v5 = vld [vmem:[#allocation2 + $0xe0] sm:$0xff] }
  0x64   : > { %537 = vrot.lane.b32.xlu1 %v5196_v41, %s4783_s14  ;;  %440 = vst.msk [vmem:[#allocation4 + $0x88] sm:$0xff] %vm270_vm0, %v5292_v3  ;;  %441 = vst.msk [vmem:[#allocation4 + $0x90] sm:$0xff] %vm270_vm0, %v5294_v4  ;;  %v5304_v6 = vld [vmem:[#allocation2 + $0xf0] sm:$0xff]  ;;  %v5306_v7 = vld [vmem:[#allocation2 + $0xf8] sm:$0xff] }
  0x65   : > { %543 = vrot.lane.b32.xlu0 %v5200_v42, %s4783_s14  ;;  %442 = vst.msk [vmem:[#allocation4 + $0x98] sm:$0xff] %vm270_vm0, %v5296_v5  ;;  %v5308_v8 = vld [vmem:[#allocation2 + $0x108] sm:$0xff]  ;;  %443 = vst.msk [vmem:[#allocation4 + $0xa0] sm:$0xff] %vm270_vm0, %v5304_v6  ;;  %v5318_v9 = vld [vmem:[#allocation2 + $0x110] sm:$0xff] }
  0x66   : > { %444 = vst.msk [vmem:[#allocation4 + $0xa8] sm:$0xff] %vm270_vm0, %v5306_v7  ;;  %445 = vst.msk [vmem:[#allocation4 + $0xb0] sm:$0xff] %vm270_vm0, %v5308_v8  ;;  %v5320_v10 = vld [vmem:[#allocation2 + $0xf1] sm:$0xff]  ;;  %v5326_v11 = vld [vmem:[#allocation2 + $0x120] sm:$0xff] }
  0x67   : > { %446 = vst.msk [vmem:[#allocation4 + $0xb8] sm:$0xff] %vm270_vm0, %v5318_v9  ;;  %v5328_v12 = vld [vmem:[#allocation2 + $0x128] sm:$0xff]  ;;  %447 = vst.msk [vmem:[#allocation4 + $0xc0] sm:$0xff] %vm270_vm0, %v5326_v11  ;;  %v5342_v15 = vld [vmem:[#allocation2 + $0x138] sm:$0xff] }
  0x68   : > { %541 = vrot.lane.b32.xlu1 %v5204_v43, %s4783_s14  ;;  %v5330_v13 = vld [vmem:[#allocation2 + $0xe1] sm:$0xff]  ;;  %448 = vst.msk [vmem:[#allocation4 + $0xc8] sm:$0xff] %vm270_vm0, %v5328_v12  ;;  %v5338_v14 = vld [vmem:[#allocation2 + $0x109] sm:$0xff]  ;;  %v5346_v17 = vld [vmem:[#allocation2 + $0xf9] sm:$0xff] }
  0x69   : > { %547 = vrot.lane.b32.xlu0 %v5208_v44, %s4783_s14  ;;  %v5344_v16 = vld [vmem:[#allocation2 + $0x140] sm:$0xff]  ;;  %449 = vst.msk [vmem:[#allocation4 + $0xd0] sm:$0xff] %vm270_vm0, %v5342_v15  ;;  %v5358_v19 = vld [vmem:[#allocation2 + $0x150] sm:$0xff]  ;;  %v5360_v20 = vld [vmem:[#allocation2 + $0x158] sm:$0xff] }
  0x6a   : > { %450 = vst.msk [vmem:[#allocation4 + $0xd8] sm:$0xff] %vm270_vm0, %v5344_v16  ;;  %v5354_v18 = vld [vmem:[#allocation2 + $0x121] sm:$0xff]  ;;  %v5362_v21 = vld [vmem:[#allocation2 + $0x111] sm:$0xff]  ;;  %451 = vst.msk [vmem:[#allocation4 + $0xe0] sm:$0xff] %vm270_vm0, %v5358_v19 }
  0x6b   : > { %452 = vst.msk [vmem:[#allocation4 + $0xe8] sm:$0xff] %vm270_vm0, %v5360_v20  ;;  %v5370_v22 = vld [vmem:[#allocation2 + $0x139] sm:$0xff]  ;;  %v5374_v23 = vld [vmem:[#allocation2 + $0x168] sm:$0xff]  ;;  %v5376_v24 = vld [vmem:[#allocation2 + $0x170] sm:$0xff] }
  0x6c   : > { %545 = vrot.lane.b32.xlu1 %v5214_v47, %s4783_s14  ;;  %v5378_v28 = vld [vmem:[#allocation2 + $0x129] sm:$0xff]  ;;  %453 = vst.msk [vmem:[#allocation4 + $0xf0] sm:$0xff] %vm270_vm0, %v5374_v23  ;;  %454 = vst.msk [vmem:[#allocation4 + $0xf8] sm:$0xff] %vm270_vm0, %v5376_v24  ;;  %v5386_v29 = vld [vmem:[#allocation2 + $0x151] sm:$0xff] }
  0x6d   : > { %551 = vrot.lane.b32.xlu0 %v5224_v50, %s4783_s14  ;;  %v5390_v33 = vld [vmem:[#allocation2 + $0x141] sm:$0xff]  ;;  %v356_v34 = vld [vmem:[%s5102_s13 + $0xf0] sm:$0xff]  ;;  %v357_v36 = vld [vmem:[%s5102_s13 + $0xf8] sm:$0xff] }
  0x6e   : > { %7190 = vst [vmem:[#allocation8_spill] sm:$0xff] %v5390_v33  ;;  %v5395_v35 = vld [vmem:[#allocation2 + $0x169] sm:$0xff]  ;;  %389 = vst.msk [vmem:[#allocation2 + $0x181] sm:$0xff] %vm270_vm0, %v356_v34  ;;  %v5402_v37 = vld [vmem:[#allocation2 + $0x159] sm:$0xff] }
  0x6f   : > { %7191 = vst [vmem:[#allocation9_spill] sm:$0xff] %v5395_v35  ;;  %390 = vst.msk [vmem:[#allocation2 + $0x189] sm:$0xff] %vm270_vm0, %v357_v36  ;;  %v648_v38 = vld [vmem:[#allocation2 + $0x2] sm:$0xff]  ;;  %v5408_v45 = vld [vmem:[#allocation2 + $0x171] sm:$0xff] }
  0x70   : > { %549 = vrot.lane.b32.xlu1 %v5234_v53, %s4783_s14  ;;  %7192 = vst [vmem:[#allocation10_spill] sm:$0xff] %v5402_v37  ;;  %7193 = vst [vmem:[#allocation11_spill] sm:$0xff] %v5408_v45  ;;  %v5411_v48 = vld [vmem:[#allocation2 + $0x1a] sm:$0xff]  ;;  %v649_v34 = vld [vmem:[#allocation2 + $0xa] sm:$0xff] }
  0x71   : > { %555 = vrot.lane.b32.xlu0 %v5244_v56, %s4783_s14  ;;  %7194 = vst [vmem:[#allocation12_spill] sm:$0xff] %v5411_v48  ;;  %v5417_v36 = vld [vmem:[#allocation2 + $0x32] sm:$0xff]  ;;  %vm6781_vm12 = vmpackc.low %vm2044_vm11, %vm2044_vm11 }
  0x72   : > { %7195 = vst [vmem:[#allocation13_spill] sm:$0xff] %v5417_v36 }
  0x74   : > { %553 = vrot.lane.b32.xlu1 %v5270_v63, %s4783_s14 }
  0x75   : > { %559 = vrot.lane.b32.xlu0 %v5320_v10, %s4783_s14 }
  0x78   : > { %557 = vrot.lane.b32.xlu1 %v5330_v13, %s4783_s14 }
  0x79   : > { %563 = vrot.lane.b32.xlu0 %v5338_v14, %s4783_s14 }
  0x7c   : > { %561 = vrot.lane.b32.xlu1 %v5346_v17, %s4783_s14 }
  0x7d   : > { %567 = vrot.lane.b32.xlu0 %v5354_v18, %s4783_s14 }
  0x80   : > { %565 = vrot.lane.b32.xlu1 %v5362_v21, %s4783_s14 }
  0x81   : > { %571 = vrot.lane.b32.xlu0 %v5370_v22, %s4783_s14 }
  0x84   : > { %569 = vrot.lane.b32.xlu1 %v5378_v28, %s4783_s14 }
  0x85   : > { %575 = vrot.lane.b32.xlu0 %v5386_v29, %s4783_s14 }
  0x88   : > { %573 = vrot.lane.b32.xlu1 %v5390_v33, %s4783_s14 }
  0x89   : > { %579 = vrot.lane.b32.xlu0 %v5395_v35, %s4783_s14  ;;  %v5420_v35 = vld [vmem:[#allocation2 + $0x22] sm:$0xff] }
  0x8a   : > { %7196 = vst [vmem:[#allocation14_spill] sm:$0xff] %v5420_v35 }
  0x8c   : > { %577 = vrot.lane.b32.xlu1 %v5402_v37, %s4783_s14  ;;  %v5424_v37 = vld [vmem:[#allocation2 + $0x4a] sm:$0xff] }
  0x8d   : > { %712 = vrot.lane.b32.xlu0 %v648_v38, %s4784_s15  ;;  %7197 = vst [vmem:[#allocation15_spill] sm:$0xff] %v5424_v37  ;;  %v5428_v38 = vld [vmem:[#allocation2 + $0x3a] sm:$0xff] }
  0x8e   : > { %7198 = vst [vmem:[#allocation16_spill] sm:$0xff] %v5428_v38 }
  0x90   : > { %581 = vrot.lane.b32.xlu1 %v5408_v45, %s4783_s14  ;;  %v5508_v45 = vld [vmem:[#allocation2 + $0x12a] sm:$0xff] }
  0x91   : > { %716 = vrot.lane.b32.xlu0 %v5411_v48, %s4784_s15  ;;  %v5432_v48 = vld [vmem:[#allocation2 + $0x62] sm:$0xff]  ;;  %7218 = vst [vmem:[#allocation36_spill] sm:$0xff] %v5508_v45 }
  0x92   : > { %7199 = vst [vmem:[#allocation17_spill] sm:$0xff] %v5432_v48 }
  0x94   : > { %714 = vrot.lane.b32.xlu1 %v649_v34, %s4784_s15  ;;  %v5436_v34 = vld [vmem:[#allocation2 + $0x52] sm:$0xff] }
  0x95   : > { %720 = vrot.lane.b32.xlu0 %v5417_v36, %s4784_s15  ;;  %7200 = vst [vmem:[#allocation18_spill] sm:$0xff] %v5436_v34  ;;  %v5440_v36 = vld [vmem:[#allocation2 + $0x7a] sm:$0xff] }
  0x96   : > { %7201 = vst [vmem:[#allocation19_spill] sm:$0xff] %v5440_v36 }
  0x98   : > { %718 = vrot.lane.b32.xlu1 %v5420_v35, %s4784_s15  ;;  %v5444_v35 = vld [vmem:[#allocation2 + $0x6a] sm:$0xff] }
  0x99   : > { %724 = vrot.lane.b32.xlu0 %v5424_v37, %s4784_s15  ;;  %7202 = vst [vmem:[#allocation20_spill] sm:$0xff] %v5444_v35  ;;  %v5448_v37 = vld [vmem:[#allocation2 + $0x92] sm:$0xff] }
  0x9a   : > { %7203 = vst [vmem:[#allocation21_spill] sm:$0xff] %v5448_v37 }
  0x9c   : > { %722 = vrot.lane.b32.xlu1 %v5428_v38, %s4784_s15  ;;  %v5452_v38 = vld [vmem:[#allocation2 + $0x82] sm:$0xff] }
  0x9d   : > { %728 = vrot.lane.b32.xlu0 %v5432_v48, %s4784_s15  ;;  %7204 = vst [vmem:[#allocation22_spill] sm:$0xff] %v5452_v38  ;;  %v5456_v48 = vld [vmem:[#allocation2 + $0xaa] sm:$0xff] }
  0x9e   : > { %7205 = vst [vmem:[#allocation23_spill] sm:$0xff] %v5456_v48 }
  0xa0   : > { %726 = vrot.lane.b32.xlu1 %v5436_v34, %s4784_s15  ;;  %v5460_v34 = vld [vmem:[#allocation2 + $0x9a] sm:$0xff] }
  0xa1   : > { %732 = vrot.lane.b32.xlu0 %v5440_v36, %s4784_s15  ;;  %7206 = vst [vmem:[#allocation24_spill] sm:$0xff] %v5460_v34  ;;  %v5464_v36 = vld [vmem:[#allocation2 + $0xc2] sm:$0xff] }
  0xa2   : > { %7207 = vst [vmem:[#allocation25_spill] sm:$0xff] %v5464_v36 }
  0xa4   : > { %730 = vrot.lane.b32.xlu1 %v5444_v35, %s4784_s15  ;;  %v5468_v35 = vld [vmem:[#allocation2 + $0xb2] sm:$0xff] }
  0xa5   : > { %736 = vrot.lane.b32.xlu0 %v5448_v37, %s4784_s15  ;;  %7208 = vst [vmem:[#allocation26_spill] sm:$0xff] %v5468_v35  ;;  %v5472_v37 = vld [vmem:[#allocation2 + $0xda] sm:$0xff] }
  0xa6   : > { %7209 = vst [vmem:[#allocation27_spill] sm:$0xff] %v5472_v37 }
  0xa8   : > { %734 = vrot.lane.b32.xlu1 %v5452_v38, %s4784_s15  ;;  %v5476_v38 = vld [vmem:[#allocation2 + $0xca] sm:$0xff] }
  0xa9   : > { %740 = vrot.lane.b32.xlu0 %v5456_v48, %s4784_s15  ;;  %7210 = vst [vmem:[#allocation28_spill] sm:$0xff] %v5476_v38  ;;  %v5480_v48 = vld [vmem:[#allocation2 + $0xf2] sm:$0xff] }
  0xaa   : > { %7211 = vst [vmem:[#allocation29_spill] sm:$0xff] %v5480_v48 }
  0xac   : > { %738 = vrot.lane.b32.xlu1 %v5460_v34, %s4784_s15  ;;  %v5484_v34 = vld [vmem:[#allocation2 + $0xe2] sm:$0xff] }
  0xad   : > { %744 = vrot.lane.b32.xlu0 %v5464_v36, %s4784_s15  ;;  %7212 = vst [vmem:[#allocation30_spill] sm:$0xff] %v5484_v34  ;;  %v5488_v36 = vld [vmem:[#allocation2 + $0x10a] sm:$0xff] }
  0xae   : > { %7213 = vst [vmem:[#allocation31_spill] sm:$0xff] %v5488_v36 }
  0xb0   : > { %742 = vrot.lane.b32.xlu1 %v5468_v35, %s4784_s15  ;;  %v5492_v35 = vld [vmem:[#allocation2 + $0xfa] sm:$0xff] }
  0xb1   : > { %748 = vrot.lane.b32.xlu0 %v5472_v37, %s4784_s15  ;;  %7214 = vst [vmem:[#allocation32_spill] sm:$0xff] %v5492_v35  ;;  %v5496_v37 = vld [vmem:[#allocation2 + $0x122] sm:$0xff] }
  0xb2   : > { %7215 = vst [vmem:[#allocation33_spill] sm:$0xff] %v5496_v37 }
  0xb4   : > { %746 = vrot.lane.b32.xlu1 %v5476_v38, %s4784_s15  ;;  %v5500_v38 = vld [vmem:[#allocation2 + $0x112] sm:$0xff] }
  0xb5   : > { %752 = vrot.lane.b32.xlu0 %v5480_v48, %s4784_s15  ;;  %7216 = vst [vmem:[#allocation34_spill] sm:$0xff] %v5500_v38  ;;  %v5504_v48 = vld [vmem:[#allocation2 + $0x13a] sm:$0xff] }
  0xb6   : > { %7217 = vst [vmem:[#allocation35_spill] sm:$0xff] %v5504_v48 }
  0xb8   : > { %750 = vrot.lane.b32.xlu1 %v5484_v34, %s4784_s15  ;;  %v520_v34 = vpop.permute.xlu0 %519 }
  0xb9   : > { %756 = vrot.lane.b32.xlu0 %v5488_v36, %s4784_s15  ;;  %616 = vst.msk [vmem:[#allocation4] sm:$0xff] %vm615_vm2, %v520_v34  ;;  %v5517_v36 = vld [vmem:[#allocation2 + $0x142] sm:$0xff]  ;;  %v5523_v34 = vld [vmem:[#allocation2 + $0x16a] sm:$0xff] }
  0xba   : > { %7219 = vst [vmem:[#allocation37_spill] sm:$0xff] %v5517_v36 }
  0xbc   : > { %754 = vrot.lane.b32.xlu1 %v5492_v35, %s4784_s15  ;;  %v5513_v35 = vld [vmem:[#allocation2 + $0x152] sm:$0xff] }
  0xbd   : > { %760 = vrot.lane.b32.xlu0 %v5496_v37, %s4784_s15  ;;  %v522_v37 = vpop.permute.xlu0 %521 }
  0xbe   : > { %617 = vst.msk [vmem:[#allocation4 + $0x8] sm:$0xff] %vm615_vm2, %v522_v37  ;;  %v5535_v37 = vld [vmem:[#allocation2 + $0x172] sm:$0xff] }
  0xc0   : > { %758 = vrot.lane.b32.xlu1 %v5500_v38, %s4784_s15  ;;  %v5527_v38 = vld [vmem:[#allocation2 + $0x15a] sm:$0xff] }
  0xc1   : > { %764 = vrot.lane.b32.xlu0 %v5504_v48, %s4784_s15 }
  0xc4   : > { %762 = vrot.lane.b32.xlu1 %v5508_v45, %s4784_s15 }
  0xc5   : > { %768 = vrot.lane.b32.xlu0 %v5513_v35, %s4784_s15 }
  0xc6   : > { %v524_v33 = vpop.permute.xlu1 %523 }
  0xc7   : > { %618 = vst.msk [vmem:[#allocation4 + $0x10] sm:$0xff] %vm615_vm2, %v524_v33  ;;  %v528_v48 = vpop.permute.xlu0 %527 }
  0xc8   : > { %766 = vrot.lane.b32.xlu1 %v5517_v36, %s4784_s15  ;;  %620 = vst.msk [vmem:[#allocation4 + $0x20] sm:$0xff] %vm615_vm2, %v528_v48 }
  0xc9   : > { %772 = vrot.lane.b32.xlu0 %v5523_v34, %s4784_s15 }
  0xca   : > { %v526_v45 = vpop.permute.xlu1 %525 }
  0xcb   : > { %619 = vst.msk [vmem:[#allocation4 + $0x18] sm:$0xff] %vm615_vm2, %v526_v45  ;;  %v532_v33 = vpop.permute.xlu0 %531 }
  0xcc   : > { %770 = vrot.lane.b32.xlu1 %v5527_v38, %s4784_s15  ;;  %622 = vst.msk [vmem:[#allocation4 + $0x30] sm:$0xff] %vm615_vm2, %v532_v33 }
  0xcd   : > { %905 = vrot.lane.b32.xlu0 %v5212_v46, %s4785_s16 }
  0xce   : > { %v530_v36 = vpop.permute.xlu1 %529 }
  0xcf   : > { %621 = vst.msk [vmem:[#allocation4 + $0x28] sm:$0xff] %vm615_vm2, %v530_v36  ;;  %v536_v48 = vpop.permute.xlu0 %535 }
  0xd0   : > { %774 = vrot.lane.b32.xlu1 %v5535_v37, %s4784_s15  ;;  %624 = vst.msk [vmem:[#allocation4 + $0x40] sm:$0xff] %vm615_vm2, %v536_v48 }
  0xd1   : > { %909 = vrot.lane.b32.xlu0 %v5228_v51, %s4785_s16 }
  0xd2   : > { %v534_v45 = vpop.permute.xlu1 %533 }
  0xd3   : > { %623 = vst.msk [vmem:[#allocation4 + $0x38] sm:$0xff] %vm615_vm2, %v534_v45  ;;  %v540_v33 = vpop.permute.xlu0 %539 }
  0xd4   : > { %907 = vrot.lane.b32.xlu1 %v5222_v49, %s4785_s16  ;;  %626 = vst.msk [vmem:[#allocation4 + $0x50] sm:$0xff] %vm615_vm2, %v540_v33 }
  0xd5   : > { %913 = vrot.lane.b32.xlu0 %v5240_v54, %s4785_s16 }
  0xd6   : > { %v538_v46 = vpop.permute.xlu1 %537 }
  0xd7   : > { %625 = vst.msk [vmem:[#allocation4 + $0x48] sm:$0xff] %vm615_vm2, %v538_v46  ;;  %v544_v36 = vpop.permute.xlu0 %543 }
  0xd8   : > { %911 = vrot.lane.b32.xlu1 %v5230_v52, %s4785_s16  ;;  %628 = vst.msk [vmem:[#allocation4 + $0x60] sm:$0xff] %vm615_vm2, %v544_v36 }
  0xd9   : > { %917 = vrot.lane.b32.xlu0 %v5250_v57, %s4785_s16 }
  0xda   : > { %v542_v48 = vpop.permute.xlu1 %541 }
  0xdb   : > { %627 = vst.msk [vmem:[#allocation4 + $0x58] sm:$0xff] %vm615_vm2, %v542_v48  ;;  %v548_v49 = vpop.permute.xlu0 %547 }
  0xdc   : > { %915 = vrot.lane.b32.xlu1 %v5242_v55, %s4785_s16  ;;  %630 = vst.msk [vmem:[#allocation4 + $0x70] sm:$0xff] %vm615_vm2, %v548_v49 }
  0xdd   : > { %921 = vrot.lane.b32.xlu0 %v5254_v59, %s4785_s16 }
  0xde   : > { %v546_v45 = vpop.permute.xlu1 %545 }
  0xdf   : > { %629 = vst.msk [vmem:[#allocation4 + $0x68] sm:$0xff] %vm615_vm2, %v546_v45  ;;  %v552_v33 = vpop.permute.xlu0 %551 }
  0xe0   : > { %919 = vrot.lane.b32.xlu1 %v5252_v58, %s4785_s16  ;;  %632 = vst.msk [vmem:[#allocation4 + $0x80] sm:$0xff] %vm615_vm2, %v552_v33 }
  0xe1   : > { %925 = vrot.lane.b32.xlu0 %v5266_v61, %s4785_s16 }
  0xe2   : > { %v550_v46 = vpop.permute.xlu1 %549 }
  0xe3   : > { %631 = vst.msk [vmem:[#allocation4 + $0x78] sm:$0xff] %vm615_vm2, %v550_v46  ;;  %v556_v36 = vpop.permute.xlu0 %555 }
  0xe4   : > { %923 = vrot.lane.b32.xlu1 %v5264_v60, %s4785_s16  ;;  %634 = vst.msk [vmem:[#allocation4 + $0x90] sm:$0xff] %vm615_vm2, %v556_v36 }
  0xe5   : > { %929 = vrot.lane.b32.xlu0 %v5278_v0, %s4785_s16 }
  0xe6   : > { %v554_v48 = vpop.permute.xlu1 %553 }
  0xe7   : > { %633 = vst.msk [vmem:[#allocation4 + $0x88] sm:$0xff] %vm615_vm2, %v554_v48  ;;  %v560_v49 = vpop.permute.xlu0 %559 }
  0xe8   : > { %927 = vrot.lane.b32.xlu1 %v5268_v62, %s4785_s16  ;;  %636 = vst.msk [vmem:[#allocation4 + $0xa0] sm:$0xff] %vm615_vm2, %v560_v49 }
  0xe9   : > { %933 = vrot.lane.b32.xlu0 %v5282_v2, %s4785_s16 }
  0xea   : > { %v558_v45 = vpop.permute.xlu1 %557 }
  0xeb   : > { %635 = vst.msk [vmem:[#allocation4 + $0x98] sm:$0xff] %vm615_vm2, %v558_v45  ;;  %v564_v33 = vpop.permute.xlu0 %563  ;;  %v872_v45 = vld [vmem:[#allocation2 + $0x188] sm:$0xff] }
  0xec   : > { %931 = vrot.lane.b32.xlu1 %v5280_v1, %s4785_s16  ;;  %638 = vst.msk [vmem:[#allocation4 + $0xb0] sm:$0xff] %vm615_vm2, %v564_v33 }
  0xed   : > { %937 = vrot.lane.b32.xlu0 %v5294_v4, %s4785_s16 }
  0xee   : > { %v562_v46 = vpop.permute.xlu1 %561 }
  0xef   : > { %637 = vst.msk [vmem:[#allocation4 + $0xa8] sm:$0xff] %vm615_vm2, %v562_v46  ;;  %v568_v36 = vpop.permute.xlu0 %567 }
  0xf0   : > { %935 = vrot.lane.b32.xlu1 %v5292_v3, %s4785_s16  ;;  %640 = vst.msk [vmem:[#allocation4 + $0xc0] sm:$0xff] %vm615_vm2, %v568_v36 }
  0xf1   : > { %941 = vrot.lane.b32.xlu0 %v5304_v6, %s4785_s16 }
  0xf2   : > { %v566_v2 = vpop.permute.xlu1 %565 }
  0xf3   : > { %639 = vst.msk [vmem:[#allocation4 + $0xb8] sm:$0xff] %vm615_vm2, %v566_v2  ;;  %v572_v48 = vpop.permute.xlu0 %571  ;;  %v7221_v2 = vld [vmem:[#allocation9_spill] sm:$0xff] }
  0xf4   : > { %939 = vrot.lane.b32.xlu1 %v5296_v5, %s4785_s16  ;;  %642 = vst.msk [vmem:[#allocation4 + $0xd0] sm:$0xff] %vm615_vm2, %v572_v48  ;;  %v7222_v48 = vld [vmem:[#allocation10_spill] sm:$0xff] }
  0xf5   : > { %945 = vrot.lane.b32.xlu0 %v5308_v8, %s4785_s16 }
  0xf6   : > { %v570_v4 = vpop.permute.xlu1 %569 }
  0xf7   : > { %641 = vst.msk [vmem:[#allocation4 + $0xc8] sm:$0xff] %vm615_vm2, %v570_v4  ;;  %v576_v3 = vpop.permute.xlu0 %575 }
  0xf8   : > { %943 = vrot.lane.b32.xlu1 %v5306_v7, %s4785_s16  ;;  %644 = vst.msk [vmem:[#allocation4 + $0xe0] sm:$0xff] %vm615_vm2, %v576_v3  ;;  %v7223_v3 = vld [vmem:[#allocation11_spill] sm:$0xff] }
  0xf9   : > { %949 = vrot.lane.b32.xlu0 %v5326_v11, %s4785_s16 }
  0xfa   : > { %v574_v6 = vpop.permute.xlu1 %573 }
  0xfb   : > { %643 = vst.msk [vmem:[#allocation4 + $0xd8] sm:$0xff] %vm615_vm2, %v574_v6  ;;  %v580_v5 = vpop.permute.xlu0 %579 }
  0xfc   : > { %947 = vrot.lane.b32.xlu1 %v5318_v9, %s4785_s16  ;;  %646 = vst.msk [vmem:[#allocation4 + $0xf0] sm:$0xff] %vm615_vm2, %v580_v5  ;;  %v1065_v5 = vld [vmem:[#allocation2 + $0x189] sm:$0xff] }
  0xfd   : > { %953 = vrot.lane.b32.xlu0 %v5342_v15, %s4785_s16 }
  0xfe   : > { %v578_v8 = vpop.permute.xlu1 %577 }
  0xff   : > { %645 = vst.msk [vmem:[#allocation4 + $0xe8] sm:$0xff] %vm615_vm2, %v578_v8  ;;  %v713_v7 = vpop.permute.xlu0 %712 }
 0x100   : > { %951 = vrot.lane.b32.xlu1 %v5328_v12, %s4785_s16  ;;  %809 = vst.msk [vmem:[#allocation4] sm:$0xff] %vm808_vm3, %v713_v7  ;;  %v871_v12 = vld [vmem:[#allocation2 + $0x180] sm:$0xff]  ;;  %v7224_v7 = vld [vmem:[#allocation12_spill] sm:$0xff] }
 0x101   : > { %957 = vrot.lane.b32.xlu0 %v5358_v19, %s4785_s16 }
 0x102   : > { %v582_v11 = vpop.permute.xlu1 %581 }
 0x103   : > { %647 = vst.msk [vmem:[#allocation4 + $0xf8] sm:$0xff] %vm615_vm2, %v582_v11  ;;  %v717_v9 = vpop.permute.xlu0 %716 }
 0x104   : > { %955 = vrot.lane.b32.xlu1 %v5344_v16, %s4785_s16  ;;  %811 = vst.msk [vmem:[#allocation4 + $0x10] sm:$0xff] %vm808_vm3, %v717_v9 }
 0x105   : > { %961 = vrot.lane.b32.xlu0 %v5374_v23, %s4785_s16 }
 0x106   : > { %v715_v15 = vpop.permute.xlu1 %714 }
 0x107   : > { %810 = vst.msk [vmem:[#allocation4 + $0x8] sm:$0xff] %vm808_vm3, %v715_v15  ;;  %v721_v49 = vpop.permute.xlu0 %720  ;;  %v7225_v15 = vld [vmem:[#allocation13_spill] sm:$0xff] }
 0x108   : > { %959 = vrot.lane.b32.xlu1 %v5360_v20, %s4785_s16  ;;  %813 = vst.msk [vmem:[#allocation4 + $0x20] sm:$0xff] %vm808_vm3, %v721_v49 }
 0x109   : > { %965 = vrot.lane.b32.xlu0 %v871_v12, %s4785_s16  ;;  %v7226_v12 = vld [vmem:[#allocation14_spill] sm:$0xff] }
 0x10a   : > { %v719_v19 = vpop.permute.xlu1 %718 }
 0x10b   : > { %812 = vst.msk [vmem:[#allocation4 + $0x18] sm:$0xff] %vm808_vm3, %v719_v19  ;;  %v725_v16 = vpop.permute.xlu0 %724 }
 0x10c   : > { %963 = vrot.lane.b32.xlu1 %v5376_v24, %s4785_s16  ;;  %815 = vst.msk [vmem:[#allocation4 + $0x30] sm:$0xff] %vm808_vm3, %v725_v16  ;;  %v7227_v16 = vld [vmem:[#allocation15_spill] sm:$0xff] }
 0x10d   : > { %1098 = vrot.lane.b32.xlu0 %v5147_v25, %s4786_s17 }
 0x10e   : > { %v723_v23 = vpop.permute.xlu1 %722 }
 0x10f   : > { %814 = vst.msk [vmem:[#allocation4 + $0x28] sm:$0xff] %vm808_vm3, %v723_v23  ;;  %v729_v20 = vpop.permute.xlu0 %728 }
 0x110   : > { %967 = vrot.lane.b32.xlu1 %v872_v45, %s4785_s16  ;;  %817 = vst.msk [vmem:[#allocation4 + $0x40] sm:$0xff] %vm808_vm3, %v729_v20  ;;  %v7228_v45 = vld [vmem:[#allocation16_spill] sm:$0xff] }
 0x111   : > { %1102 = vrot.lane.b32.xlu0 %v5149_v26, %s4786_s17 }
 0x112   : > { %v727_v33 = vpop.permute.xlu1 %726 }
 0x113   : > { %816 = vst.msk [vmem:[#allocation4 + $0x38] sm:$0xff] %vm808_vm3, %v727_v33  ;;  %v733_v24 = vpop.permute.xlu0 %732  ;;  %v7229_v33 = vld [vmem:[#allocation17_spill] sm:$0xff] }
 0x114   : > { %1100 = vrot.lane.b32.xlu1 %v5156_v27, %s4786_s17  ;;  %819 = vst.msk [vmem:[#allocation4 + $0x50] sm:$0xff] %vm808_vm3, %v733_v24  ;;  %v7230_v24 = vld [vmem:[#allocation18_spill] sm:$0xff] }
 0x115   : > { %1106 = vrot.lane.b32.xlu0 %v5164_v30, %s4786_s17 }
 0x116   : > { %v731_v25 = vpop.permute.xlu1 %730 }
 0x117   : > { %818 = vst.msk [vmem:[#allocation4 + $0x48] sm:$0xff] %vm808_vm3, %v731_v25  ;;  %v737_v46 = vpop.permute.xlu0 %736 }
 0x118   : > { %1104 = vrot.lane.b32.xlu1 %v5168_v31, %s4786_s17  ;;  %821 = vst.msk [vmem:[#allocation4 + $0x60] sm:$0xff] %vm808_vm3, %v737_v46 }
 0x119   : > { %1110 = vrot.lane.b32.xlu0 %v5172_v32, %s4786_s17 }
 0x11a   : > { %v735_v26 = vpop.permute.xlu1 %734 }
 0x11b   : > { %820 = vst.msk [vmem:[#allocation4 + $0x58] sm:$0xff] %vm808_vm3, %v735_v26  ;;  %v741_v27 = vpop.permute.xlu0 %740  ;;  %v7231_v26 = vld [vmem:[#allocation19_spill] sm:$0xff] }
 0x11c   : > { %1108 = vrot.lane.b32.xlu1 %v5185_v39, %s4786_s17  ;;  %823 = vst.msk [vmem:[#allocation4 + $0x70] sm:$0xff] %vm808_vm3, %v741_v27  ;;  %v7232_v27 = vld [vmem:[#allocation20_spill] sm:$0xff] }
 0x11d   : > { %1114 = vrot.lane.b32.xlu0 %v5192_v40, %s4786_s17 }
 0x11e   : > { %v739_v30 = vpop.permute.xlu1 %738 }
 0x11f   : > { %822 = vst.msk [vmem:[#allocation4 + $0x68] sm:$0xff] %vm808_vm3, %v739_v30  ;;  %v745_v31 = vpop.permute.xlu0 %744 }
 0x120   : > { %1112 = vrot.lane.b32.xlu1 %v5196_v41, %s4786_s17  ;;  %825 = vst.msk [vmem:[#allocation4 + $0x80] sm:$0xff] %vm808_vm3, %v745_v31 }
 0x121   : > { %1118 = vrot.lane.b32.xlu0 %v5200_v42, %s4786_s17 }
 0x122   : > { %v743_v32 = vpop.permute.xlu1 %742 }
 0x123   : > { %824 = vst.msk [vmem:[#allocation4 + $0x78] sm:$0xff] %vm808_vm3, %v743_v32  ;;  %v749_v39 = vpop.permute.xlu0 %748  ;;  %v7233_v32 = vld [vmem:[#allocation21_spill] sm:$0xff] }
 0x124   : > { %1116 = vrot.lane.b32.xlu1 %v5204_v43, %s4786_s17  ;;  %827 = vst.msk [vmem:[#allocation4 + $0x90] sm:$0xff] %vm808_vm3, %v749_v39  ;;  %v7234_v39 = vld [vmem:[#allocation22_spill] sm:$0xff] }
 0x125   : > { %1122 = vrot.lane.b32.xlu0 %v5208_v44, %s4786_s17 }
 0x126   : > { %v747_v40 = vpop.permute.xlu1 %746 }
 0x127   : > { %826 = vst.msk [vmem:[#allocation4 + $0x88] sm:$0xff] %vm808_vm3, %v747_v40  ;;  %v753_v41 = vpop.permute.xlu0 %752 }
 0x128   : > { %1120 = vrot.lane.b32.xlu1 %v5214_v47, %s4786_s17  ;;  %829 = vst.msk [vmem:[#allocation4 + $0xa0] sm:$0xff] %vm808_vm3, %v753_v41 }
 0x129   : > { %1126 = vrot.lane.b32.xlu0 %v5224_v50, %s4786_s17 }
 0x12a   : > { %v751_v42 = vpop.permute.xlu1 %750 }
 0x12b   : > { %828 = vst.msk [vmem:[#allocation4 + $0x98] sm:$0xff] %vm808_vm3, %v751_v42  ;;  %v757_v43 = vpop.permute.xlu0 %756  ;;  %v7235_v42 = vld [vmem:[#allocation23_spill] sm:$0xff] }
 0x12c   : > { %1124 = vrot.lane.b32.xlu1 %v5234_v53, %s4786_s17  ;;  %831 = vst.msk [vmem:[#allocation4 + $0xb0] sm:$0xff] %vm808_vm3, %v757_v43  ;;  %v7236_v43 = vld [vmem:[#allocation24_spill] sm:$0xff] }
 0x12d   : > { %1130 = vrot.lane.b32.xlu0 %v5244_v56, %s4786_s17 }
 0x12e   : > { %v755_v44 = vpop.permute.xlu1 %754 }
 0x12f   : > { %830 = vst.msk [vmem:[#allocation4 + $0xa8] sm:$0xff] %vm808_vm3, %v755_v44  ;;  %v761_v47 = vpop.permute.xlu0 %760 }
 0x130   : > { %1128 = vrot.lane.b32.xlu1 %v5270_v63, %s4786_s17  ;;  %833 = vst.msk [vmem:[#allocation4 + $0xc0] sm:$0xff] %vm808_vm3, %v761_v47 }
 0x131   : > { %1134 = vrot.lane.b32.xlu0 %v5320_v10, %s4786_s17 }
 0x132   : > { %v759_v50 = vpop.permute.xlu1 %758 }
 0x133   : > { %832 = vst.msk [vmem:[#allocation4 + $0xb8] sm:$0xff] %vm808_vm3, %v759_v50  ;;  %v765_v53 = vpop.permute.xlu0 %764  ;;  %v7237_v50 = vld [vmem:[#allocation25_spill] sm:$0xff] }
 0x134   : > { %1132 = vrot.lane.b32.xlu1 %v5330_v13, %s4786_s17  ;;  %835 = vst.msk [vmem:[#allocation4 + $0xd0] sm:$0xff] %vm808_vm3, %v765_v53  ;;  %v7238_v53 = vld [vmem:[#allocation26_spill] sm:$0xff] }
 0x135   : > { %1138 = vrot.lane.b32.xlu0 %v5338_v14, %s4786_s17 }
 0x136   : > { %v763_v56 = vpop.permute.xlu1 %762 }
 0x137   : > { %834 = vst.msk [vmem:[#allocation4 + $0xc8] sm:$0xff] %vm808_vm3, %v763_v56  ;;  %v769_v63 = vpop.permute.xlu0 %768 }
 0x138   : > { %1136 = vrot.lane.b32.xlu1 %v5346_v17, %s4786_s17  ;;  %837 = vst.msk [vmem:[#allocation4 + $0xe0] sm:$0xff] %vm808_vm3, %v769_v63 }
 0x139   : > { %1142 = vrot.lane.b32.xlu0 %v5354_v18, %s4786_s17 }
 0x13a   : > { %v767_v10 = vpop.permute.xlu1 %766 }
 0x13b   : > { %836 = vst.msk [vmem:[#allocation4 + $0xd8] sm:$0xff] %vm808_vm3, %v767_v10  ;;  %v773_v13 = vpop.permute.xlu0 %772  ;;  %v7239_v10 = vld [vmem:[#allocation27_spill] sm:$0xff] }
 0x13c   : > { %1140 = vrot.lane.b32.xlu1 %v5362_v21, %s4786_s17  ;;  %839 = vst.msk [vmem:[#allocation4 + $0xf0] sm:$0xff] %vm808_vm3, %v773_v13  ;;  %v7220_v21 = vld [vmem:[#allocation8_spill] sm:$0xff] }
 0x13d   : > { %1146 = vrot.lane.b32.xlu0 %v5370_v22, %s4786_s17  ;;  %v7240_v13 = vld [vmem:[#allocation28_spill] sm:$0xff] }
 0x13e   : > { %v771_v14 = vpop.permute.xlu1 %770 }
 0x13f   : > { %838 = vst.msk [vmem:[#allocation4 + $0xe8] sm:$0xff] %vm808_vm3, %v771_v14  ;;  %v906_v17 = vpop.permute.xlu0 %905 }
 0x140   : > { %1144 = vrot.lane.b32.xlu1 %v5378_v28, %s4786_s17  ;;  %1002 = vst.msk [vmem:[#allocation4] sm:$0xff] %vm1001_vm4, %v906_v17  ;;  %v1064_v28 = vld [vmem:[#allocation2 + $0x181] sm:$0xff] }
 0x141   : > { %1150 = vrot.lane.b32.xlu0 %v5386_v29, %s4786_s17 }
 0x142   : > { %v775_v18 = vpop.permute.xlu1 %774 }
 0x143   : > { %840 = vst.msk [vmem:[#allocation4 + $0xf8] sm:$0xff] %vm808_vm3, %v775_v18  ;;  %v910_v36 = vpop.permute.xlu0 %909  ;;  %v7241_v18 = vld [vmem:[#allocation29_spill] sm:$0xff] }
 0x144   : > { %1148 = vrot.lane.b32.xlu1 %v7220_v21, %s4786_s17  ;;  %1004 = vst.msk [vmem:[#allocation4 + $0x10] sm:$0xff] %vm1001_vm4, %v910_v36  ;;  %v7242_v21 = vld [vmem:[#allocation30_spill] sm:$0xff] }
 0x145   : > { %1154 = vrot.lane.b32.xlu0 %v7221_v2, %s4786_s17  ;;  %v7243_v2 = vld [vmem:[#allocation31_spill] sm:$0xff] }
 0x146   : > { %v908_v22 = vpop.permute.xlu1 %907 }
 0x147   : > { %1003 = vst.msk [vmem:[#allocation4 + $0x8] sm:$0xff] %vm1001_vm4, %v908_v22  ;;  %v914_v4 = vpop.permute.xlu0 %913 }
 0x148   : > { %1152 = vrot.lane.b32.xlu1 %v7222_v48, %s4786_s17  ;;  %1006 = vst.msk [vmem:[#allocation4 + $0x20] sm:$0xff] %vm1001_vm4, %v914_v4 }
 0x149   : > { %1158 = vrot.lane.b32.xlu0 %v1064_v28, %s4786_s17  ;;  %v7244_v28 = vld [vmem:[#allocation32_spill] sm:$0xff] }
 0x14a   : > { %v912_v29 = vpop.permute.xlu1 %911 }
 0x14b   : > { %1005 = vst.msk [vmem:[#allocation4 + $0x18] sm:$0xff] %vm1001_vm4, %v912_v29  ;;  %v918_v6 = vpop.permute.xlu0 %917  ;;  %v7245_v29 = vld [vmem:[#allocation33_spill] sm:$0xff] }
 0x14c   : > { %1156 = vrot.lane.b32.xlu1 %v7223_v3, %s4786_s17  ;;  %1008 = vst.msk [vmem:[#allocation4 + $0x30] sm:$0xff] %vm1001_vm4, %v918_v6  ;;  %v7246_v3 = vld [vmem:[#allocation34_spill] sm:$0xff] }
 0x14d   : > { %1291 = vrot.lane.b32.xlu0 %v7224_v7, %s4787_s18  ;;  %v7248_v7 = vld [vmem:[#allocation36_spill] sm:$0xff] }
 0x14e   : > { %v916_v8 = vpop.permute.xlu1 %915 }
 0x14f   : > { %1007 = vst.msk [vmem:[#allocation4 + $0x28] sm:$0xff] %vm1001_vm4, %v916_v8  ;;  %v922_v11 = vpop.permute.xlu0 %921  ;;  %v7247_v8 = vld [vmem:[#allocation35_spill] sm:$0xff] }
 0x150   : > { %1160 = vrot.lane.b32.xlu1 %v1065_v5, %s4786_s17  ;;  %1010 = vst.msk [vmem:[#allocation4 + $0x40] sm:$0xff] %vm1001_vm4, %v922_v11 }
 0x151   : > { %1295 = vrot.lane.b32.xlu0 %v7225_v15, %s4787_s18  ;;  %v7249_v15 = vld [vmem:[#allocation37_spill] sm:$0xff] }
 0x152   : > { %v920_v9 = vpop.permute.xlu1 %919 }
 0x153   : > { %1009 = vst.msk [vmem:[#allocation4 + $0x38] sm:$0xff] %vm1001_vm4, %v920_v9  ;;  %v926_v49 = vpop.permute.xlu0 %925 }
 0x154   : > { %1293 = vrot.lane.b32.xlu1 %v7226_v12, %s4787_s18  ;;  %1012 = vst.msk [vmem:[#allocation4 + $0x50] sm:$0xff] %vm1001_vm4, %v926_v49 }
 0x155   : > { %1299 = vrot.lane.b32.xlu0 %v7227_v16, %s4787_s18 }
 0x156   : > { %v924_v19 = vpop.permute.xlu1 %923 }
 0x157   : > { %1011 = vst.msk [vmem:[#allocation4 + $0x48] sm:$0xff] %vm1001_vm4, %v924_v19  ;;  %v930_v23 = vpop.permute.xlu0 %929  ;;  %v5813_v19 = vld [vmem:[#allocation2 + $0x182] sm:$0xff] }
 0x158   : > { %1297 = vrot.lane.b32.xlu1 %v7228_v45, %s4787_s18  ;;  %1014 = vst.msk [vmem:[#allocation4 + $0x60] sm:$0xff] %vm1001_vm4, %v930_v23  ;;  %v5823_v45 = vld [vmem:[#allocation2 + $0x18a] sm:$0xff] }
 0x159   : > { %1303 = vrot.lane.b32.xlu0 %v7229_v33, %s4787_s18 }
 0x15a   : > { %v928_v20 = vpop.permute.xlu1 %927 }
 0x15b   : > { %1013 = vst.msk [vmem:[#allocation4 + $0x58] sm:$0xff] %vm1001_vm4, %v928_v20  ;;  %v934_v25 = vpop.permute.xlu0 %933 }
 0x15c   : > { %1301 = vrot.lane.b32.xlu1 %v7230_v24, %s4787_s18  ;;  %1016 = vst.msk [vmem:[#allocation4 + $0x70] sm:$0xff] %vm1001_vm4, %v934_v25 }
 0x15d   : > { %1307 = vrot.lane.b32.xlu0 %v7231_v26, %s4787_s18 }
 0x15e   : > { %v932_v46 = vpop.permute.xlu1 %931 }
 0x15f   : > { %1015 = vst.msk [vmem:[#allocation4 + $0x68] sm:$0xff] %vm1001_vm4, %v932_v46  ;;  %v938_v30 = vpop.permute.xlu0 %937  ;;  %v2035_v46 = vld [vmem:[%s7146_s2 + $0x18] sm:$0xff] }
 0x160   : > { %1305 = vrot.lane.b32.xlu1 %v7232_v27, %s4787_s18  ;;  %1018 = vst.msk [vmem:[#allocation4 + $0x80] sm:$0xff] %vm1001_vm4, %v938_v30  ;;  %v1807_v30 = vld [vmem:[#allocation2 + $0x32] sm:$0xff] }
 0x161   : > { %1311 = vrot.lane.b32.xlu0 %v7233_v32, %s4787_s18  ;;  %v1615_v32 = vld [vmem:[#allocation2 + $0x39] sm:$0xff] }
 0x162   : > { %v936_v31 = vpop.permute.xlu1 %935 }
 0x163   : > { %1017 = vst.msk [vmem:[#allocation4 + $0x78] sm:$0xff] %vm1001_vm4, %v936_v31  ;;  %v942_v40 = vpop.permute.xlu0 %941 }
 0x164   : > { %1309 = vrot.lane.b32.xlu1 %v7234_v39, %s4787_s18  ;;  %1020 = vst.msk [vmem:[#allocation4 + $0x90] sm:$0xff] %vm1001_vm4, %v942_v40  ;;  %v1616_v40 = vld [vmem:[#allocation2 + $0x49] sm:$0xff] }
 0x165   : > { %1315 = vrot.lane.b32.xlu0 %v7235_v42, %s4787_s18 }
 0x166   : > { %v940_v41 = vpop.permute.xlu1 %939 }
 0x167   : > { %1019 = vst.msk [vmem:[#allocation4 + $0x88] sm:$0xff] %vm1001_vm4, %v940_v41  ;;  %v946_v44 = vpop.permute.xlu0 %945  ;;  %v1808_v41 = vld [vmem:[#allocation2 + $0x3a] sm:$0xff] }
 0x168   : > { %1313 = vrot.lane.b32.xlu1 %v7236_v43, %s4787_s18  ;;  %1022 = vst.msk [vmem:[#allocation4 + $0xa0] sm:$0xff] %vm1001_vm4, %v946_v44  ;;  %v1809_v43 = vld [vmem:[#allocation2 + $0x4a] sm:$0xff] }
 0x169   : > { %1319 = vrot.lane.b32.xlu0 %v7237_v50, %s4787_s18 }
 0x16a   : > { %v944_v47 = vpop.permute.xlu1 %943 }
 0x16b   : > { %1021 = vst.msk [vmem:[#allocation4 + $0x98] sm:$0xff] %vm1001_vm4, %v944_v47  ;;  %v950_v56 = vpop.permute.xlu0 %949  ;;  %v1617_v47 = vld [vmem:[#allocation2 + $0x51] sm:$0xff] }
 0x16c   : > { %1317 = vrot.lane.b32.xlu1 %v7238_v53, %s4787_s18  ;;  %1024 = vst.msk [vmem:[#allocation4 + $0xb0] sm:$0xff] %vm1001_vm4, %v950_v56  ;;  %v1618_v53 = vld [vmem:[#allocation2 + $0x61] sm:$0xff] }
 0x16d   : > { %1323 = vrot.lane.b32.xlu0 %v7239_v10, %s4787_s18 }
 0x16e   : > { %v948_v63 = vpop.permute.xlu1 %947 }
 0x16f   : > { %1023 = vst.msk [vmem:[#allocation4 + $0xa8] sm:$0xff] %vm1001_vm4, %v948_v63  ;;  %v954_v14 = vpop.permute.xlu0 %953  ;;  %v1810_v63 = vld [vmem:[#allocation2 + $0x52] sm:$0xff] }
 0x170   : > { %1321 = vrot.lane.b32.xlu1 %v7240_v13, %s4787_s18  ;;  %1026 = vst.msk [vmem:[#allocation4 + $0xc0] sm:$0xff] %vm1001_vm4, %v954_v14  ;;  %v1811_v13 = vld [vmem:[#allocation2 + $0x62] sm:$0xff] }
 0x171   : > { %1327 = vrot.lane.b32.xlu0 %v7241_v18, %s4787_s18 }
 0x172   : > { %v952_v17 = vpop.permute.xlu1 %951 }
 0x173   : > { %1025 = vst.msk [vmem:[#allocation4 + $0xb8] sm:$0xff] %vm1001_vm4, %v952_v17  ;;  %v958_v36 = vpop.permute.xlu0 %957  ;;  %v1619_v17 = vld [vmem:[#allocation2 + $0x69] sm:$0xff] }
 0x174   : > { %1325 = vrot.lane.b32.xlu1 %v7242_v21, %s4787_s18  ;;  %1028 = vst.msk [vmem:[#allocation4 + $0xd0] sm:$0xff] %vm1001_vm4, %v958_v36  ;;  %v1620_v21 = vld [vmem:[#allocation2 + $0x79] sm:$0xff] }
 0x175   : > { %1331 = vrot.lane.b32.xlu0 %v7243_v2, %s4787_s18 }
 0x176   : > { %v956_v22 = vpop.permute.xlu1 %955 }
 0x177   : > { %1027 = vst.msk [vmem:[#allocation4 + $0xc8] sm:$0xff] %vm1001_vm4, %v956_v22  ;;  %v962_v48 = vpop.permute.xlu0 %961  ;;  %v1812_v22 = vld [vmem:[#allocation2 + $0x6a] sm:$0xff] }
 0x178   : > { %1329 = vrot.lane.b32.xlu1 %v7244_v28, %s4787_s18  ;;  %1030 = vst.msk [vmem:[#allocation4 + $0xe0] sm:$0xff] %vm1001_vm4, %v962_v48  ;;  %v1813_v28 = vld [vmem:[#allocation2 + $0x7a] sm:$0xff] }
 0x179   : > { %1335 = vrot.lane.b32.xlu0 %v7245_v29, %s4787_s18 }
 0x17a   : > { %v960_v4 = vpop.permute.xlu1 %959 }
 0x17b   : > { %1029 = vst.msk [vmem:[#allocation4 + $0xd8] sm:$0xff] %vm1001_vm4, %v960_v4  ;;  %v966_v6 = vpop.permute.xlu0 %965  ;;  %v1621_v4 = vld [vmem:[#allocation2 + $0x81] sm:$0xff] }
 0x17c   : > { %1333 = vrot.lane.b32.xlu1 %v7246_v3, %s4787_s18  ;;  %1032 = vst.msk [vmem:[#allocation4 + $0xf0] sm:$0xff] %vm1001_vm4, %v966_v6  ;;  %v1622_v3 = vld [vmem:[#allocation2 + $0x91] sm:$0xff] }
 0x17d   : > { %1339 = vrot.lane.b32.xlu0 %v7247_v8, %s4787_s18 }
 0x17e   : > { %v964_v5 = vpop.permute.xlu1 %963 }
 0x17f   : > { %1031 = vst.msk [vmem:[#allocation4 + $0xe8] sm:$0xff] %vm1001_vm4, %v964_v5  ;;  %v1099_v11 = vpop.permute.xlu0 %1098  ;;  %v1814_v5 = vld [vmem:[#allocation2 + $0x82] sm:$0xff] }
 0x180   : > { %1337 = vrot.lane.b32.xlu1 %v7248_v7, %s4787_s18  ;;  %1195 = vst.msk [vmem:[#allocation4] sm:$0xff] %vm1194_vm5, %v1099_v11  ;;  %v1815_v7 = vld [vmem:[#allocation2 + $0x92] sm:$0xff] }
 0x181   : > { %1343 = vrot.lane.b32.xlu0 %v5513_v35, %s4787_s18 }
 0x182   : > { %v968_v9 = vpop.permute.xlu1 %967 }
 0x183   : > { %1033 = vst.msk [vmem:[#allocation4 + $0xf8] sm:$0xff] %vm1001_vm4, %v968_v9  ;;  %v1103_v12 = vpop.permute.xlu0 %1102  ;;  %v1623_v9 = vld [vmem:[#allocation2 + $0x99] sm:$0xff] }
 0x184   : > { %1341 = vrot.lane.b32.xlu1 %v7249_v15, %s4787_s18  ;;  %1197 = vst.msk [vmem:[#allocation4 + $0x10] sm:$0xff] %vm1194_vm5, %v1103_v12  ;;  %v1624_v12 = vld [vmem:[#allocation2 + $0xa9] sm:$0xff] }
 0x185   : > { %1347 = vrot.lane.b32.xlu0 %v5523_v34, %s4787_s18 }
 0x186   : > { %v1101_v49 = vpop.permute.xlu1 %1100 }
 0x187   : > { %1196 = vst.msk [vmem:[#allocation4 + $0x8] sm:$0xff] %vm1194_vm5, %v1101_v49  ;;  %v1107_v35 = vpop.permute.xlu0 %1106 }
 0x188   : > { %1345 = vrot.lane.b32.xlu1 %v5527_v38, %s4787_s18  ;;  %1199 = vst.msk [vmem:[#allocation4 + $0x20] sm:$0xff] %vm1194_vm5, %v1107_v35  ;;  %v1816_v35 = vld [vmem:[#allocation2 + $0x9a] sm:$0xff] }
 0x189   : > { %1351 = vrot.lane.b32.xlu0 %v5813_v19, %s4787_s18 }
 0x18a   : > { %v1105_v16 = vpop.permute.xlu1 %1104 }
 0x18b   : > { %1198 = vst.msk [vmem:[#allocation4 + $0x18] sm:$0xff] %vm1194_vm5, %v1105_v16  ;;  %v1111_v34 = vpop.permute.xlu0 %1110 }
 0x18c   : > { %1349 = vrot.lane.b32.xlu1 %v5535_v37, %s4787_s18  ;;  %1201 = vst.msk [vmem:[#allocation4 + $0x30] sm:$0xff] %vm1194_vm5, %v1111_v34  ;;  %v1817_v34 = vld [vmem:[#allocation2 + $0xaa] sm:$0xff] }
 0x18d   : > { %1485 = vrot.lane.b32.xlu0 %v5228_v51, %s4788_s19 }
 0x18e   : > { %v1109_v23 = vpop.permute.xlu1 %1108 }
 0x18f   : > { %1200 = vst.msk [vmem:[#allocation4 + $0x28] sm:$0xff] %vm1194_vm5, %v1109_v23  ;;  %v1115_v38 = vpop.permute.xlu0 %1114 }
 0x190   : > { %1353 = vrot.lane.b32.xlu1 %v5823_v45, %s4787_s18  ;;  %1203 = vst.msk [vmem:[#allocation4 + $0x40] sm:$0xff] %vm1194_vm5, %v1115_v38  ;;  %v1625_v38 = vld [vmem:[#allocation2 + $0xb1] sm:$0xff] }
 0x191   : > { %1489 = vrot.lane.b32.xlu0 %v5240_v54, %s4788_s19 }
 0x192   : > { %v1113_v20 = vpop.permute.xlu1 %1112 }
 0x193   : > { %1202 = vst.msk [vmem:[#allocation4 + $0x38] sm:$0xff] %vm1194_vm5, %v1113_v20  ;;  %v1119_v37 = vpop.permute.xlu0 %1118 }
 0x194   : > { %1487 = vrot.lane.b32.xlu1 %v5230_v52, %s4788_s19  ;;  %1205 = vst.msk [vmem:[#allocation4 + $0x50] sm:$0xff] %vm1194_vm5, %v1119_v37  ;;  %v1433_v37 = vld [vmem:[#allocation2 + $0xc0] sm:$0xff] }
 0x195   : > { %1493 = vrot.lane.b32.xlu0 %v5250_v57, %s4788_s19 }
 0x196   : > { %v1117_v51 = vpop.permute.xlu1 %1116 }
 0x197   : > { %1204 = vst.msk [vmem:[#allocation4 + $0x48] sm:$0xff] %vm1194_vm5, %v1117_v51  ;;  %v1123_v33 = vpop.permute.xlu0 %1122 }
 0x198   : > { %1491 = vrot.lane.b32.xlu1 %v5242_v55, %s4788_s19  ;;  %1207 = vst.msk [vmem:[#allocation4 + $0x60] sm:$0xff] %vm1194_vm5, %v1123_v33  ;;  %v2032_v55 = vld [vmem:[%s7146_s2] sm:$0xff]  ;;  %v1818_v33 = vld [vmem:[#allocation2 + $0xb2] sm:$0xff] }
 0x199   : > { %1497 = vrot.lane.b32.xlu0 %v5254_v59, %s4788_s19  ;;  %v2033_v59 = vld [vmem:[%s7146_s2 + $0x8] sm:$0xff] }
 0x19a   : > { %v1121_v54 = vpop.permute.xlu1 %1120  ;;  %v4611_v24 = vpack.c.bf16 %v2033_v59, %v2032_v55  ;;  %v1434_v55 = vld [vmem:[#allocation2 + $0xc8] sm:$0xff] }
 0x19b   : > { %1206 = vst.msk [vmem:[#allocation4 + $0x58] sm:$0xff] %vm1194_vm5, %v1121_v54  ;;  %v1127_v52 = vpop.permute.xlu0 %1126 }
 0x19c   : > { %1495 = vrot.lane.b32.xlu1 %v5252_v58, %s4788_s19  ;;  %1209 = vst.msk [vmem:[#allocation4 + $0x70] sm:$0xff] %vm1194_vm5, %v1127_v52  ;;  %4612 = vmatprep.subr.bf16.mxu0 %v4611_v24  ;;  %v1626_v52 = vld [vmem:[#allocation2 + $0xc1] sm:$0xff] }
 0x19d   : > { %1501 = vrot.lane.b32.xlu0 %v5266_v61, %s4788_s19  ;;  %4614 = vmatpush3.bf16.msra.mxu0 %v4611_v24  ;;  %v2034_v61 = vld [vmem:[%s7146_s2 + $0x10] sm:$0xff]  ;;  %v1819_v24 = vld [vmem:[#allocation2 + $0xc2] sm:$0xff] }
 0x19e   : > { %v1125_v57 = vpop.permute.xlu1 %1124  ;;  %v4615_v26 = vpack.c.bf16 %v2035_v46, %v2034_v61  ;;  %v1435_v46 = vld [vmem:[#allocation2 + $0xd8] sm:$0xff] }
 0x19f   : > { %1208 = vst.msk [vmem:[#allocation4 + $0x68] sm:$0xff] %vm1194_vm5, %v1125_v57  ;;  %v1131_v58 = vpop.permute.xlu0 %1130 }
 0x1a0   : > { %1499 = vrot.lane.b32.xlu1 %v5264_v60, %s4788_s19  ;;  %1211 = vst.msk [vmem:[#allocation4 + $0x80] sm:$0xff] %vm1194_vm5, %v1131_v58  ;;  %v1614_v60 = vld [vmem:[#allocation2 + $0x31] sm:$0xff]  ;;  %4616 = vmatprep.subr.bf16.mxu0 %v4615_v26 }
 0x1a1   : > { %1505 = vrot.lane.b32.xlu0 %v5278_v0, %s4788_s19  ;;  %4618 = vmatpush3.bf16.msra.mxu0 %v4615_v26  ;;  %v1820_v26 = vld [vmem:[#allocation2 + $0xca] sm:$0xff] }
 0x1a2   : > { %v1129_v25 = vpop.permute.xlu1 %1128 }
 0x1a3   : > { %1210 = vst.msk [vmem:[#allocation4 + $0x78] sm:$0xff] %vm1194_vm5, %v1129_v25  ;;  %v1135_v27 = vpop.permute.xlu0 %1134  ;;  %v1627_v25 = vld [vmem:[#allocation2 + $0xc9] sm:$0xff] }
 0x1a4   : > { %1503 = vrot.lane.b32.xlu1 %v5268_v62, %s4788_s19  ;;  %1213 = vst.msk [vmem:[#allocation4 + $0x90] sm:$0xff] %vm1194_vm5, %v1135_v27  ;;  %v2036_v62 = vld [vmem:[%s7146_s2 + $0x20] sm:$0xf] }
 0x1a5   : > { %1678 = vrot.lane.b32.xlu0 %v1614_v60, %s4789_s20  ;;  %4561 = vmatprep.subr.msk.mxu0 %vm2141_vm6, %v2036_v62 }
 0x1a6   : > { %v1133_v0 = vpop.permute.xlu1 %1132  ;;  %4562 = vmatpush3.msk.msra.mxu0 %vm2141_vm6, %v2036_v62 }
 0x1a7   : > { %1212 = vst.msk [vmem:[#allocation4 + $0x88] sm:$0xff] %vm1194_vm5, %v1133_v0  ;;  %v1139_v31 = vpop.permute.xlu0 %1138  ;;  %v1628_v0 = vld [vmem:[#allocation2 + $0xd9] sm:$0xff] }
 0x1a8   : > { %1507 = vrot.lane.b32.xlu1 %v5280_v1, %s4788_s19  ;;  %1215 = vst.msk [vmem:[#allocation4 + $0xa0] sm:$0xff] %vm1194_vm5, %v1139_v31  ;;  %v1436_v31 = vld [vmem:[#allocation2 + $0xe0] sm:$0xff] }
 0x1a9   : > { %1871 = vrot.lane.b32.xlu0 %v1807_v30, %s4790_s29 }
 0x1aa   : > { %v1137_v39 = vpop.permute.xlu1 %1136 }
 0x1ab   : > { %1214 = vst.msk [vmem:[#allocation4 + $0x98] sm:$0xff] %vm1194_vm5, %v1137_v39  ;;  %v1143_v1 = vpop.permute.xlu0 %1142 }
 0x1ac   : > { %1680 = vrot.lane.b32.xlu1 %v1615_v32, %s4789_s20  ;;  %1217 = vst.msk [vmem:[#allocation4 + $0xb0] sm:$0xff] %vm1194_vm5, %v1143_v1  ;;  %v1821_v32 = vld [vmem:[#allocation2 + $0xda] sm:$0xff] }
 0x1ad   : > { %1682 = vrot.lane.b32.xlu0 %v1616_v40, %s4789_s20  ;;  %v1629_v40 = vld [vmem:[#allocation2 + $0xe1] sm:$0xff] }
 0x1ae   : > { %v1141_v42 = vpop.permute.xlu1 %1140 }
 0x1af   : > { %1216 = vst.msk [vmem:[#allocation4 + $0xa8] sm:$0xff] %vm1194_vm5, %v1141_v42  ;;  %v1147_v44 = vpop.permute.xlu0 %1146 }
 0x1b0   : > { %1873 = vrot.lane.b32.xlu1 %v1808_v41, %s4790_s29  ;;  %1219 = vst.msk [vmem:[#allocation4 + $0xc0] sm:$0xff] %vm1194_vm5, %v1147_v44  ;;  %v1437_v41 = vld [vmem:[#allocation2 + $0xf0] sm:$0xff] }
 0x1b1   : > { %1875 = vrot.lane.b32.xlu0 %v1809_v43, %s4790_s29  ;;  %v1822_v43 = vld [vmem:[#allocation2 + $0xe2] sm:$0xff] }
 0x1b2   : > { %v1145_v50 = vpop.permute.xlu1 %1144 }
 0x1b3   : > { %1218 = vst.msk [vmem:[#allocation4 + $0xb8] sm:$0xff] %vm1194_vm5, %v1145_v50  ;;  %v1151_v56 = vpop.permute.xlu0 %1150 }
 0x1b4   : > { %1684 = vrot.lane.b32.xlu1 %v1617_v47, %s4789_s20  ;;  %1221 = vst.msk [vmem:[#allocation4 + $0xd0] sm:$0xff] %vm1194_vm5, %v1151_v56  ;;  %v1630_v47 = vld [vmem:[#allocation2 + $0xf1] sm:$0xff] }
 0x1b5   : > { %1686 = vrot.lane.b32.xlu0 %v1618_v53, %s4789_s20  ;;  %v1438_v53 = vld [vmem:[#allocation2 + $0xf8] sm:$0xff] }
 0x1b6   : > { %v1149_v10 = vpop.permute.xlu1 %1148 }
 0x1b7   : > { %1220 = vst.msk [vmem:[#allocation4 + $0xc8] sm:$0xff] %vm1194_vm5, %v1149_v10  ;;  %v1155_v14 = vpop.permute.xlu0 %1154 }
 0x1b8   : > { %1877 = vrot.lane.b32.xlu1 %v1810_v63, %s4790_s29  ;;  %1223 = vst.msk [vmem:[#allocation4 + $0xe0] sm:$0xff] %vm1194_vm5, %v1155_v14  ;;  %v1823_v63 = vld [vmem:[#allocation2 + $0xf2] sm:$0xff] }
 0x1b9   : > { %1879 = vrot.lane.b32.xlu0 %v1811_v13, %s4790_s29  ;;  %v1631_v13 = vld [vmem:[#allocation2 + $0xf9] sm:$0xff] }
 0x1ba   : > { %v1153_v18 = vpop.permute.xlu1 %1152 }
 0x1bb   : > { %1222 = vst.msk [vmem:[#allocation4 + $0xd8] sm:$0xff] %vm1194_vm5, %v1153_v18  ;;  %v1159_v36 = vpop.permute.xlu0 %1158 }
 0x1bc   : > { %1688 = vrot.lane.b32.xlu1 %v1619_v17, %s4789_s20  ;;  %1225 = vst.msk [vmem:[#allocation4 + $0xf0] sm:$0xff] %vm1194_vm5, %v1159_v36  ;;  %v1439_v17 = vld [vmem:[#allocation2 + $0x108] sm:$0xff] }
 0x1bd   : > { %1690 = vrot.lane.b32.xlu0 %v1620_v21, %s4789_s20  ;;  %v1824_v21 = vld [vmem:[#allocation2 + $0xfa] sm:$0xff] }
 0x1be   : > { %v1157_v2 = vpop.permute.xlu1 %1156 }
 0x1bf   : > { %1224 = vst.msk [vmem:[#allocation4 + $0xe8] sm:$0xff] %vm1194_vm5, %v1157_v2  ;;  %v1292_v48 = vpop.permute.xlu0 %1291 }
 0x1c0   : > { %1881 = vrot.lane.b32.xlu1 %v1812_v22, %s4790_s29  ;;  %1388 = vst.msk [vmem:[#allocation4] sm:$0xff] %vm1387_vm7, %v1292_v48  ;;  %v1632_v22 = vld [vmem:[#allocation2 + $0x109] sm:$0xff] }
 0x1c1   : > { %1883 = vrot.lane.b32.xlu0 %v1813_v28, %s4790_s29  ;;  %v1440_v28 = vld [vmem:[#allocation2 + $0x110] sm:$0xff] }
 0x1c2   : > { %v1161_v29 = vpop.permute.xlu1 %1160 }
 0x1c3   : > { %1226 = vst.msk [vmem:[#allocation4 + $0xf8] sm:$0xff] %vm1194_vm5, %v1161_v29  ;;  %v1296_v6 = vpop.permute.xlu0 %1295 }
 0x1c4   : > { %1692 = vrot.lane.b32.xlu1 %v1621_v4, %s4789_s20  ;;  %1390 = vst.msk [vmem:[#allocation4 + $0x10] sm:$0xff] %vm1387_vm7, %v1296_v6  ;;  %v1825_v4 = vld [vmem:[#allocation2 + $0x10a] sm:$0xff] }
 0x1c5   : > { %1694 = vrot.lane.b32.xlu0 %v1622_v3, %s4789_s20  ;;  %v1633_v3 = vld [vmem:[#allocation2 + $0x111] sm:$0xff] }
 0x1c6   : > { %v1294_v8 = vpop.permute.xlu1 %1293 }
 0x1c7   : > { %1389 = vst.msk [vmem:[#allocation4 + $0x8] sm:$0xff] %vm1387_vm7, %v1294_v8  ;;  %v1300_v11 = vpop.permute.xlu0 %1299 }
 0x1c8   : > { %1885 = vrot.lane.b32.xlu1 %v1814_v5, %s4790_s29  ;;  %1392 = vst.msk [vmem:[#allocation4 + $0x20] sm:$0xff] %vm1387_vm7, %v1300_v11  ;;  %v1441_v5 = vld [vmem:[#allocation2 + $0x120] sm:$0xff] }
 0x1c9   : > { %1887 = vrot.lane.b32.xlu0 %v1815_v7, %s4790_s29  ;;  %v1826_v7 = vld [vmem:[#allocation2 + $0x112] sm:$0xff] }
 0x1ca   : > { %v1298_v15 = vpop.permute.xlu1 %1297 }
 0x1cb   : > { %1391 = vst.msk [vmem:[#allocation4 + $0x18] sm:$0xff] %vm1387_vm7, %v1298_v15  ;;  %v1304_v49 = vpop.permute.xlu0 %1303 }
 0x1cc   : > { %1696 = vrot.lane.b32.xlu1 %v1623_v9, %s4789_s20  ;;  %1394 = vst.msk [vmem:[#allocation4 + $0x30] sm:$0xff] %vm1387_vm7, %v1304_v49  ;;  %v1634_v9 = vld [vmem:[#allocation2 + $0x121] sm:$0xff] }
 0x1cd   : > { %1698 = vrot.lane.b32.xlu0 %v1624_v12, %s4789_s20  ;;  %v1442_v12 = vld [vmem:[#allocation2 + $0x128] sm:$0xff] }
 0x1ce   : > { %v1302_v16 = vpop.permute.xlu1 %1301 }
 0x1cf   : > { %1393 = vst.msk [vmem:[#allocation4 + $0x28] sm:$0xff] %vm1387_vm7, %v1302_v16  ;;  %v1308_v23 = vpop.permute.xlu0 %1307 }
 0x1d0   : > { %1889 = vrot.lane.b32.xlu1 %v1816_v35, %s4790_s29  ;;  %1396 = vst.msk [vmem:[#allocation4 + $0x40] sm:$0xff] %vm1387_vm7, %v1308_v23  ;;  %v1827_v35 = vld [vmem:[#allocation2 + $0x122] sm:$0xff] }
 0x1d1   : > { %1891 = vrot.lane.b32.xlu0 %v1817_v34, %s4790_s29  ;;  %v1635_v34 = vld [vmem:[#allocation2 + $0x129] sm:$0xff] }
 0x1d2   : > { %v1306_v20 = vpop.permute.xlu1 %1305 }
 0x1d3   : > { %1395 = vst.msk [vmem:[#allocation4 + $0x38] sm:$0xff] %vm1387_vm7, %v1306_v20  ;;  %v1312_v51 = vpop.permute.xlu0 %1311 }
 0x1d4   : > { %1700 = vrot.lane.b32.xlu1 %v1625_v38, %s4789_s20  ;;  %1398 = vst.msk [vmem:[#allocation4 + $0x50] sm:$0xff] %vm1387_vm7, %v1312_v51  ;;  %v1443_v38 = vld [vmem:[#allocation2 + $0x138] sm:$0xff] }
 0x1d5   : > { %1509 = vrot.lane.b32.xlu0 %v1433_v37, %s4788_s19  ;;  %v1828_v37 = vld [vmem:[#allocation2 + $0x12a] sm:$0xff] }
 0x1d6   : > { %v1310_v54 = vpop.permute.xlu1 %1309 }
 0x1d7   : > { %1397 = vst.msk [vmem:[#allocation4 + $0x48] sm:$0xff] %vm1387_vm7, %v1310_v54  ;;  %v1316_v57 = vpop.permute.xlu0 %1315 }
 0x1d8   : > { %1893 = vrot.lane.b32.xlu1 %v1818_v33, %s4790_s29  ;;  %1400 = vst.msk [vmem:[#allocation4 + $0x60] sm:$0xff] %vm1387_vm7, %v1316_v57  ;;  %v1636_v33 = vld [vmem:[#allocation2 + $0x139] sm:$0xff] }
 0x1d9   : > { %1702 = vrot.lane.b32.xlu0 %v1626_v52, %s4789_s20  ;;  %v1444_v52 = vld [vmem:[#allocation2 + $0x140] sm:$0xff] }
 0x1da   : > { %v1314_v59 = vpop.permute.xlu1 %1313 }
 0x1db   : > { %1399 = vst.msk [vmem:[#allocation4 + $0x58] sm:$0xff] %vm1387_vm7, %v1314_v59  ;;  %v1320_v58 = vpop.permute.xlu0 %1319 }
 0x1dc   : > { %1511 = vrot.lane.b32.xlu1 %v1434_v55, %s4788_s19  ;;  %1402 = vst.msk [vmem:[#allocation4 + $0x70] sm:$0xff] %vm1387_vm7, %v1320_v58  ;;  %v1829_v55 = vld [vmem:[#allocation2 + $0x13a] sm:$0xff] }
 0x1dd   : > { %1895 = vrot.lane.b32.xlu0 %v1819_v24, %s4790_s29  ;;  %v1637_v24 = vld [vmem:[#allocation2 + $0x141] sm:$0xff] }
 0x1de   : > { %v1318_v61 = vpop.permute.xlu1 %1317 }
 0x1df   : > { %1401 = vst.msk [vmem:[#allocation4 + $0x68] sm:$0xff] %vm1387_vm7, %v1318_v61  ;;  %v1324_v60 = vpop.permute.xlu0 %1323 }
 0x1e0   : > { %1704 = vrot.lane.b32.xlu1 %v1627_v25, %s4789_s20  ;;  %1404 = vst.msk [vmem:[#allocation4 + $0x80] sm:$0xff] %vm1387_vm7, %v1324_v60  ;;  %v1445_v25 = vld [vmem:[#allocation2 + $0x150] sm:$0xff] }
 0x1e1   : > { %1513 = vrot.lane.b32.xlu0 %v1435_v46, %s4788_s19  ;;  %v1830_v46 = vld [vmem:[#allocation2 + $0x142] sm:$0xff] }
 0x1e2   : > { %v1322_v27 = vpop.permute.xlu1 %1321 }
 0x1e3   : > { %1403 = vst.msk [vmem:[#allocation4 + $0x78] sm:$0xff] %vm1387_vm7, %v1322_v27  ;;  %v1328_v30 = vpop.permute.xlu0 %1327 }
 0x1e4   : > { %1897 = vrot.lane.b32.xlu1 %v1820_v26, %s4790_s29  ;;  %1406 = vst.msk [vmem:[#allocation4 + $0x90] sm:$0xff] %vm1387_vm7, %v1328_v30  ;;  %v1638_v26 = vld [vmem:[#allocation2 + $0x151] sm:$0xff] }
 0x1e5   : > { %1706 = vrot.lane.b32.xlu0 %v1628_v0, %s4789_s20  ;;  %v1446_v0 = vld [vmem:[#allocation2 + $0x158] sm:$0xff] }
 0x1e6   : > { %v1326_v62 = vpop.permute.xlu1 %1325 }
 0x1e7   : > { %1405 = vst.msk [vmem:[#allocation4 + $0x88] sm:$0xff] %vm1387_vm7, %v1326_v62  ;;  %v1332_v39 = vpop.permute.xlu0 %1331 }
 0x1e8   : > { %1515 = vrot.lane.b32.xlu1 %v1436_v31, %s4788_s19  ;;  %1408 = vst.msk [vmem:[#allocation4 + $0xa0] sm:$0xff] %vm1387_vm7, %v1332_v39  ;;  %v1831_v31 = vld [vmem:[#allocation2 + $0x152] sm:$0xff] }
 0x1e9   : > { %1899 = vrot.lane.b32.xlu0 %v1821_v32, %s4790_s29  ;;  %v1639_v39 = vld [vmem:[#allocation2 + $0x159] sm:$0xff] }
 0x1ea   : > { %v1330_v1 = vpop.permute.xlu1 %1329 }
 0x1eb   : > { %1407 = vst.msk [vmem:[#allocation4 + $0x98] sm:$0xff] %vm1387_vm7, %v1330_v1  ;;  %v1336_v42 = vpop.permute.xlu0 %1335  ;;  %v1447_v1 = vld [vmem:[#allocation2 + $0x168] sm:$0xff] }
 0x1ec   : > { %1708 = vrot.lane.b32.xlu1 %v1629_v40, %s4789_s20  ;;  %1410 = vst.msk [vmem:[#allocation4 + $0xb0] sm:$0xff] %vm1387_vm7, %v1336_v42  ;;  %v1832_v42 = vld [vmem:[#allocation2 + $0x15a] sm:$0xff] }
 0x1ed   : > { %1517 = vrot.lane.b32.xlu0 %v1437_v41, %s4788_s19 }
 0x1ee   : > { %v1334_v44 = vpop.permute.xlu1 %1333 }
 0x1ef   : > { %1409 = vst.msk [vmem:[#allocation4 + $0xa8] sm:$0xff] %vm1387_vm7, %v1334_v44  ;;  %v1340_v50 = vpop.permute.xlu0 %1339 }
 0x1f0   : > { %1901 = vrot.lane.b32.xlu1 %v1822_v43, %s4790_s29  ;;  %1412 = vst.msk [vmem:[#allocation4 + $0xc0] sm:$0xff] %vm1387_vm7, %v1340_v50 }
 0x1f1   : > { %1710 = vrot.lane.b32.xlu0 %v1630_v47, %s4789_s20  ;;  %v1640_v47 = vld [vmem:[#allocation2 + $0x169] sm:$0xff] }
 0x1f2   : > { %v1338_v56 = vpop.permute.xlu1 %1337 }
 0x1f3   : > { %1411 = vst.msk [vmem:[#allocation4 + $0xb8] sm:$0xff] %vm1387_vm7, %v1338_v56  ;;  %v1344_v10 = vpop.permute.xlu0 %1343  ;;  %v1448_v56 = vld [vmem:[#allocation2 + $0x170] sm:$0xff] }
 0x1f4   : > { %1519 = vrot.lane.b32.xlu1 %v1438_v53, %s4788_s19  ;;  %1414 = vst.msk [vmem:[#allocation4 + $0xd0] sm:$0xff] %vm1387_vm7, %v1344_v10  ;;  %v1833_v10 = vld [vmem:[#allocation2 + $0x16a] sm:$0xff] }
 0x1f5   : > { %1903 = vrot.lane.b32.xlu0 %v1823_v63, %s4790_s29 }
 0x1f6   : > { %v1342_v14 = vpop.permute.xlu1 %1341 }
 0x1f7   : > { %1413 = vst.msk [vmem:[#allocation4 + $0xc8] sm:$0xff] %vm1387_vm7, %v1342_v14  ;;  %v1348_v18 = vpop.permute.xlu0 %1347  ;;  %v1641_v14 = vld [vmem:[#allocation2 + $0x171] sm:$0xff] }
 0x1f8   : > { %1712 = vrot.lane.b32.xlu1 %v1631_v13, %s4789_s20  ;;  %1416 = vst.msk [vmem:[#allocation4 + $0xe0] sm:$0xff] %vm1387_vm7, %v1348_v18 }
 0x1f9   : > { %1521 = vrot.lane.b32.xlu0 %v1439_v17, %s4788_s19 }
 0x1fa   : > { %v1346_v36 = vpop.permute.xlu1 %1345 }
 0x1fb   : > { %1415 = vst.msk [vmem:[#allocation4 + $0xd8] sm:$0xff] %vm1387_vm7, %v1346_v36  ;;  %v1352_v2 = vpop.permute.xlu0 %1351 }
 0x1fc   : > { %1905 = vrot.lane.b32.xlu1 %v1824_v21, %s4790_s29  ;;  %1418 = vst.msk [vmem:[#allocation4 + $0xf0] sm:$0xff] %vm1387_vm7, %v1352_v2  ;;  %v1449_v21 = vld [vmem:[#allocation2 + $0x180] sm:$0xff]  ;;  %v1834_v2 = vld [vmem:[#allocation2 + $0x172] sm:$0xff] }
 0x1fd   : > { %1714 = vrot.lane.b32.xlu0 %v1632_v22, %s4789_s20 }
 0x1fe   : > { %v1350_v48 = vpop.permute.xlu1 %1349 }
 0x1ff   : > { %1417 = vst.msk [vmem:[#allocation4 + $0xe8] sm:$0xff] %vm1387_vm7, %v1350_v48  ;;  %v1486_v29 = vpop.permute.xlu0 %1485  ;;  %v1642_v48 = vld [vmem:[#allocation2 + $0x181] sm:$0xff] }
 0x200   : > { %1523 = vrot.lane.b32.xlu1 %v1440_v28, %s4788_s19  ;;  %1582 = vst.msk [vmem:[#allocation4] sm:$0xff] %vm1581_vm8, %v1486_v29  ;;  %v1450_v29 = vld [vmem:[#allocation2 + $0x188] sm:$0xff] }
 0x201   : > { %1907 = vrot.lane.b32.xlu0 %v1825_v4, %s4790_s29 }
 0x202   : > { %v1354_v6 = vpop.permute.xlu1 %1353 }
 0x203   : > { %1419 = vst.msk [vmem:[#allocation4 + $0xf8] sm:$0xff] %vm1387_vm7, %v1354_v6  ;;  %v1490_v8 = vpop.permute.xlu0 %1489 }
 0x204   : > { %1716 = vrot.lane.b32.xlu1 %v1633_v3, %s4789_s20  ;;  %1584 = vst.msk [vmem:[#allocation4 + $0x10] sm:$0xff] %vm1581_vm8, %v1490_v8 }
 0x205   : > { %1525 = vrot.lane.b32.xlu0 %v1441_v5, %s4788_s19 }
 0x206   : > { %v1488_v11 = vpop.permute.xlu1 %1487 }
 0x207   : > { %1583 = vst.msk [vmem:[#allocation4 + $0x8] sm:$0xff] %vm1581_vm8, %v1488_v11  ;;  %v1494_v15 = vpop.permute.xlu0 %1493 }
 0x208   : > { %1909 = vrot.lane.b32.xlu1 %v1826_v7, %s4790_s29  ;;  %1586 = vst.msk [vmem:[#allocation4 + $0x20] sm:$0xff] %vm1581_vm8, %v1494_v15  ;;  %v1643_v7 = vld [vmem:[#allocation2 + $0x189] sm:$0xff] }
 0x209   : > { %1718 = vrot.lane.b32.xlu0 %v1634_v9, %s4789_s20  ;;  %v1451_v9 = vld [vmem:[#allocation2 + $0x198] sm:$0xff] }
 0x20a   : > { %v1492_v49 = vpop.permute.xlu1 %1491 }
 0x20b   : > { %1585 = vst.msk [vmem:[#allocation4 + $0x18] sm:$0xff] %vm1581_vm8, %v1492_v49  ;;  %v1498_v16 = vpop.permute.xlu0 %1497 }
 0x20c   : > { %1527 = vrot.lane.b32.xlu1 %v1442_v12, %s4788_s19  ;;  %1588 = vst.msk [vmem:[#allocation4 + $0x30] sm:$0xff] %vm1581_vm8, %v1498_v16  ;;  %v1452_v16 = vld [vmem:[#allocation2 + $0x1a0] sm:$0xff] }
 0x20d   : > { %1911 = vrot.lane.b32.xlu0 %v1827_v35, %s4790_s29 }
 0x20e   : > { %v1496_v23 = vpop.permute.xlu1 %1495 }
 0x20f   : > { %1587 = vst.msk [vmem:[#allocation4 + $0x28] sm:$0xff] %vm1581_vm8, %v1496_v23  ;;  %v1502_v20 = vpop.permute.xlu0 %1501 }
 0x210   : > { %1720 = vrot.lane.b32.xlu1 %v1635_v34, %s4789_s20  ;;  %1590 = vst.msk [vmem:[#allocation4 + $0x40] sm:$0xff] %vm1581_vm8, %v1502_v20 }
 0x211   : > { %1529 = vrot.lane.b32.xlu0 %v1443_v38, %s4788_s19 }
 0x212   : > { %v1500_v51 = vpop.permute.xlu1 %1499 }
 0x213   : > { %1589 = vst.msk [vmem:[#allocation4 + $0x38] sm:$0xff] %vm1581_vm8, %v1500_v51  ;;  %v1506_v54 = vpop.permute.xlu0 %1505 }
 0x214   : > { %1913 = vrot.lane.b32.xlu1 %v1828_v37, %s4790_s29  ;;  %1592 = vst.msk [vmem:[#allocation4 + $0x50] sm:$0xff] %vm1581_vm8, %v1506_v54 }
 0x215   : > { %1722 = vrot.lane.b32.xlu0 %v1636_v33, %s4789_s20 }
 0x216   : > { %v1504_v57 = vpop.permute.xlu1 %1503 }
 0x217   : > { %1591 = vst.msk [vmem:[#allocation4 + $0x48] sm:$0xff] %vm1581_vm8, %v1504_v57  ;;  %v1679_v59 = vpop.permute.xlu0 %1678 }
 0x218   : > { %1531 = vrot.lane.b32.xlu1 %v1444_v52, %s4788_s19  ;;  %1775 = vst.msk [vmem:[#allocation4] sm:$0xff] %vm1774_vm9, %v1679_v59 }
 0x219   : > { %1915 = vrot.lane.b32.xlu0 %v1829_v55, %s4790_s29 }
 0x21a   : > { %v1508_v58 = vpop.permute.xlu1 %1507 }
 0x21b   : > { %1593 = vst.msk [vmem:[#allocation4 + $0x58] sm:$0xff] %vm1581_vm8, %v1508_v58  ;;  %v1872_v61 = vpop.permute.xlu0 %1871 }
 0x21c   : > { %1724 = vrot.lane.b32.xlu1 %v1637_v24, %s4789_s20  ;;  %1968 = vst.msk [vmem:[#allocation4] sm:$0xff] %vm1967_vm10, %v1872_v61 }
 0x21d   : > { %1533 = vrot.lane.b32.xlu0 %v1445_v25, %s4788_s19 }
 0x21e   : > { %v1681_v60 = vpop.permute.xlu1 %1680 }
 0x21f   : > { %1776 = vst.msk [vmem:[#allocation4 + $0x8] sm:$0xff] %vm1774_vm9, %v1681_v60  ;;  %v1683_v27 = vpop.permute.xlu0 %1682 }
 0x220   : > { %1917 = vrot.lane.b32.xlu1 %v1830_v46, %s4790_s29  ;;  %1777 = vst.msk [vmem:[#allocation4 + $0x10] sm:$0xff] %vm1774_vm9, %v1683_v27 }
 0x221   : > { %1726 = vrot.lane.b32.xlu0 %v1638_v26, %s4789_s20 }
 0x222   : > { %v1874_v30 = vpop.permute.xlu1 %1873 }
 0x223   : > { %1969 = vst.msk [vmem:[#allocation4 + $0x8] sm:$0xff] %vm1967_vm10, %v1874_v30  ;;  %v1876_v62 = vpop.permute.xlu0 %1875  ;;  %v2000_v32 = vld [vmem:[#allocation4] sm:$0xff] }
 0x224   : > { %1535 = vrot.lane.b32.xlu1 %v1446_v0, %s4788_s19  ;;  %1970 = vst.msk [vmem:[#allocation4 + $0x10] sm:$0xff] %vm1967_vm10, %v1876_v62  ;;  %4563 = vmatprep.mubr.msk.f32.mxu0 %vm2044_vm11, %v2000_v32 }
 0x225   : > { %1919 = vrot.lane.b32.xlu0 %v1831_v31, %s4790_s29 }
 0x226   : > { %v1685_v40 = vpop.permute.xlu1 %1684 }
 0x227   : > { %1778 = vst.msk [vmem:[#allocation4 + $0x18] sm:$0xff] %vm1774_vm9, %v1685_v40  ;;  %v1687_v41 = vpop.permute.xlu0 %1686 }
 0x228   : > { %1728 = vrot.lane.b32.xlu1 %v1639_v39, %s4789_s20  ;;  %1779 = vst.msk [vmem:[#allocation4 + $0x20] sm:$0xff] %vm1774_vm9, %v1687_v41 }
 0x229   : > { %1537 = vrot.lane.b32.xlu0 %v1447_v1, %s4788_s19 }
 0x22a   : > { %v1878_v43 = vpop.permute.xlu1 %1877  ;;  %v2001_v44 = vld [vmem:[#allocation4 + $0x8] sm:$0xff] }
 0x22b   : > { %1971 = vst.msk [vmem:[#allocation4 + $0x18] sm:$0xff] %vm1967_vm10, %v1878_v43  ;;  %4564 = vmatmul.mubr.msk.f32.vlgmr.msra.gmra.mrb[0].mxu0 %vm2044_vm11, %v2001_v44  ;;  %v1880_v50 = vpop.permute.xlu0 %1879  ;;  %v2002_v53 = vld [vmem:[#allocation4 + $0x10] sm:$0xff] }
 0x22c   : > { %1921 = vrot.lane.b32.xlu1 %v1832_v42, %s4790_s29  ;;  %1972 = vst.msk [vmem:[#allocation4 + $0x20] sm:$0xff] %vm1967_vm10, %v1880_v50  ;;  %4566 = vmatprep.mubr.msk.f32.mxu0 %vm2044_vm11, %v2002_v53 }
 0x22d   : > { %1730 = vrot.lane.b32.xlu0 %v1640_v47, %s4789_s20 }
 0x22e   : > { %v1689_v63 = vpop.permute.xlu1 %1688 }
 0x22f   : > { %1780 = vst.msk [vmem:[#allocation4 + $0x28] sm:$0xff] %vm1774_vm9, %v1689_v63  ;;  %v1691_v13 = vpop.permute.xlu0 %1690 }
 0x230   : > { %1539 = vrot.lane.b32.xlu1 %v1448_v56, %s4788_s19  ;;  %1781 = vst.msk [vmem:[#allocation4 + $0x30] sm:$0xff] %vm1774_vm9, %v1691_v13  ;;  %v1645_v13 = vld [vmem:[#allocation2 + $0x1a1] sm:$0xff] }
 0x231   : > { %1923 = vrot.lane.b32.xlu0 %v1833_v10, %s4790_s29 }
 0x232   : > { %v1882_v17 = vpop.permute.xlu1 %1881  ;;  %v2003_v18 = vld [vmem:[#allocation4 + $0x18] sm:$0xff] }
 0x233   : > { %1973 = vst.msk [vmem:[#allocation4 + $0x28] sm:$0xff] %vm1967_vm10, %v1882_v17  ;;  %4567 = vmatmul.mubr.msk.f32.gmra.mrb[2].mxu0 %vm2044_vm11, %v2003_v18  ;;  %v1884_v36 = vpop.permute.xlu0 %1883  ;;  %v2004_v22 = vld [vmem:[#allocation4 + $0x20] sm:$0xff] }
 0x234   : > { %1732 = vrot.lane.b32.xlu1 %v1641_v14, %s4789_s20  ;;  %1974 = vst.msk [vmem:[#allocation4 + $0x30] sm:$0xff] %vm1967_vm10, %v1884_v36  ;;  %4569 = vmatprep.mubr.msk.f32.mxu0 %vm2044_vm11, %v2004_v22  ;;  %v1644_v14 = vld [vmem:[#allocation2 + $0x199] sm:$0xff]  ;;  %v1838_v36 = vld [vmem:[#allocation2 + $0x1a2] sm:$0xff] }
 0x235   : > { %1541 = vrot.lane.b32.xlu0 %v1449_v21, %s4788_s19  ;;  %v1837_v22 = vld [vmem:[#allocation2 + $0x19a] sm:$0xff] }
 0x236   : > { %v1693_v28 = vpop.permute.xlu1 %1692 }
 0x237   : > { %1782 = vst.msk [vmem:[#allocation4 + $0x38] sm:$0xff] %vm1774_vm9, %v1693_v28  ;;  %v1695_v4 = vpop.permute.xlu0 %1694 }
 0x238   : > { %1925 = vrot.lane.b32.xlu1 %v1834_v2, %s4790_s29  ;;  %1783 = vst.msk [vmem:[#allocation4 + $0x40] sm:$0xff] %vm1774_vm9, %v1695_v4  ;;  %v2553_v4 = vld [vmem:[#allocation3 + $0x1] sm:$0xff] }
 0x239   : > { %1734 = vrot.lane.b32.xlu0 %v1642_v48, %s4789_s20  ;;  %v2554_v48 = vld [vmem:[#allocation3 + $0x9] sm:$0xff] }
 0x23a   : > { %v1886_v3 = vpop.permute.xlu1 %1885  ;;  %v2005_v6 = vld [vmem:[#allocation4 + $0x28] sm:$0xff] }
 0x23b   : > { %1975 = vst.msk [vmem:[#allocation4 + $0x38] sm:$0xff] %vm1967_vm10, %v1886_v3  ;;  %4570 = vmatmul.mubr.msk.f32.gmra.mrb[4].mxu0 %vm2044_vm11, %v2005_v6  ;;  %v1888_v5 = vpop.permute.xlu0 %1887  ;;  %v2006_v8 = vld [vmem:[#allocation4 + $0x30] sm:$0xff] }
 0x23c   : > { %1543 = vrot.lane.b32.xlu1 %v1450_v29, %s4788_s19  ;;  %1976 = vst.msk [vmem:[#allocation4 + $0x40] sm:$0xff] %vm1967_vm10, %v1888_v5  ;;  %4572 = vmatprep.mubr.msk.f32.mxu0 %vm2044_vm11, %v2006_v8 }
 0x23d   : > { %1927 = vrot.lane.b32.xlu0 %v5813_v19, %s4790_s29 }
 0x23e   : > { %v1697_v11 = vpop.permute.xlu1 %1696 }
 0x23f   : > { %1784 = vst.msk [vmem:[#allocation4 + $0x48] sm:$0xff] %vm1774_vm9, %v1697_v11  ;;  %v1699_v15 = vpop.permute.xlu0 %1698 }
 0x240   : > { %1736 = vrot.lane.b32.xlu1 %v1643_v7, %s4789_s20  ;;  %1785 = vst.msk [vmem:[#allocation4 + $0x50] sm:$0xff] %vm1774_vm9, %v1699_v15 }
 0x241   : > { %1545 = vrot.lane.b32.xlu0 %v1451_v9, %s4788_s19 }
 0x242   : > { %v1890_v12 = vpop.permute.xlu1 %1889  ;;  %v2007_v49 = vld [vmem:[#allocation4 + $0x38] sm:$0xff] }
 0x243   : > { %1977 = vst.msk [vmem:[#allocation4 + $0x48] sm:$0xff] %vm1967_vm10, %v1890_v12  ;;  %4573 = vmatmul.mubr.msk.f32.gmra.mrb[6].mxu0 %vm2044_vm11, %v2007_v49  ;;  %v1892_v19 = vpop.permute.xlu0 %1891  ;;  %v2008_v35 = vld [vmem:[#allocation4 + $0x40] sm:$0xff] }
 0x244   : > { %1929 = vrot.lane.b32.xlu1 %v5823_v45, %s4790_s29  ;;  %1978 = vst.msk [vmem:[#allocation4 + $0x50] sm:$0xff] %vm1967_vm10, %v1892_v19  ;;  %4575 = vmatprep.mubr.msk.f32.mxu0 %vm2044_vm11, %v2008_v35 }
 0x245   : > { %1738 = vrot.lane.b32.xlu0 %v1644_v14, %s4789_s20 }
 0x246   : > { %v1701_v34 = vpop.permute.xlu1 %1700 }
 0x247   : > { %1786 = vst.msk [vmem:[#allocation4 + $0x58] sm:$0xff] %vm1774_vm9, %v1701_v34  ;;  %v1510_v23 = vpop.permute.xlu0 %1509 }
 0x248   : > { %1547 = vrot.lane.b32.xlu1 %v1452_v16, %s4788_s19  ;;  %1594 = vst.msk [vmem:[#allocation4 + $0x60] sm:$0xff] %vm1581_vm8, %v1510_v23 }
 0x249   : > { %1931 = vrot.lane.b32.xlu0 %v1837_v22, %s4790_s29 }
 0x24a   : > { %v1894_v38 = vpop.permute.xlu1 %1893  ;;  %v2009_v20 = vld [vmem:[#allocation4 + $0x48] sm:$0xff] }
 0x24b   : > { %1979 = vst.msk [vmem:[#allocation4 + $0x58] sm:$0xff] %vm1967_vm10, %v1894_v38  ;;  %4576 = vmatmul.mubr.msk.f32.gmra.mrb[8].mxu0 %vm2044_vm11, %v2009_v20  ;;  %v1703_v45 = vpop.permute.xlu0 %1702  ;;  %v2010_v37 = vld [vmem:[#allocation4 + $0x50] sm:$0xff] }
 0x24c   : > { %1787 = vst.msk [vmem:[#allocation4 + $0x60] sm:$0xff] %vm1774_vm9, %v1703_v45  ;;  %4578 = vmatprep.mubr.msk.f32.mxu0 %vm2044_vm11, %v2010_v37  ;;  %1740 = vrot.lane.b32.xlu1 %v1645_v13, %s4789_s20 }
 0x24d   : > { %2617 = vrot.lane.b32.xlu0 %v2553_v4, %s4783_s14 }
 0x24e   : > { %v1512_v51 = vpop.permute.xlu1 %1511 }
 0x24f   : > { %1595 = vst.msk [vmem:[#allocation4 + $0x68] sm:$0xff] %vm1581_vm8, %v1512_v51  ;;  %v1896_v33 = vpop.permute.xlu0 %1895 }
 0x250   : > { %1980 = vst.msk [vmem:[#allocation4 + $0x60] sm:$0xff] %vm1967_vm10, %v1896_v33  ;;  %1933 = vrot.lane.b32.xlu1 %v1838_v36, %s4790_s29 }
 0x252   : > { %v1705_v54 = vpop.permute.xlu1 %1704  ;;  %v2011_v52 = vld [vmem:[#allocation4 + $0x58] sm:$0xff] }
 0x253   : > { %1788 = vst.msk [vmem:[#allocation4 + $0x68] sm:$0xff] %vm1774_vm9, %v1705_v54  ;;  %4579 = vmatmul.mubr.msk.f32.gmra.mrb[10].mxu0 %vm2044_vm11, %v2011_v52  ;;  %v1514_v57 = vpop.permute.xlu0 %1513 }
 0x254   : > { %1596 = vst.msk [vmem:[#allocation4 + $0x70] sm:$0xff] %vm1581_vm8, %v1514_v57  ;;  %2619 = vrot.lane.b32.xlu1 %v2554_v48, %s4783_s14 }
 0x256   : > { %v1898_v55 = vpop.permute.xlu1 %1897 }
 0x257   : > { %1981 = vst.msk [vmem:[#allocation4 + $0x68] sm:$0xff] %vm1967_vm10, %v1898_v55  ;;  %v1707_v59 = vpop.permute.xlu0 %1706  ;;  %v2012_v24 = vld [vmem:[#allocation4 + $0x60] sm:$0xff] }
 0x258   : > { %1789 = vst.msk [vmem:[#allocation4 + $0x70] sm:$0xff] %vm1774_vm9, %v1707_v59  ;;  %4581 = vmatprep.mubr.msk.f32.mxu0 %vm2044_vm11, %v2012_v24 }
 0x25a   : > { %v1516_v58 = vpop.permute.xlu1 %1515 }
 0x25b   : > { %1597 = vst.msk [vmem:[#allocation4 + $0x78] sm:$0xff] %vm1581_vm8, %v1516_v58  ;;  %v1900_v25 = vpop.permute.xlu0 %1899 }
 0x25c   : > { %1982 = vst.msk [vmem:[#allocation4 + $0x70] sm:$0xff] %vm1967_vm10, %v1900_v25 }
 0x25e   : > { %v1709_v61 = vpop.permute.xlu1 %1708  ;;  %v2013_v46 = vld [vmem:[#allocation4 + $0x68] sm:$0xff] }
 0x25f   : > { %1790 = vst.msk [vmem:[#allocation4 + $0x78] sm:$0xff] %vm1774_vm9, %v1709_v61  ;;  %4582 = vmatmul.mubr.msk.f32.gmra.mrb[12].mxu0 %vm2044_vm11, %v2013_v46  ;;  %v1518_v60 = vpop.permute.xlu0 %1517 }
 0x260   : > { %1598 = vst.msk [vmem:[#allocation4 + $0x80] sm:$0xff] %vm1581_vm8, %v1518_v60 }
 0x262   : > { %v1902_v26 = vpop.permute.xlu1 %1901 }
 0x263   : > { %1983 = vst.msk [vmem:[#allocation4 + $0x78] sm:$0xff] %vm1967_vm10, %v1902_v26  ;;  %v1711_v27 = vpop.permute.xlu0 %1710  ;;  %v2014_v0 = vld [vmem:[#allocation4 + $0x70] sm:$0xff] }
 0x264   : > { %1791 = vst.msk [vmem:[#allocation4 + $0x80] sm:$0xff] %vm1774_vm9, %v1711_v27  ;;  %4584 = vmatprep.mubr.msk.f32.mxu0 %vm2044_vm11, %v2014_v0 }
 0x266   : > { %v1520_v30 = vpop.permute.xlu1 %1519 }
 0x267   : > { %1599 = vst.msk [vmem:[#allocation4 + $0x88] sm:$0xff] %vm1581_vm8, %v1520_v30  ;;  %v1904_v31 = vpop.permute.xlu0 %1903 }
 0x268   : > { %1984 = vst.msk [vmem:[#allocation4 + $0x80] sm:$0xff] %vm1967_vm10, %v1904_v31  ;;  %v2490_v31 = vld [vmem:[#allocation3 + $0x8] sm:$0xff] }
 0x269   : > { %2522 = vst.msk [vmem:[#allocation4 + $0x8] sm:$0xff] %vm270_vm0, %v2490_v31 }
 0x26a   : > { %v1713_v62 = vpop.permute.xlu1 %1712  ;;  %v2015_v32 = vld [vmem:[#allocation4 + $0x78] sm:$0xff] }
 0x26b   : > { %1792 = vst.msk [vmem:[#allocation4 + $0x88] sm:$0xff] %vm1774_vm9, %v1713_v62  ;;  %4585 = vmatmul.mubr.msk.f32.gmra.mrb[14].mxu0 %vm2044_vm11, %v2015_v32  ;;  %v1522_v39 = vpop.permute.xlu0 %1521  ;;  %v2489_v62 = vld [vmem:[#allocation3] sm:$0xff] }
 0x26c   : > { %1600 = vst.msk [vmem:[#allocation4 + $0x90] sm:$0xff] %vm1581_vm8, %v1522_v39 }
 0x26d   : > { %2521 = vst.msk [vmem:[#allocation4] sm:$0xff] %vm270_vm0, %v2489_v62 }
 0x26e   : > { %v1906_v40 = vpop.permute.xlu1 %1905 }
 0x26f   : > { %1985 = vst.msk [vmem:[#allocation4 + $0x88] sm:$0xff] %vm1967_vm10, %v1906_v40  ;;  %v1715_v1 = vpop.permute.xlu0 %1714  ;;  %v2016_v41 = vld [vmem:[#allocation4 + $0x80] sm:$0xff] }
 0x270   : > { %1793 = vst.msk [vmem:[#allocation4 + $0x90] sm:$0xff] %vm1774_vm9, %v1715_v1  ;;  %4587 = vmatprep.mubr.msk.f32.mxu0 %vm2044_vm11, %v2016_v41  ;;  %v6146_v41 = vld [vmem:[%s7147_s3] ss:$0 sm:$0xff] }
 0x272   : > { %v1524_v42 = vpop.permute.xlu1 %1523 }
 0x273   : > { %1601 = vst.msk [vmem:[#allocation4 + $0x98] sm:$0xff] %vm1581_vm8, %v1524_v42  ;;  %v1908_v43 = vpop.permute.xlu0 %1907 }
 0x274   : > { %1986 = vst.msk [vmem:[#allocation4 + $0x90] sm:$0xff] %vm1967_vm10, %v1908_v43 }
 0x276   : > { %v1717_v44 = vpop.permute.xlu1 %1716  ;;  %v2017_v47 = vld [vmem:[#allocation4 + $0x88] sm:$0xff] }
 0x277   : > { %1794 = vst.msk [vmem:[#allocation4 + $0x98] sm:$0xff] %vm1774_vm9, %v1717_v44  ;;  %4588 = vmatmul.mubr.msk.f32.gmra.mrb[16].mxu0 %vm2044_vm11, %v2017_v47  ;;  %v1526_v50 = vpop.permute.xlu0 %1525 }
 0x278   : > { %1602 = vst.msk [vmem:[#allocation4 + $0xa0] sm:$0xff] %vm1581_vm8, %v1526_v50 }
 0x27a   : > { %v1910_v53 = vpop.permute.xlu1 %1909 }
 0x27b   : > { %1987 = vst.msk [vmem:[#allocation4 + $0x98] sm:$0xff] %vm1967_vm10, %v1910_v53  ;;  %v1719_v56 = vpop.permute.xlu0 %1718  ;;  %v2018_v63 = vld [vmem:[#allocation4 + $0x90] sm:$0xff] }
 0x27c   : > { %1795 = vst.msk [vmem:[#allocation4 + $0xa0] sm:$0xff] %vm1774_vm9, %v1719_v56  ;;  %4590 = vmatprep.mubr.msk.f32.mxu0 %vm2044_vm11, %v2018_v63 }
 0x27e   : > { %v1528_v10 = vpop.permute.xlu1 %1527 }
 0x27f   : > { %1603 = vst.msk [vmem:[#allocation4 + $0xa8] sm:$0xff] %vm1581_vm8, %v1528_v10  ;;  %v1912_v17 = vpop.permute.xlu0 %1911 }
 0x280   : > { %1988 = vst.msk [vmem:[#allocation4 + $0xa0] sm:$0xff] %vm1967_vm10, %v1912_v17 }
 0x282   : > { %v1721_v18 = vpop.permute.xlu1 %1720  ;;  %v2019_v21 = vld [vmem:[#allocation4 + $0x98] sm:$0xff] }
 0x283   : > { %1796 = vst.msk [vmem:[#allocation4 + $0xa8] sm:$0xff] %vm1774_vm9, %v1721_v18  ;;  %4591 = vmatmul.mubr.msk.f32.gmra.mrb[18].mxu0 %vm2044_vm11, %v2019_v21  ;;  %v1530_v2 = vpop.permute.xlu0 %1529 }
 0x284   : > { %1604 = vst.msk [vmem:[#allocation4 + $0xb0] sm:$0xff] %vm1581_vm8, %v1530_v2 }
 0x286   : > { %v1914_v28 = vpop.permute.xlu1 %1913 }
 0x287   : > { %1989 = vst.msk [vmem:[#allocation4 + $0xa8] sm:$0xff] %vm1967_vm10, %v1914_v28  ;;  %v1723_v29 = vpop.permute.xlu0 %1722  ;;  %v2020_v3 = vld [vmem:[#allocation4 + $0xa0] sm:$0xff] }
 0x288   : > { %1797 = vst.msk [vmem:[#allocation4 + $0xb0] sm:$0xff] %vm1774_vm9, %v1723_v29  ;;  %4593 = vmatprep.mubr.msk.f32.mxu0 %vm2044_vm11, %v2020_v3 }
 0x28a   : > { %v1532_v6 = vpop.permute.xlu1 %1531 }
 0x28b   : > { %1605 = vst.msk [vmem:[#allocation4 + $0xb8] sm:$0xff] %vm1581_vm8, %v1532_v6  ;;  %v1916_v5 = vpop.permute.xlu0 %1915 }
 0x28c   : > { %1990 = vst.msk [vmem:[#allocation4 + $0xb0] sm:$0xff] %vm1967_vm10, %v1916_v5 }
 0x28e   : > { %v1725_v8 = vpop.permute.xlu1 %1724  ;;  %v2021_v7 = vld [vmem:[#allocation4 + $0xa8] sm:$0xff] }
 0x28f   : > { %1798 = vst.msk [vmem:[#allocation4 + $0xb8] sm:$0xff] %vm1774_vm9, %v1725_v8  ;;  %4594 = vmatmul.mubr.msk.f32.gmra.mrb[20].mxu0 %vm2044_vm11, %v2021_v7  ;;  %v1534_v11 = vpop.permute.xlu0 %1533 }
 0x290   : > { %1606 = vst.msk [vmem:[#allocation4 + $0xc0] sm:$0xff] %vm1581_vm8, %v1534_v11 }
 0x292   : > { %v1918_v9 = vpop.permute.xlu1 %1917 }
 0x293   : > { %1991 = vst.msk [vmem:[#allocation4 + $0xb8] sm:$0xff] %vm1967_vm10, %v1918_v9  ;;  %v1727_v15 = vpop.permute.xlu0 %1726  ;;  %v2022_v12 = vld [vmem:[#allocation4 + $0xb0] sm:$0xff] }
 0x294   : > { %1799 = vst.msk [vmem:[#allocation4 + $0xc0] sm:$0xff] %vm1774_vm9, %v1727_v15  ;;  %4596 = vmatprep.mubr.msk.f32.mxu0 %vm2044_vm11, %v2022_v12 }
 0x296   : > { %v1536_v49 = vpop.permute.xlu1 %1535 }
 0x297   : > { %1607 = vst.msk [vmem:[#allocation4 + $0xc8] sm:$0xff] %vm1581_vm8, %v1536_v49  ;;  %v1920_v19 = vpop.permute.xlu0 %1919 }
 0x298   : > { %1992 = vst.msk [vmem:[#allocation4 + $0xc0] sm:$0xff] %vm1967_vm10, %v1920_v19 }
 0x29a   : > { %v1729_v35 = vpop.permute.xlu1 %1728  ;;  %v2023_v16 = vld [vmem:[#allocation4 + $0xb8] sm:$0xff] }
 0x29b   : > { %1800 = vst.msk [vmem:[#allocation4 + $0xc8] sm:$0xff] %vm1774_vm9, %v1729_v35  ;;  %4597 = vmatmul.mubr.msk.f32.gmra.mrb[22].mxu0 %vm2044_vm11, %v2023_v16  ;;  %v1538_v34 = vpop.permute.xlu0 %1537 }
 0x29c   : > { %1608 = vst.msk [vmem:[#allocation4 + $0xd0] sm:$0xff] %vm1581_vm8, %v1538_v34 }
 0x29e   : > { %v1922_v23 = vpop.permute.xlu1 %1921 }
 0x29f   : > { %1993 = vst.msk [vmem:[#allocation4 + $0xc8] sm:$0xff] %vm1967_vm10, %v1922_v23  ;;  %v1731_v38 = vpop.permute.xlu0 %1730  ;;  %v2024_v20 = vld [vmem:[#allocation4 + $0xc0] sm:$0xff] }
 0x2a0   : > { %1801 = vst.msk [vmem:[#allocation4 + $0xd0] sm:$0xff] %vm1774_vm9, %v1731_v38  ;;  %4599 = vmatprep.mubr.msk.f32.mxu0 %vm2044_vm11, %v2024_v20 }
 0x2a2   : > { %v1540_v45 = vpop.permute.xlu1 %1539 }
 0x2a3   : > { %1609 = vst.msk [vmem:[#allocation4 + $0xd8] sm:$0xff] %vm1581_vm8, %v1540_v45  ;;  %v1924_v37 = vpop.permute.xlu0 %1923 }
 0x2a4   : > { %1994 = vst.msk [vmem:[#allocation4 + $0xd0] sm:$0xff] %vm1967_vm10, %v1924_v37 }
 0x2a6   : > { %v1733_v51 = vpop.permute.xlu1 %1732  ;;  %v2025_v33 = vld [vmem:[#allocation4 + $0xc8] sm:$0xff] }
 0x2a7   : > { %1802 = vst.msk [vmem:[#allocation4 + $0xd8] sm:$0xff] %vm1774_vm9, %v1733_v51  ;;  %4600 = vmatmul.mubr.msk.f32.gmra.mrb[24].mxu0 %vm2044_vm11, %v2025_v33  ;;  %v1542_v54 = vpop.permute.xlu0 %1541 }
 0x2a8   : > { %1610 = vst.msk [vmem:[#allocation4 + $0xe0] sm:$0xff] %vm1581_vm8, %v1542_v54 }
 0x2aa   : > { %v1926_v52 = vpop.permute.xlu1 %1925 }
 0x2ab   : > { %1995 = vst.msk [vmem:[#allocation4 + $0xd8] sm:$0xff] %vm1967_vm10, %v1926_v52  ;;  %v1735_v57 = vpop.permute.xlu0 %1734  ;;  %v2026_v55 = vld [vmem:[#allocation4 + $0xd0] sm:$0xff] }
 0x2ac   : > { %1803 = vst.msk [vmem:[#allocation4 + $0xe0] sm:$0xff] %vm1774_vm9, %v1735_v57  ;;  %4602 = vmatprep.mubr.msk.f32.mxu0 %vm2044_vm11, %v2026_v55 }
 0x2ae   : > { %v1544_v59 = vpop.permute.xlu1 %1543 }
 0x2af   : > { %1611 = vst.msk [vmem:[#allocation4 + $0xe8] sm:$0xff] %vm1581_vm8, %v1544_v59  ;;  %v1928_v24 = vpop.permute.xlu0 %1927 }
 0x2b0   : > { %1996 = vst.msk [vmem:[#allocation4 + $0xe0] sm:$0xff] %vm1967_vm10, %v1928_v24 }
 0x2b2   : > { %v1737_v58 = vpop.permute.xlu1 %1736  ;;  %v2027_v25 = vld [vmem:[#allocation4 + $0xd8] sm:$0xff] }
 0x2b3   : > { %1804 = vst.msk [vmem:[#allocation4 + $0xe8] sm:$0xff] %vm1774_vm9, %v1737_v58  ;;  %4603 = vmatmul.mubr.msk.f32.gmra.mrb[26].mxu0 %vm2044_vm11, %v2027_v25  ;;  %v1546_v27 = vpop.permute.xlu0 %1545 }
 0x2b4   : > { %1612 = vst.msk [vmem:[#allocation4 + $0xf0] sm:$0xff] %vm1581_vm8, %v1546_v27 }
 0x2b6   : > { %v1930_v61 = vpop.permute.xlu1 %1929 }
 0x2b7   : > { %1997 = vst.msk [vmem:[#allocation4 + $0xe8] sm:$0xff] %vm1967_vm10, %v1930_v61  ;;  %v2028_v46 = vld [vmem:[#allocation4 + $0xe0] sm:$0xff]  ;;  %v1739_v30 = vpop.permute.xlu0 %1738 }
 0x2b8   : > { %4605 = vmatprep.mubr.msk.f32.mxu0 %vm2044_vm11, %v2028_v46  ;;  %1805 = vst.msk [vmem:[#allocation4 + $0xf0] sm:$0xff] %vm1774_vm9, %v1739_v30 }
 0x2ba   : > { %v1548_v26 = vpop.permute.xlu1 %1547 }
 0x2bb   : > { %1613 = vst.msk [vmem:[#allocation4 + $0xf8] sm:$0xff] %vm1581_vm8, %v1548_v26  ;;  %v1932_v39 = vpop.permute.xlu0 %1931 }
 0x2bc   : > { %1998 = vst.msk [vmem:[#allocation4 + $0xf0] sm:$0xff] %vm1967_vm10, %v1932_v39 }
 0x2be   : > { %v2029_v60 = vld [vmem:[#allocation4 + $0xe8] sm:$0xff]  ;;  %v1741_v0 = vpop.permute.xlu1 %1740 }
 0x2bf   : > { %4606 = vmatmul.mubr.msk.f32.gmra.mrb[28].mxu0 %vm2044_vm11, %v2029_v60  ;;  %1806 = vst.msk [vmem:[#allocation4 + $0xf8] sm:$0xff] %vm1774_vm9, %v1741_v0  ;;  %v2618_v1 = vpop.permute.xlu0 %2617 }
 0x2c0   : > { %2713 = vst.msk [vmem:[#allocation4] sm:$0xff] %vm615_vm2, %v2618_v1 }
 0x2c2   : > { %v1934_v32 = vpop.permute.xlu1 %1933 }
 0x2c3   : > { %1999 = vst.msk [vmem:[#allocation4 + $0xf8] sm:$0xff] %vm1967_vm10, %v1934_v32  ;;  %v2030_v51 = vld [vmem:[#allocation4 + $0xf0] sm:$0xff] }
 0x2c4   : > { %4608 = vmatprep.mubr.msk.f32.mxu0 %vm2044_vm11, %v2030_v51 }
 0x2c6   : > { %v2620_v40 = vpop.permute.xlu1 %2619 }
 0x2c7   : > { %2714 = vst.msk [vmem:[#allocation4 + $0x8] sm:$0xff] %vm615_vm2, %v2620_v40 }
 0x2ca   : > { %v2031_v54 = vld [vmem:[#allocation4 + $0xf8] sm:$0xff] }
 0x2cb   : > { %4609 = vmatmul.mubr.msk.f32.gmra.mrb[30].mxu0 %vm2044_vm11, %v2031_v54 }
 0x2fe   : > { %v4565_v42 = vpop.f32.mrb[0].mxu0 }
 0x2ff   : > { %v2217_v43 = vadd.f32 %v4565_v42, %v6146_v41  ;;  %v2211_v44 = vpop.f32.mrb[1].mxu0 }
 0x300   : > { %v2212_v47 = vadd.f32 %v6146_v41, %v2211_v44 }
 0x301   : > { %v2371_v50 = vmax.f32 %v2217_v43, 0.0 }
 0x302   : > { %v2370_v53 = vmax.f32 %v2212_v47, 0.0 }
 0x303   : > { %2458 = vst.msk [vmem:[#allocation3 + $0x21] sm:$0xff] %vm270_vm0, %v2371_v50 }
 0x304   : > { %2457 = vst.msk [vmem:[#allocation3 + $0x19] sm:$0xff] %vm270_vm0, %v2370_v53 }
 0x306   : > { %v4568_v56 = vpop.f32.mrb[2].mxu0 }
 0x307   : > { %v2227_v63 = vadd.f32 %v4568_v56, %v6146_v41  ;;  %v2221_v10 = vpop.f32.mrb[3].mxu0 }
 0x308   : > { %v2222_v13 = vadd.f32 %v6146_v41, %v2221_v10 }
 0x309   : > { %v2373_v14 = vmax.f32 %v2227_v63, 0.0 }
 0x30a   : > { %v2372_v17 = vmax.f32 %v2222_v13, 0.0  ;;  %v6154_v18 = vld [vmem:[#allocation3 + $0x21] sm:$0xff] }
 0x30b   : > { %2460 = vst.msk [vmem:[#allocation3 + $0x39] sm:$0xff] %vm270_vm0, %v2373_v14  ;;  %2623 = vrot.lane.b32.xlu1 %v6154_v18, %s4783_s14  ;;  %v6159_v21 = vld [vmem:[#allocation3 + $0x19] sm:$0xff] }
 0x30c   : > { %v6161_v36 = vld [vmem:[#allocation3 + $0x20] sm:$0xff]  ;;  %v6163_v22 = vld [vmem:[#allocation3 + $0x18] sm:$0xff]  ;;  %2459 = vst.msk [vmem:[#allocation3 + $0x31] sm:$0xff] %vm270_vm0, %v2372_v17  ;;  %2621 = vrot.lane.b32.xlu0 %v6159_v21, %s4783_s14 }
 0x30d   : > { %2524 = vst.msk [vmem:[#allocation4 + $0x18] sm:$0xff] %vm270_vm0, %v6161_v36  ;;  %2523 = vst.msk [vmem:[#allocation4 + $0x10] sm:$0xff] %vm270_vm0, %v6163_v22 }
 0x30e   : > { %v4571_v2 = vpop.f32.mrb[4].mxu0 }
 0x30f   : > { %v2237_v28 = vadd.f32 %v4571_v2, %v6146_v41  ;;  %v2231_v48 = vpop.f32.mrb[5].mxu0 }
 0x310   : > { %v2232_v4 = vadd.f32 %v6146_v41, %v2231_v48 }
 0x311   : > { %v2375_v29 = vmax.f32 %v2237_v28, 0.0 }
 0x312   : > { %v2374_v3 = vmax.f32 %v2232_v4, 0.0  ;;  %v6174_v6 = vld [vmem:[#allocation3 + $0x39] sm:$0xff] }
 0x313   : > { %2462 = vst.msk [vmem:[#allocation3 + $0x51] sm:$0xff] %vm270_vm0, %v2375_v29  ;;  %2627 = vrot.lane.b32.xlu1 %v6174_v6, %s4783_s14  ;;  %v6179_v5 = vld [vmem:[#allocation3 + $0x31] sm:$0xff] }
 0x314   : > { %v6181_v8 = vld [vmem:[#allocation3 + $0x38] sm:$0xff]  ;;  %v6183_v7 = vld [vmem:[#allocation3 + $0x30] sm:$0xff]  ;;  %2461 = vst.msk [vmem:[#allocation3 + $0x49] sm:$0xff] %vm270_vm0, %v2374_v3  ;;  %2625 = vrot.lane.b32.xlu0 %v6179_v5, %s4783_s14 }
 0x315   : > { %2526 = vst.msk [vmem:[#allocation4 + $0x28] sm:$0xff] %vm270_vm0, %v6181_v8  ;;  %2525 = vst.msk [vmem:[#allocation4 + $0x20] sm:$0xff] %vm270_vm0, %v6183_v7 }
 0x316   : > { %v4574_v11 = vpop.f32.mrb[6].mxu0 }
 0x317   : > { %v2247_v9 = vadd.f32 %v4574_v11, %v6146_v41  ;;  %v2241_v15 = vpop.f32.mrb[7].mxu0 }
 0x318   : > { %v2242_v12 = vadd.f32 %v6146_v41, %v2241_v15 }
 0x319   : > { %v2377_v49 = vmax.f32 %v2247_v9, 0.0 }
 0x31a   : > { %v2376_v19 = vmax.f32 %v2242_v12, 0.0  ;;  %v2560_v35 = vld [vmem:[#allocation3 + $0x51] sm:$0xff] }
 0x31b   : > { %2464 = vst.msk [vmem:[#allocation3 + $0x69] sm:$0xff] %vm270_vm0, %v2377_v49  ;;  %2631 = vrot.lane.b32.xlu1 %v2560_v35, %s4783_s14  ;;  %v6196_v16 = vld [vmem:[#allocation3 + $0x49] sm:$0xff] }
 0x31c   : > { %v6198_v34 = vld [vmem:[#allocation3 + $0x50] sm:$0xff]  ;;  %v6200_v23 = vld [vmem:[#allocation3 + $0x48] sm:$0xff]  ;;  %2463 = vst.msk [vmem:[#allocation3 + $0x61] sm:$0xff] %vm270_vm0, %v2376_v19  ;;  %2629 = vrot.lane.b32.xlu0 %v6196_v16, %s4783_s14 }
 0x31d   : > { %2528 = vst.msk [vmem:[#allocation4 + $0x38] sm:$0xff] %vm270_vm0, %v6198_v34  ;;  %2527 = vst.msk [vmem:[#allocation4 + $0x30] sm:$0xff] %vm270_vm0, %v6200_v23 }
 0x31e   : > { %v4577_v38 = vpop.f32.mrb[8].mxu0 }
 0x31f   : > { %v2257_v20 = vadd.f32 %v4577_v38, %v6146_v41  ;;  %v2251_v45 = vpop.f32.mrb[9].mxu0 }
 0x320   : > { %v2252_v37 = vadd.f32 %v6146_v41, %v2251_v45 }
 0x321   : > { %v2379_v33 = vmax.f32 %v2257_v20, 0.0 }
 0x322   : > { %v2378_v52 = vmax.f32 %v2252_v37, 0.0  ;;  %v2562_v57 = vld [vmem:[#allocation3 + $0x69] sm:$0xff] }
 0x323   : > { %2466 = vst.msk [vmem:[#allocation3 + $0x81] sm:$0xff] %vm270_vm0, %v2379_v33  ;;  %2635 = vrot.lane.b32.xlu1 %v2562_v57, %s4783_s14  ;;  %v2561_v55 = vld [vmem:[#allocation3 + $0x61] sm:$0xff] }
 0x324   : > { %v6215_v59 = vld [vmem:[#allocation3 + $0x68] sm:$0xff]  ;;  %v6217_v24 = vld [vmem:[#allocation3 + $0x60] sm:$0xff]  ;;  %2465 = vst.msk [vmem:[#allocation3 + $0x79] sm:$0xff] %vm270_vm0, %v2378_v52  ;;  %2633 = vrot.lane.b32.xlu0 %v2561_v55, %s4783_s14 }
 0x325   : > { %2530 = vst.msk [vmem:[#allocation4 + $0x48] sm:$0xff] %vm270_vm0, %v6215_v59  ;;  %2529 = vst.msk [vmem:[#allocation4 + $0x40] sm:$0xff] %vm270_vm0, %v6217_v24 }
 0x326   : > { %v4580_v58 = vpop.f32.mrb[10].mxu0 }
 0x327   : > { %v2267_v25 = vadd.f32 %v4580_v58, %v6146_v41  ;;  %v2261_v61 = vpop.f32.mrb[11].mxu0 }
 0x328   : > { %v2262_v46 = vadd.f32 %v6146_v41, %v2261_v61 }
 0x329   : > { %v2381_v60 = vmax.f32 %v2267_v25, 0.0 }
 0x32a   : > { %v2380_v26 = vmax.f32 %v2262_v46, 0.0  ;;  %v2564_v27 = vld [vmem:[#allocation3 + $0x81] sm:$0xff] }
 0x32b   : > { %2468 = vst.msk [vmem:[#allocation3 + $0x99] sm:$0xff] %vm270_vm0, %v2381_v60  ;;  %2639 = vrot.lane.b32.xlu1 %v2564_v27, %s4783_s14  ;;  %v2563_v0 = vld [vmem:[#allocation3 + $0x79] sm:$0xff] }
 0x32c   : > { %v6229_v30 = vld [vmem:[#allocation3 + $0x80] sm:$0xff]  ;;  %v6231_v31 = vld [vmem:[#allocation3 + $0x78] sm:$0xff]  ;;  %2467 = vst.msk [vmem:[#allocation3 + $0x91] sm:$0xff] %vm270_vm0, %v2380_v26  ;;  %2637 = vrot.lane.b32.xlu0 %v2563_v0, %s4783_s14 }
 0x32d   : > { %2532 = vst.msk [vmem:[#allocation4 + $0x58] sm:$0xff] %vm270_vm0, %v6229_v30  ;;  %2531 = vst.msk [vmem:[#allocation4 + $0x50] sm:$0xff] %vm270_vm0, %v6231_v31 }
 0x332   : > { %v4583_v62 = vpop.f32.mrb[12].mxu0  ;;  %v2566_v32 = vld [vmem:[#allocation3 + $0x99] sm:$0xff] }
 0x333   : > { %v2277_v39 = vadd.f32 %v4583_v62, %v6146_v41  ;;  %2643 = vrot.lane.b32.xlu1 %v2566_v32, %s4783_s14  ;;  %v2271_v40 = vpop.f32.mrb[13].mxu0  ;;  %v2565_v1 = vld [vmem:[#allocation3 + $0x91] sm:$0xff] }
 0x334   : > { %v6241_v42 = vld [vmem:[#allocation3 + $0x98] sm:$0xff]  ;;  %v6243_v43 = vld [vmem:[#allocation3 + $0x90] sm:$0xff]  ;;  %v2272_v44 = vadd.f32 %v6146_v41, %v2271_v40  ;;  %2641 = vrot.lane.b32.xlu0 %v2565_v1, %s4783_s14 }
 0x335   : > { %2534 = vst.msk [vmem:[#allocation4 + $0x68] sm:$0xff] %vm270_vm0, %v6241_v42  ;;  %2533 = vst.msk [vmem:[#allocation4 + $0x60] sm:$0xff] %vm270_vm0, %v6243_v43  ;;  %v2383_v47 = vmax.f32 %v2277_v39, 0.0 }
 0x336   : > { %v2382_v50 = vmax.f32 %v2272_v44, 0.0 }
 0x337   : > { %2470 = vst.msk [vmem:[#allocation3 + $0xb1] sm:$0xff] %vm270_vm0, %v2383_v47 }
 0x338   : > { %2469 = vst.msk [vmem:[#allocation3 + $0xa9] sm:$0xff] %vm270_vm0, %v2382_v50 }
 0x33e   : > { %v4586_v53 = vpop.f32.mrb[14].mxu0  ;;  %v2568_v56 = vld [vmem:[#allocation3 + $0xb1] sm:$0xff] }
 0x33f   : > { %v2287_v63 = vadd.f32 %v4586_v53, %v6146_v41  ;;  %2647 = vrot.lane.b32.xlu1 %v2568_v56, %s4783_s14  ;;  %v2281_v10 = vpop.f32.mrb[15].mxu0  ;;  %v2567_v13 = vld [vmem:[#allocation3 + $0xa9] sm:$0xff] }
 0x340   : > { %v6255_v14 = vld [vmem:[#allocation3 + $0xb0] sm:$0xff]  ;;  %v6257_v17 = vld [vmem:[#allocation3 + $0xa8] sm:$0xff]  ;;  %v2282_v2 = vadd.f32 %v6146_v41, %v2281_v10  ;;  %2645 = vrot.lane.b32.xlu0 %v2567_v13, %s4783_s14 }
 0x341   : > { %2536 = vst.msk [vmem:[#allocation4 + $0x78] sm:$0xff] %vm270_vm0, %v6255_v14  ;;  %2535 = vst.msk [vmem:[#allocation4 + $0x70] sm:$0xff] %vm270_vm0, %v6257_v17  ;;  %v2385_v28 = vmax.f32 %v2287_v63, 0.0 }
 0x342   : > { %v2384_v48 = vmax.f32 %v2282_v2, 0.0 }
 0x343   : > { %2472 = vst.msk [vmem:[#allocation3 + $0xc9] sm:$0xff] %vm270_vm0, %v2385_v28 }
 0x344   : > { %2471 = vst.msk [vmem:[#allocation3 + $0xc1] sm:$0xff] %vm270_vm0, %v2384_v48 }
 0x34a   : > { %v4589_v4 = vpop.f32.mrb[16].mxu0  ;;  %v2570_v29 = vld [vmem:[#allocation3 + $0xc9] sm:$0xff] }
 0x34b   : > { %v2297_v3 = vadd.f32 %v4589_v4, %v6146_v41  ;;  %2651 = vrot.lane.b32.xlu1 %v2570_v29, %s4783_s14  ;;  %v2291_v11 = vpop.f32.mrb[17].mxu0  ;;  %v2569_v9 = vld [vmem:[#allocation3 + $0xc1] sm:$0xff] }
 0x34c   : > { %v2506_v15 = vld [vmem:[#allocation3 + $0xc8] sm:$0xff]  ;;  %v6269_v12 = vld [vmem:[#allocation3 + $0xc0] sm:$0xff]  ;;  %v2292_v49 = vadd.f32 %v6146_v41, %v2291_v11  ;;  %2649 = vrot.lane.b32.xlu0 %v2569_v9, %s4783_s14 }
 0x34d   : > { %2538 = vst.msk [vmem:[#allocation4 + $0x88] sm:$0xff] %vm270_vm0, %v2506_v15  ;;  %2537 = vst.msk [vmem:[#allocation4 + $0x80] sm:$0xff] %vm270_vm0, %v6269_v12  ;;  %v2387_v19 = vmax.f32 %v2297_v3, 0.0 }
 0x34e   : > { %v2386_v35 = vmax.f32 %v2292_v49, 0.0 }
 0x34f   : > { %2474 = vst.msk [vmem:[#allocation3 + $0xe1] sm:$0xff] %vm270_vm0, %v2387_v19 }
 0x350   : > { %2473 = vst.msk [vmem:[#allocation3 + $0xd9] sm:$0xff] %vm270_vm0, %v2386_v35 }
 0x356   : > { %v4592_v38 = vpop.f32.mrb[18].mxu0  ;;  %v6278_v20 = vld [vmem:[#allocation3 + $0xe1] sm:$0xff] }
 0x357   : > { %v2307_v45 = vadd.f32 %v4592_v38, %v6146_v41  ;;  %2655 = vrot.lane.b32.xlu1 %v6278_v20, %s4783_s14  ;;  %v2301_v37 = vpop.f32.mrb[19].mxu0  ;;  %v6283_v51 = vld [vmem:[#allocation3 + $0xd9] sm:$0xff] }
 0x358   : > { %v6285_v33 = vld [vmem:[#allocation3 + $0xe0] sm:$0xff]  ;;  %v2302_v54 = vadd.f32 %v6146_v41, %v2301_v37  ;;  %2653 = vrot.lane.b32.xlu0 %v6283_v51, %s4783_s14  ;;  %v6292_v52 = vld [vmem:[#allocation3 + $0xd8] sm:$0xff] }
 0x359   : > { %2540 = vst.msk [vmem:[#allocation4 + $0x98] sm:$0xff] %vm270_vm0, %v6285_v33  ;;  %v2389_v57 = vmax.f32 %v2307_v45, 0.0  ;;  %2539 = vst.msk [vmem:[#allocation4 + $0x90] sm:$0xff] %vm270_vm0, %v6292_v52 }
 0x35a   : > { %v2388_v55 = vmax.f32 %v2302_v54, 0.0 }
 0x35b   : > { %2476 = vst.msk [vmem:[#allocation3 + $0xf9] sm:$0xff] %vm270_vm0, %v2389_v57 }
 0x35c   : > { %2475 = vst.msk [vmem:[#allocation3 + $0xf1] sm:$0xff] %vm270_vm0, %v2388_v55 }
 0x362   : > { %v4595_v58 = vpop.f32.mrb[20].mxu0  ;;  %v6298_v25 = vld [vmem:[#allocation3 + $0xf9] sm:$0xff] }
 0x363   : > { %v2317_v61 = vadd.f32 %v4595_v58, %v6146_v41  ;;  %2659 = vrot.lane.b32.xlu1 %v6298_v25, %s4783_s14  ;;  %v2311_v46 = vpop.f32.mrb[21].mxu0  ;;  %v6303_v60 = vld [vmem:[#allocation3 + $0xf1] sm:$0xff] }
 0x364   : > { %v6305_v26 = vld [vmem:[#allocation3 + $0xf8] sm:$0xff]  ;;  %v2312_v27 = vadd.f32 %v6146_v41, %v2311_v46  ;;  %2657 = vrot.lane.b32.xlu0 %v6303_v60, %s4783_s14  ;;  %v6312_v0 = vld [vmem:[#allocation3 + $0xf0] sm:$0xff] }
 0x365   : > { %2542 = vst.msk [vmem:[#allocation4 + $0xa8] sm:$0xff] %vm270_vm0, %v6305_v26  ;;  %v2391_v62 = vmax.f32 %v2317_v61, 0.0  ;;  %2541 = vst.msk [vmem:[#allocation4 + $0xa0] sm:$0xff] %vm270_vm0, %v6312_v0 }
 0x366   : > { %v2390_v32 = vmax.f32 %v2312_v27, 0.0 }
 0x367   : > { %2478 = vst.msk [vmem:[#allocation3 + $0x111] sm:$0xff] %vm270_vm0, %v2391_v62 }
 0x368   : > { %2477 = vst.msk [vmem:[#allocation3 + $0x109] sm:$0xff] %vm270_vm0, %v2390_v32 }
 0x36e   : > { %v4598_v39 = vpop.f32.mrb[22].mxu0  ;;  %v6318_v40 = vld [vmem:[#allocation3 + $0x111] sm:$0xff] }
 0x36f   : > { %v2327_v1 = vadd.f32 %v4598_v39, %v6146_v41  ;;  %2663 = vrot.lane.b32.xlu1 %v6318_v40, %s4783_s14  ;;  %v2321_v44 = vpop.f32.mrb[23].mxu0  ;;  %v6323_v47 = vld [vmem:[#allocation3 + $0x109] sm:$0xff] }
 0x370   : > { %v6325_v50 = vld [vmem:[#allocation3 + $0x110] sm:$0xff]  ;;  %v2322_v53 = vadd.f32 %v6146_v41, %v2321_v44  ;;  %2661 = vrot.lane.b32.xlu0 %v6323_v47, %s4783_s14  ;;  %v6332_v56 = vld [vmem:[#allocation3 + $0x108] sm:$0xff] }
 0x371   : > { %2544 = vst.msk [vmem:[#allocation4 + $0xb8] sm:$0xff] %vm270_vm0, %v6325_v50  ;;  %v2393_v63 = vmax.f32 %v2327_v1, 0.0  ;;  %2543 = vst.msk [vmem:[#allocation4 + $0xb0] sm:$0xff] %vm270_vm0, %v6332_v56 }
 0x372   : > { %v2392_v10 = vmax.f32 %v2322_v53, 0.0 }
 0x373   : > { %2480 = vst.msk [vmem:[#allocation3 + $0x129] sm:$0xff] %vm270_vm0, %v2393_v63 }
 0x374   : > { %2479 = vst.msk [vmem:[#allocation3 + $0x121] sm:$0xff] %vm270_vm0, %v2392_v10 }
 0x37a   : > { %v4601_v13 = vpop.f32.mrb[24].mxu0  ;;  %v6338_v2 = vld [vmem:[#allocation3 + $0x129] sm:$0xff] }
 0x37b   : > { %v2337_v28 = vadd.f32 %v4601_v13, %v6146_v41  ;;  %2667 = vrot.lane.b32.xlu1 %v6338_v2, %s4783_s14  ;;  %v2331_v48 = vpop.f32.mrb[25].mxu0  ;;  %v6343_v4 = vld [vmem:[#allocation3 + $0x121] sm:$0xff] }
 0x37c   : > { %v6345_v29 = vld [vmem:[#allocation3 + $0x128] sm:$0xff]  ;;  %v2332_v3 = vadd.f32 %v6146_v41, %v2331_v48  ;;  %2665 = vrot.lane.b32.xlu0 %v6343_v4, %s4783_s14  ;;  %v6352_v11 = vld [vmem:[#allocation3 + $0x120] sm:$0xff] }
 0x37d   : > { %2546 = vst.msk [vmem:[#allocation4 + $0xc8] sm:$0xff] %vm270_vm0, %v6345_v29  ;;  %v2395_v9 = vmax.f32 %v2337_v28, 0.0  ;;  %v2624_v15 = vpop.permute.xlu1 %2623  ;;  %2545 = vst.msk [vmem:[#allocation4 + $0xc0] sm:$0xff] %vm270_vm0, %v6352_v11 }
 0x37e   : > { %v2394_v49 = vmax.f32 %v2332_v3, 0.0  ;;  %2716 = vst.msk [vmem:[#allocation4 + $0x18] sm:$0xff] %vm615_vm2, %v2624_v15  ;;  %v2622_v19 = vpop.permute.xlu0 %2621 }
 0x37f   : > { %2482 = vst.msk [vmem:[#allocation3 + $0x141] sm:$0xff] %vm270_vm0, %v2395_v9 }
 0x380   : > { %2715 = vst.msk [vmem:[#allocation4 + $0x10] sm:$0xff] %vm615_vm2, %v2622_v19 }
 0x381   : > { %2481 = vst.msk [vmem:[#allocation3 + $0x139] sm:$0xff] %vm270_vm0, %v2394_v49 }
 0x385   : > { %v2628_v35 = vpop.permute.xlu1 %2627 }
 0x386   : > { %2718 = vst.msk [vmem:[#allocation4 + $0x28] sm:$0xff] %vm615_vm2, %v2628_v35  ;;  %v4604_v38 = vpop.f32.mrb[26].mxu0  ;;  %v2626_v45 = vpop.permute.xlu0 %2625  ;;  %v2580_v37 = vld [vmem:[#allocation3 + $0x141] sm:$0xff] }
 0x387   : > { %v2347_v54 = vadd.f32 %v4604_v38, %v6146_v41  ;;  %2717 = vst.msk [vmem:[#allocation4 + $0x20] sm:$0xff] %vm615_vm2, %v2626_v45  ;;  %2671 = vrot.lane.b32.xlu1 %v2580_v37, %s4783_s14  ;;  %v2341_v57 = vpop.f32.mrb[27].mxu0 }
 0x388   : > { %v2579_v55 = vld [vmem:[#allocation3 + $0x139] sm:$0xff]  ;;  %v2342_v61 = vadd.f32 %v6146_v41, %v2341_v57 }
 0x389   : > { %v6364_v58 = vld [vmem:[#allocation3 + $0x140] sm:$0xff]  ;;  %2669 = vrot.lane.b32.xlu0 %v2579_v55, %s4783_s14  ;;  %v6370_v46 = vld [vmem:[#allocation3 + $0x138] sm:$0xff]  ;;  %v2397_v27 = vmax.f32 %v2347_v54, 0.0  ;;  %v2746_v54 = vld [vmem:[#allocation3 + $0xa] sm:$0xff] }
 0x38a   : > { %2548 = vst.msk [vmem:[#allocation4 + $0xd8] sm:$0xff] %vm270_vm0, %v6364_v58  ;;  %2547 = vst.msk [vmem:[#allocation4 + $0xd0] sm:$0xff] %vm270_vm0, %v6370_v46  ;;  %v2396_v62 = vmax.f32 %v2342_v61, 0.0  ;;  %v2745_v55 = vld [vmem:[#allocation3 + $0x2] sm:$0xff] }
 0x38b   : > { %2484 = vst.msk [vmem:[#allocation3 + $0x159] sm:$0xff] %vm270_vm0, %v2397_v27 }
 0x38c   : > { %2483 = vst.msk [vmem:[#allocation3 + $0x151] sm:$0xff] %vm270_vm0, %v2396_v62  ;;  %v6409_v62 = vld [vmem:[#allocation3 + $0x22] sm:$0xff] }
 0x38d   : > { %v2632_v32 = vpop.permute.xlu1 %2631 }
 0x38e   : > { %2720 = vst.msk [vmem:[#allocation4 + $0x38] sm:$0xff] %vm615_vm2, %v2632_v32  ;;  %v2630_v39 = vpop.permute.xlu0 %2629  ;;  %v6414_v32 = vld [vmem:[#allocation3 + $0x1a] sm:$0xff] }
 0x38f   : > { %2719 = vst.msk [vmem:[#allocation4 + $0x30] sm:$0xff] %vm615_vm2, %v2630_v39  ;;  %v6418_v39 = vld [vmem:[#allocation3 + $0x3a] sm:$0xff] }
 0x392   : > { %v4607_v1 = vpop.f32.mrb[28].mxu0  ;;  %v2582_v44 = vld [vmem:[#allocation3 + $0x159] sm:$0xff] }
 0x393   : > { %v2357_v53 = vadd.f32 %v4607_v1, %v6146_v41  ;;  %2675 = vrot.lane.b32.xlu1 %v2582_v44, %s4783_s14  ;;  %v2351_v63 = vpop.f32.mrb[29].mxu0  ;;  %v2581_v10 = vld [vmem:[#allocation3 + $0x151] sm:$0xff] }
 0x394   : > { %v6380_v13 = vld [vmem:[#allocation3 + $0x158] sm:$0xff]  ;;  %v2352_v28 = vadd.f32 %v6146_v41, %v2351_v63  ;;  %2673 = vrot.lane.b32.xlu0 %v2581_v10, %s4783_s14  ;;  %v6386_v48 = vld [vmem:[#allocation3 + $0x150] sm:$0xff] }
 0x395   : > { %7250 = vst [vmem:[#allocation8_spill] sm:$0xff] %v6380_v13  ;;  %2550 = vst.msk [vmem:[#allocation4 + $0xe8] sm:$0xff] %vm270_vm0, %v6380_v13  ;;  %v2399_v3 = vmax.f32 %v2357_v53, 0.0  ;;  %v2636_v9 = vpop.permute.xlu1 %2635  ;;  %v6422_v1 = vld [vmem:[#allocation3 + $0x32] sm:$0xff]  ;;  %v6430_v53 = vld [vmem:[#allocation3 + $0x4a] sm:$0xff] }
 0x396   : > { %7251 = vst [vmem:[#allocation9_spill] sm:$0xff] %v6386_v48  ;;  %2549 = vst.msk [vmem:[#allocation4 + $0xe0] sm:$0xff] %vm270_vm0, %v6386_v48  ;;  %v2398_v15 = vmax.f32 %v2352_v28, 0.0  ;;  %v2634_v49 = vpop.permute.xlu0 %2633  ;;  %v6426_v44 = vld [vmem:[#allocation3 + $0x52] sm:$0xff]  ;;  %v6435_v28 = vld [vmem:[#allocation3 + $0x6a] sm:$0xff] }
 0x397   : > { %2722 = vst.msk [vmem:[#allocation4 + $0x48] sm:$0xff] %vm615_vm2, %v2636_v9  ;;  %2721 = vst.msk [vmem:[#allocation4 + $0x40] sm:$0xff] %vm615_vm2, %v2634_v49  ;;  %v6444_v9 = vld [vmem:[#allocation3 + $0x82] sm:$0xff]  ;;  %v2758_v49 = vld [vmem:[#allocation3 + $0x9a] sm:$0xff] }
 0x398   : > { %2486 = vst.msk [vmem:[#allocation3 + $0x171] sm:$0xff] %vm270_vm0, %v2399_v3  ;;  %2485 = vst.msk [vmem:[#allocation3 + $0x169] sm:$0xff] %vm270_vm0, %v2398_v15  ;;  %v6440_v3 = vld [vmem:[#allocation3 + $0x62] sm:$0xff]  ;;  %v6448_v15 = vld [vmem:[#allocation3 + $0x7a] sm:$0xff] }
 0x399   : > { %7254 = vst [vmem:[#allocation12_spill] sm:$0xff] %v6444_v9  ;;  %v6505_v13 = vld [vmem:[#allocation3 + $0x152] sm:$0xff] }
 0x39d   : > { %v2640_v19 = vpop.permute.xlu1 %2639 }
 0x39e   : > { %2724 = vst.msk [vmem:[#allocation4 + $0x58] sm:$0xff] %vm615_vm2, %v2640_v19  ;;  %v2638_v35 = vpop.permute.xlu0 %2637  ;;  %v2757_v19 = vld [vmem:[#allocation3 + $0x92] sm:$0xff] }
 0x39f   : > { %v2584_v38 = vld [vmem:[#allocation3 + $0x171] sm:$0xff]  ;;  %2723 = vst.msk [vmem:[#allocation4 + $0x50] sm:$0xff] %vm615_vm2, %v2638_v35  ;;  %v2583_v45 = vld [vmem:[#allocation3 + $0x169] sm:$0xff] }
 0x3a0   : > { %2679 = vrot.lane.b32.xlu1 %v2584_v38, %s4783_s14  ;;  %v6397_v37 = vld [vmem:[#allocation3 + $0x170] sm:$0xff]  ;;  %2677 = vrot.lane.b32.xlu0 %v2583_v45, %s4783_s14  ;;  %v6402_v57 = vld [vmem:[#allocation3 + $0x168] sm:$0xff]  ;;  %s7102_s14 = scalar_lea.hbm %s7150_s6, %s4481_s28 }
 0x3a1   : > { %7252 = vst [vmem:[#allocation10_spill] sm:$0xff] %v6397_v37  ;;  %2552 = vst.msk [vmem:[#allocation4 + $0xf8] sm:$0xff] %vm270_vm0, %v6397_v37  ;;  %v2760_v45 = vld [vmem:[#allocation3 + $0xb2] sm:$0xff]  ;;  %v6500_v37 = vld [vmem:[#allocation3 + $0x13a] sm:$0xff] }
 0x3a2   : > { %7253 = vst [vmem:[#allocation11_spill] sm:$0xff] %v6402_v57  ;;  %2551 = vst.msk [vmem:[#allocation4 + $0xf0] sm:$0xff] %vm270_vm0, %v6402_v57  ;;  %v2774_v57 = vld [vmem:[#allocation3 + $0x15a] sm:$0xff] }
 0x3a4   : > { %2811 = vrot.lane.b32.xlu1 %v2746_v54, %s4784_s15  ;;  %2809 = vrot.lane.b32.xlu0 %v2745_v55, %s4784_s15  ;;  %v2759_v54 = vld [vmem:[#allocation3 + $0xaa] sm:$0xff] }
 0x3a5   : > { %v2644_v61 = vpop.permute.xlu1 %2643  ;;  %v2762_v55 = vld [vmem:[#allocation3 + $0xca] sm:$0xff] }
 0x3a6   : > { %2726 = vst.msk [vmem:[#allocation4 + $0x68] sm:$0xff] %vm615_vm2, %v2644_v61  ;;  %v2642_v27 = vpop.permute.xlu0 %2641  ;;  %v2761_v61 = vld [vmem:[#allocation3 + $0xc2] sm:$0xff] }
 0x3a7   : > { %2725 = vst.msk [vmem:[#allocation4 + $0x60] sm:$0xff] %vm615_vm2, %v2642_v27  ;;  %v6460_v27 = vld [vmem:[#allocation3 + $0xe2] sm:$0xff] }
 0x3a8   : > { %2815 = vrot.lane.b32.xlu1 %v6409_v62, %s4784_s15  ;;  %2813 = vrot.lane.b32.xlu0 %v6414_v32, %s4784_s15 }
 0x3ac   : > { %2819 = vrot.lane.b32.xlu1 %v6418_v39, %s4784_s15  ;;  %2817 = vrot.lane.b32.xlu0 %v6422_v1, %s4784_s15 }
 0x3b0   : > { %2823 = vrot.lane.b32.xlu1 %v6426_v44, %s4784_s15  ;;  %2821 = vrot.lane.b32.xlu0 %v6430_v53, %s4784_s15 }
 0x3b1   : > { %v2648_v63 = vpop.permute.xlu1 %2647 }
 0x3b2   : > { %2728 = vst.msk [vmem:[#allocation4 + $0x78] sm:$0xff] %vm615_vm2, %v2648_v63  ;;  %v2646_v10 = vpop.permute.xlu0 %2645  ;;  %v6464_v63 = vld [vmem:[#allocation3 + $0xda] sm:$0xff] }
 0x3b3   : > { %2727 = vst.msk [vmem:[#allocation4 + $0x70] sm:$0xff] %vm615_vm2, %v2646_v10 }
 0x3b4   : > { %2827 = vrot.lane.b32.xlu1 %v6435_v28, %s4784_s15  ;;  %2825 = vrot.lane.b32.xlu0 %v6440_v3, %s4784_s15 }
 0x3b8   : > { %2831 = vrot.lane.b32.xlu1 %v6444_v9, %s4784_s15  ;;  %2829 = vrot.lane.b32.xlu0 %v6448_v15, %s4784_s15 }
 0x3bc   : > { %2835 = vrot.lane.b32.xlu1 %v2758_v49, %s4784_s15  ;;  %2833 = vrot.lane.b32.xlu0 %v2757_v19, %s4784_s15  ;;  %v6469_v19 = vld [vmem:[#allocation3 + $0xfa] sm:$0xff] }
 0x3bd   : > { %v2652_v35 = vpop.permute.xlu1 %2651 }
 0x3be   : > { %2730 = vst.msk [vmem:[#allocation4 + $0x88] sm:$0xff] %vm615_vm2, %v2652_v35  ;;  %v2650_v38 = vpop.permute.xlu0 %2649  ;;  %v6474_v35 = vld [vmem:[#allocation3 + $0xf2] sm:$0xff] }
 0x3bf   : > { %2729 = vst.msk [vmem:[#allocation4 + $0x80] sm:$0xff] %vm615_vm2, %v2650_v38  ;;  %v6478_v38 = vld [vmem:[#allocation3 + $0x112] sm:$0xff] }
 0x3c0   : > { %2839 = vrot.lane.b32.xlu1 %v2760_v45, %s4784_s15  ;;  %2837 = vrot.lane.b32.xlu0 %v2759_v54, %s4784_s15  ;;  %v6482_v45 = vld [vmem:[#allocation3 + $0x10a] sm:$0xff] }
 0x3c1   : > { %v6486_v54 = vld [vmem:[#allocation3 + $0x12a] sm:$0xff] }
 0x3c4   : > { %2843 = vrot.lane.b32.xlu1 %v2762_v55, %s4784_s15  ;;  %2841 = vrot.lane.b32.xlu0 %v2761_v61, %s4784_s15  ;;  %v6490_v55 = vld [vmem:[#allocation3 + $0x122] sm:$0xff] }
 0x3c8   : > { %2847 = vrot.lane.b32.xlu1 %v6460_v27, %s4784_s15  ;;  %2845 = vrot.lane.b32.xlu0 %v6464_v63, %s4784_s15 }
 0x3c9   : > { %v2656_v10 = vpop.permute.xlu1 %2655 }
 0x3ca   : > { %2732 = vst.msk [vmem:[#allocation4 + $0x98] sm:$0xff] %vm615_vm2, %v2656_v10  ;;  %v2654_v49 = vpop.permute.xlu0 %2653 }
 0x3cb   : > { %2731 = vst.msk [vmem:[#allocation4 + $0x90] sm:$0xff] %vm615_vm2, %v2654_v49  ;;  %v6495_v49 = vld [vmem:[#allocation3 + $0x142] sm:$0xff] }
 0x3cc   : > { %2851 = vrot.lane.b32.xlu1 %v6469_v19, %s4784_s15  ;;  %2849 = vrot.lane.b32.xlu0 %v6474_v35, %s4784_s15 }
 0x3d0   : > { %2855 = vrot.lane.b32.xlu1 %v6478_v38, %s4784_s15  ;;  %2853 = vrot.lane.b32.xlu0 %v6482_v45, %s4784_s15 }
 0x3d4   : > { %2859 = vrot.lane.b32.xlu1 %v6486_v54, %s4784_s15  ;;  %2857 = vrot.lane.b32.xlu0 %v6490_v55, %s4784_s15 }
 0x3d5   : > { %v2660_v61 = vpop.permute.xlu1 %2659 }
 0x3d6   : > { %2734 = vst.msk [vmem:[#allocation4 + $0xa8] sm:$0xff] %vm615_vm2, %v2660_v61  ;;  %v2658_v10 = vpop.permute.xlu0 %2657  ;;  %v2776_v61 = vld [vmem:[#allocation3 + $0x172] sm:$0xff] }
 0x3d7   : > { %2733 = vst.msk [vmem:[#allocation4 + $0xa0] sm:$0xff] %vm615_vm2, %v2658_v10  ;;  %v2775_v10 = vld [vmem:[#allocation3 + $0x16a] sm:$0xff] }
 0x3d8   : > { %2863 = vrot.lane.b32.xlu1 %v6495_v49, %s4784_s15  ;;  %2861 = vrot.lane.b32.xlu0 %v6500_v37, %s4784_s15 }
 0x3dc   : > { %2867 = vrot.lane.b32.xlu1 %v2774_v57, %s4784_s15  ;;  %2865 = vrot.lane.b32.xlu0 %v6505_v13, %s4784_s15 }
 0x3e0   : > { %2871 = vrot.lane.b32.xlu1 %v2776_v61, %s4784_s15  ;;  %2869 = vrot.lane.b32.xlu0 %v2775_v10, %s4784_s15 }
 0x3e1   : > { %v2664_v48 = vpop.permute.xlu1 %2663 }
 0x3e2   : > { %2736 = vst.msk [vmem:[#allocation4 + $0xb8] sm:$0xff] %vm615_vm2, %v2664_v48  ;;  %v2662_v9 = vpop.permute.xlu0 %2661 }
 0x3e3   : > { %2735 = vst.msk [vmem:[#allocation4 + $0xb0] sm:$0xff] %vm615_vm2, %v2662_v9 }
 0x3e4   : > { %3003 = vrot.lane.b32.xlu1 %v6161_v36, %s4785_s16  ;;  %3001 = vrot.lane.b32.xlu0 %v6163_v22, %s4785_s16 }
 0x3e8   : > { %3007 = vrot.lane.b32.xlu1 %v6181_v8, %s4785_s16  ;;  %3005 = vrot.lane.b32.xlu0 %v6183_v7, %s4785_s16 }
 0x3ec   : > { %3011 = vrot.lane.b32.xlu1 %v6198_v34, %s4785_s16  ;;  %3009 = vrot.lane.b32.xlu0 %v6200_v23, %s4785_s16 }
 0x3ed   : > { %v2668_v48 = vpop.permute.xlu1 %2667 }
 0x3ee   : > { %2738 = vst.msk [vmem:[#allocation4 + $0xc8] sm:$0xff] %vm615_vm2, %v2668_v48  ;;  %v2666_v57 = vpop.permute.xlu0 %2665 }
 0x3ef   : > { %2737 = vst.msk [vmem:[#allocation4 + $0xc0] sm:$0xff] %vm615_vm2, %v2666_v57 }
 0x3f0   : > { %3015 = vrot.lane.b32.xlu1 %v6215_v59, %s4785_s16  ;;  %3013 = vrot.lane.b32.xlu0 %v6217_v24, %s4785_s16 }
 0x3f4   : > { %3019 = vrot.lane.b32.xlu1 %v6229_v30, %s4785_s16  ;;  %3017 = vrot.lane.b32.xlu0 %v6231_v31, %s4785_s16 }
 0x3f8   : > { %3023 = vrot.lane.b32.xlu1 %v6241_v42, %s4785_s16  ;;  %3021 = vrot.lane.b32.xlu0 %v6243_v43, %s4785_s16 }
 0x3f9   : > { %v2672_v36 = vpop.permute.xlu1 %2671 }
 0x3fa   : > { %2740 = vst.msk [vmem:[#allocation4 + $0xd8] sm:$0xff] %vm615_vm2, %v2672_v36 }
 0x3fb   : > { %v2670_v22 = vpop.permute.xlu0 %2669 }
 0x3fc   : > { %2739 = vst.msk [vmem:[#allocation4 + $0xd0] sm:$0xff] %vm615_vm2, %v2670_v22  ;;  %3027 = vrot.lane.b32.xlu1 %v6255_v14, %s4785_s16  ;;  %3025 = vrot.lane.b32.xlu0 %v6257_v17, %s4785_s16 }
 0x400   : > { %3033 = vrot.lane.b32.xlu1 %v6292_v52, %s4785_s16  ;;  %3029 = vrot.lane.b32.xlu0 %v6269_v12, %s4785_s16 }
 0x404   : > { %3225 = vrot.lane.b32.xlu1 %v6283_v51, %s4786_s17  ;;  %3035 = vrot.lane.b32.xlu0 %v6285_v33, %s4785_s16 }
 0x405   : > { %v2676_v42 = vpop.permute.xlu1 %2675 }
 0x406   : > { %2742 = vst.msk [vmem:[#allocation4 + $0xe8] sm:$0xff] %vm615_vm2, %v2676_v42  ;;  %v2674_v43 = vpop.permute.xlu0 %2673 }
 0x407   : > { %2741 = vst.msk [vmem:[#allocation4 + $0xe0] sm:$0xff] %vm615_vm2, %v2674_v43 }
 0x408   : > { %3193 = vrot.lane.b32.xlu1 %v6159_v21, %s4786_s17  ;;  %3227 = vrot.lane.b32.xlu0 %v6278_v20, %s4786_s17 }
 0x40c   : > { %3417 = vrot.lane.b32.xlu1 %v6464_v63, %s4787_s18  ;;  %3195 = vrot.lane.b32.xlu0 %v6154_v18, %s4786_s17 }
 0x410   : > { %3385 = vrot.lane.b32.xlu1 %v6414_v32, %s4787_s18  ;;  %3419 = vrot.lane.b32.xlu0 %v6460_v27, %s4787_s18  ;;  %v4610_v27 = vpop.f32.mrb[30].mxu0 }
 0x411   : > { %v2367_v61 = vadd.f32 %v4610_v27, %v6146_v41  ;;  %v2361_v48 = vpop.f32.mrb[31].mxu0 }
 0x412   : > { %v2680_v14 = vpop.permute.xlu1 %2679  ;;  %v2678_v17 = vpop.permute.xlu0 %2677  ;;  %v2362_v36 = vadd.f32 %v6146_v41, %v2361_v48 }
 0x413   : > { %2744 = vst.msk [vmem:[#allocation4 + $0xf8] sm:$0xff] %vm615_vm2, %v2680_v14  ;;  %2743 = vst.msk [vmem:[#allocation4 + $0xf0] sm:$0xff] %vm615_vm2, %v2678_v17  ;;  %v2401_v57 = vmax.f32 %v2367_v61, 0.0 }
 0x414   : > { %3610 = vrot.lane.b32.xlu1 %v6312_v0, %s4788_s19  ;;  %3387 = vrot.lane.b32.xlu0 %v6409_v62, %s4787_s18  ;;  %v2400_v22 = vmax.f32 %v2362_v36, 0.0 }
 0x415   : > { %2488 = vst.msk [vmem:[#allocation3 + $0x189] sm:$0xff] %vm270_vm0, %v2401_v57 }
 0x416   : > { %v2812_v21 = vpop.permute.xlu1 %2811  ;;  %v2810_v18 = vpop.permute.xlu0 %2809  ;;  %2487 = vst.msk [vmem:[#allocation3 + $0x181] sm:$0xff] %vm270_vm0, %v2400_v22 }
 0x417   : > { %2906 = vst.msk [vmem:[#allocation4 + $0x8] sm:$0xff] %vm808_vm3, %v2812_v21  ;;  %2905 = vst.msk [vmem:[#allocation4] sm:$0xff] %vm808_vm3, %v2810_v18 }
 0x418   : > { %3578 = vrot.lane.b32.xlu1 %v6183_v7, %s4788_s19  ;;  %3612 = vrot.lane.b32.xlu0 %v6305_v26, %s4788_s19 }
 0x41a   : > { %v2816_v12 = vpop.permute.xlu1 %2815  ;;  %v2814_v20 = vpop.permute.xlu0 %2813 }
 0x41b   : > { %2908 = vst.msk [vmem:[#allocation4 + $0x18] sm:$0xff] %vm808_vm3, %v2816_v12  ;;  %2907 = vst.msk [vmem:[#allocation4 + $0x10] sm:$0xff] %vm808_vm3, %v2814_v20 }
 0x41c   : > { %3802 = vrot.lane.b32.xlu1 %v6303_v60, %s4789_s20  ;;  %3580 = vrot.lane.b32.xlu0 %v6181_v8, %s4788_s19 }
 0x41e   : > { %v2820_v51 = vpop.permute.xlu1 %2819  ;;  %v2818_v33 = vpop.permute.xlu0 %2817 }
 0x41f   : > { %2910 = vst.msk [vmem:[#allocation4 + $0x28] sm:$0xff] %vm808_vm3, %v2820_v51  ;;  %2909 = vst.msk [vmem:[#allocation4 + $0x20] sm:$0xff] %vm808_vm3, %v2818_v33 }
 0x420   : > { %3770 = vrot.lane.b32.xlu1 %v6179_v5, %s4789_s20  ;;  %3804 = vrot.lane.b32.xlu0 %v6298_v25, %s4789_s20 }
 0x422   : > { %v2824_v7 = vpop.permute.xlu1 %2823  ;;  %v2822_v52 = vpop.permute.xlu0 %2821 }
 0x423   : > { %2912 = vst.msk [vmem:[#allocation4 + $0x38] sm:$0xff] %vm808_vm3, %v2824_v7  ;;  %2911 = vst.msk [vmem:[#allocation4 + $0x30] sm:$0xff] %vm808_vm3, %v2822_v52 }
 0x424   : > { %3994 = vrot.lane.b32.xlu1 %v6474_v35, %s4790_s29  ;;  %3772 = vrot.lane.b32.xlu0 %v6174_v6, %s4789_s20 }
 0x426   : > { %v2828_v8 = vpop.permute.xlu1 %2827  ;;  %v2826_v62 = vpop.permute.xlu0 %2825 }
 0x427   : > { %2914 = vst.msk [vmem:[#allocation4 + $0x48] sm:$0xff] %vm808_vm3, %v2828_v8  ;;  %2913 = vst.msk [vmem:[#allocation4 + $0x40] sm:$0xff] %vm808_vm3, %v2826_v62 }
 0x428   : > { %3962 = vrot.lane.b32.xlu1 %v6422_v1, %s4790_s29  ;;  %3996 = vrot.lane.b32.xlu0 %v6469_v19, %s4790_s29 }
 0x42a   : > { %v2832_v32 = vpop.permute.xlu1 %2831  ;;  %v2830_v9 = vpop.permute.xlu0 %2829 }
 0x42b   : > { %2916 = vst.msk [vmem:[#allocation4 + $0x58] sm:$0xff] %vm808_vm3, %v2832_v32  ;;  %2915 = vst.msk [vmem:[#allocation4 + $0x50] sm:$0xff] %vm808_vm3, %v2830_v9 }
 0x42c   : > { %3037 = vrot.lane.b32.xlu1 %v6312_v0, %s4785_s16  ;;  %3964 = vrot.lane.b32.xlu0 %v6418_v39, %s4790_s29 }
 0x42e   : > { %v2836_v63 = vpop.permute.xlu1 %2835  ;;  %v2834_v10 = vpop.permute.xlu0 %2833 }
 0x42f   : > { %2918 = vst.msk [vmem:[#allocation4 + $0x68] sm:$0xff] %vm808_vm3, %v2836_v63  ;;  %2917 = vst.msk [vmem:[#allocation4 + $0x60] sm:$0xff] %vm808_vm3, %v2834_v10 }
 0x430   : > { %3229 = vrot.lane.b32.xlu1 %v6303_v60, %s4786_s17  ;;  %3039 = vrot.lane.b32.xlu0 %v6305_v26, %s4785_s16 }
 0x432   : > { %v2840_v0 = vpop.permute.xlu1 %2839  ;;  %v2838_v42 = vpop.permute.xlu0 %2837 }
 0x433   : > { %2920 = vst.msk [vmem:[#allocation4 + $0x78] sm:$0xff] %vm808_vm3, %v2840_v0  ;;  %2919 = vst.msk [vmem:[#allocation4 + $0x70] sm:$0xff] %vm808_vm3, %v2838_v42 }
 0x434   : > { %3197 = vrot.lane.b32.xlu1 %v6179_v5, %s4786_s17  ;;  %3231 = vrot.lane.b32.xlu0 %v6298_v25, %s4786_s17 }
 0x436   : > { %v2844_v41 = vpop.permute.xlu1 %2843  ;;  %v2842_v60 = vpop.permute.xlu0 %2841 }
 0x437   : > { %2922 = vst.msk [vmem:[#allocation4 + $0x88] sm:$0xff] %vm808_vm3, %v2844_v41  ;;  %2921 = vst.msk [vmem:[#allocation4 + $0x80] sm:$0xff] %vm808_vm3, %v2842_v60 }
 0x438   : > { %3421 = vrot.lane.b32.xlu1 %v6474_v35, %s4787_s18  ;;  %3199 = vrot.lane.b32.xlu0 %v6174_v6, %s4786_s17 }
 0x43a   : > { %v2848_v26 = vpop.permute.xlu1 %2847  ;;  %v2846_v5 = vpop.permute.xlu0 %2845 }
 0x43b   : > { %2924 = vst.msk [vmem:[#allocation4 + $0x98] sm:$0xff] %vm808_vm3, %v2848_v26  ;;  %2923 = vst.msk [vmem:[#allocation4 + $0x90] sm:$0xff] %vm808_vm3, %v2846_v5 }
 0x43c   : > { %3389 = vrot.lane.b32.xlu1 %v6422_v1, %s4787_s18  ;;  %3423 = vrot.lane.b32.xlu0 %v6469_v19, %s4787_s18 }
 0x43e   : > { %v2852_v25 = vpop.permute.xlu1 %2851  ;;  %v2850_v43 = vpop.permute.xlu0 %2849 }
 0x43f   : > { %2926 = vst.msk [vmem:[#allocation4 + $0xa8] sm:$0xff] %vm808_vm3, %v2852_v25  ;;  %2925 = vst.msk [vmem:[#allocation4 + $0xa0] sm:$0xff] %vm808_vm3, %v2850_v43  ;;  %v3728_v25 = vld [vmem:[#allocation3 + $0x139] sm:$0xff] }
 0x440   : > { %3614 = vrot.lane.b32.xlu1 %v6332_v56, %s4788_s19  ;;  %3391 = vrot.lane.b32.xlu0 %v6418_v39, %s4787_s18  ;;  %v3712_v43 = vld [vmem:[#allocation3 + $0x79] sm:$0xff] }
 0x442   : > { %v2856_v6 = vpop.permute.xlu1 %2855  ;;  %v2854_v35 = vpop.permute.xlu0 %2853 }
 0x443   : > { %2928 = vst.msk [vmem:[#allocation4 + $0xb8] sm:$0xff] %vm808_vm3, %v2856_v6  ;;  %2927 = vst.msk [vmem:[#allocation4 + $0xb0] sm:$0xff] %vm808_vm3, %v2854_v35 }
 0x444   : > { %3582 = vrot.lane.b32.xlu1 %v6200_v23, %s4788_s19  ;;  %3616 = vrot.lane.b32.xlu0 %v6325_v50, %s4788_s19 }
 0x446   : > { %v2860_v1 = vpop.permute.xlu1 %2859  ;;  %v2858_v19 = vpop.permute.xlu0 %2857 }
 0x447   : > { %2930 = vst.msk [vmem:[#allocation4 + $0xc8] sm:$0xff] %vm808_vm3, %v2860_v1  ;;  %2929 = vst.msk [vmem:[#allocation4 + $0xc0] sm:$0xff] %vm808_vm3, %v2858_v19  ;;  %v3729_v19 = vld [vmem:[#allocation3 + $0x141] sm:$0xff] }
 0x448   : > { %3806 = vrot.lane.b32.xlu1 %v6323_v47, %s4789_s20  ;;  %3584 = vrot.lane.b32.xlu0 %v6198_v34, %s4788_s19  ;;  %v3709_v34 = vld [vmem:[#allocation3 + $0x51] sm:$0xff] }
 0x44a   : > { %v2864_v39 = vpop.permute.xlu1 %2863  ;;  %v2862_v14 = vpop.permute.xlu0 %2861 }
 0x44b   : > { %2932 = vst.msk [vmem:[#allocation4 + $0xd8] sm:$0xff] %vm808_vm3, %v2864_v39  ;;  %2931 = vst.msk [vmem:[#allocation4 + $0xd0] sm:$0xff] %vm808_vm3, %v2862_v14 }
 0x44c   : > { %3774 = vrot.lane.b32.xlu1 %v6196_v16, %s4789_s20  ;;  %3808 = vrot.lane.b32.xlu0 %v6318_v40, %s4789_s20 }
 0x44e   : > { %v2868_v23 = vpop.permute.xlu1 %2867  ;;  %v2866_v17 = vpop.permute.xlu0 %2865 }
 0x44f   : > { %2934 = vst.msk [vmem:[#allocation4 + $0xe8] sm:$0xff] %vm808_vm3, %v2868_v23  ;;  %2933 = vst.msk [vmem:[#allocation4 + $0xe0] sm:$0xff] %vm808_vm3, %v2866_v17 }
 0x450   : > { %3998 = vrot.lane.b32.xlu1 %v6482_v45, %s4790_s29  ;;  %3776 = vrot.lane.b32.xlu0 %v3709_v34, %s4789_s20 }
 0x452   : > { %v2872_v21 = vpop.permute.xlu1 %2871  ;;  %v2870_v18 = vpop.permute.xlu0 %2869 }
 0x453   : > { %2936 = vst.msk [vmem:[#allocation4 + $0xf8] sm:$0xff] %vm808_vm3, %v2872_v21  ;;  %2935 = vst.msk [vmem:[#allocation4 + $0xf0] sm:$0xff] %vm808_vm3, %v2870_v18 }
 0x454   : > { %3966 = vrot.lane.b32.xlu1 %v6430_v53, %s4790_s29  ;;  %4000 = vrot.lane.b32.xlu0 %v6478_v38, %s4790_s29 }
 0x456   : > { %v3004_v16 = vpop.permute.xlu1 %3003  ;;  %v3002_v12 = vpop.permute.xlu0 %3001 }
 0x457   : > { %3098 = vst.msk [vmem:[#allocation4 + $0x8] sm:$0xff] %vm1001_vm4, %v3004_v16  ;;  %3097 = vst.msk [vmem:[#allocation4] sm:$0xff] %vm1001_vm4, %v3002_v12 }
 0x458   : > { %3041 = vrot.lane.b32.xlu1 %v6332_v56, %s4785_s16  ;;  %3968 = vrot.lane.b32.xlu0 %v6426_v44, %s4790_s29  ;;  %v3133_v56 = vld [vmem:[#allocation3 + $0x49] sm:$0xff] }
 0x45a   : > { %v3008_v20 = vpop.permute.xlu1 %3007  ;;  %v3006_v51 = vpop.permute.xlu0 %3005 }
 0x45b   : > { %3100 = vst.msk [vmem:[#allocation4 + $0x18] sm:$0xff] %vm1001_vm4, %v3008_v20  ;;  %3099 = vst.msk [vmem:[#allocation4 + $0x10] sm:$0xff] %vm1001_vm4, %v3006_v51  ;;  %v7257_v51 = vld [vmem:[#allocation12_spill] sm:$0xff] }
 0x45c   : > { %3233 = vrot.lane.b32.xlu1 %v6323_v47, %s4786_s17  ;;  %3043 = vrot.lane.b32.xlu0 %v6325_v50, %s4785_s16 }
 0x45e   : > { %v3012_v33 = vpop.permute.xlu1 %3011  ;;  %v3010_v7 = vpop.permute.xlu0 %3009 }
 0x45f   : > { %3102 = vst.msk [vmem:[#allocation4 + $0x28] sm:$0xff] %vm1001_vm4, %v3012_v33  ;;  %3101 = vst.msk [vmem:[#allocation4 + $0x20] sm:$0xff] %vm1001_vm4, %v3010_v7 }
 0x460   : > { %3201 = vrot.lane.b32.xlu1 %v3133_v56, %s4786_s17  ;;  %3235 = vrot.lane.b32.xlu0 %v6318_v40, %s4786_s17 }
 0x462   : > { %v3016_v52 = vpop.permute.xlu1 %3015  ;;  %v3014_v8 = vpop.permute.xlu0 %3013 }
 0x463   : > { %3104 = vst.msk [vmem:[#allocation4 + $0x38] sm:$0xff] %vm1001_vm4, %v3016_v52  ;;  %3103 = vst.msk [vmem:[#allocation4 + $0x30] sm:$0xff] %vm1001_vm4, %v3014_v8 }
 0x464   : > { %3425 = vrot.lane.b32.xlu1 %v6482_v45, %s4787_s18  ;;  %3203 = vrot.lane.b32.xlu0 %v3709_v34, %s4786_s17  ;;  %v3713_v34 = vld [vmem:[#allocation3 + $0x81] sm:$0xff] }
 0x466   : > { %v3020_v47 = vpop.permute.xlu1 %3019  ;;  %v3018_v50 = vpop.permute.xlu0 %3017 }
 0x467   : > { %3106 = vst.msk [vmem:[#allocation4 + $0x48] sm:$0xff] %vm1001_vm4, %v3020_v47  ;;  %3105 = vst.msk [vmem:[#allocation4 + $0x40] sm:$0xff] %vm1001_vm4, %v3018_v50  ;;  %v3329_v47 = vld [vmem:[#allocation3 + $0x7a] sm:$0xff] }
 0x468   : > { %3393 = vrot.lane.b32.xlu1 %v6430_v53, %s4787_s18  ;;  %3427 = vrot.lane.b32.xlu0 %v6478_v38, %s4787_s18 }
 0x46a   : > { %v3024_v40 = vpop.permute.xlu1 %3023  ;;  %v3022_v62 = vpop.permute.xlu0 %3021 }
 0x46b   : > { %3108 = vst.msk [vmem:[#allocation4 + $0x58] sm:$0xff] %vm1001_vm4, %v3024_v40  ;;  %3107 = vst.msk [vmem:[#allocation4 + $0x50] sm:$0xff] %vm1001_vm4, %v3022_v62  ;;  %v3330_v62 = vld [vmem:[#allocation3 + $0x82] sm:$0xff] }
 0x46c   : > { %3618 = vrot.lane.b32.xlu1 %v6352_v11, %s4788_s19  ;;  %3395 = vrot.lane.b32.xlu0 %v6426_v44, %s4787_s18 }
 0x46e   : > { %v3028_v45 = vpop.permute.xlu1 %3027  ;;  %v3026_v32 = vpop.permute.xlu0 %3025 }
 0x46f   : > { %3110 = vst.msk [vmem:[#allocation4 + $0x68] sm:$0xff] %vm1001_vm4, %v3028_v45  ;;  %3109 = vst.msk [vmem:[#allocation4 + $0x60] sm:$0xff] %vm1001_vm4, %v3026_v32 }
 0x470   : > { %3586 = vrot.lane.b32.xlu1 %v6217_v24, %s4788_s19  ;;  %3620 = vrot.lane.b32.xlu0 %v6345_v29, %s4788_s19  ;;  %v3710_v24 = vld [vmem:[#allocation3 + $0x61] sm:$0xff] }
 0x472   : > { %v3034_v53 = vpop.permute.xlu1 %3033  ;;  %v3030_v38 = vpop.permute.xlu0 %3029 }
 0x473   : > { %3113 = vst.msk [vmem:[#allocation4 + $0x80] sm:$0xff] %vm1001_vm4, %v3034_v53  ;;  %3111 = vst.msk [vmem:[#allocation4 + $0x70] sm:$0xff] %vm1001_vm4, %v3030_v38  ;;  %v3522_v53 = vld [vmem:[#allocation3 + $0x90] sm:$0xff] }
 0x474   : > { %3810 = vrot.lane.b32.xlu1 %v6343_v4, %s4789_s20  ;;  %3588 = vrot.lane.b32.xlu0 %v6215_v59, %s4788_s19  ;;  %v3711_v59 = vld [vmem:[#allocation3 + $0x69] sm:$0xff] }
 0x476   : > { %v3226_v44 = vpop.permute.xlu1 %3225  ;;  %v3036_v9 = vpop.permute.xlu0 %3035 }
 0x477   : > { %3305 = vst.msk [vmem:[#allocation4 + $0x80] sm:$0xff] %vm1194_vm5, %v3226_v44 }
 0x478   : > { %3114 = vst.msk [vmem:[#allocation4 + $0x88] sm:$0xff] %vm1001_vm4, %v3036_v9  ;;  %3778 = vrot.lane.b32.xlu1 %v3710_v24, %s4789_s20  ;;  %3812 = vrot.lane.b32.xlu0 %v6338_v2, %s4789_s20  ;;  %v3730_v9 = vld [vmem:[#allocation3 + $0x151] sm:$0xff] }
 0x47a   : > { %v3194_v27 = vpop.permute.xlu1 %3193  ;;  %v3228_v63 = vpop.permute.xlu0 %3227 }
 0x47b   : > { %3289 = vst.msk [vmem:[#allocation4] sm:$0xff] %vm1194_vm5, %v3194_v27  ;;  %3306 = vst.msk [vmem:[#allocation4 + $0x88] sm:$0xff] %vm1194_vm5, %v3228_v63 }
 0x47c   : > { %4002 = vrot.lane.b32.xlu1 %v6490_v55, %s4790_s29  ;;  %3780 = vrot.lane.b32.xlu0 %v3711_v59, %s4789_s20 }
 0x47e   : > { %v3418_v61 = vpop.permute.xlu1 %3417  ;;  %v3196_v10 = vpop.permute.xlu0 %3195 }
 0x47f   : > { %3497 = vst.msk [vmem:[#allocation4 + $0x80] sm:$0xff] %vm1387_vm7, %v3418_v61 }
 0x480   : > { %3290 = vst.msk [vmem:[#allocation4 + $0x8] sm:$0xff] %vm1194_vm5, %v3196_v10  ;;  %3970 = vrot.lane.b32.xlu1 %v6440_v3, %s4790_s29  ;;  %4004 = vrot.lane.b32.xlu0 %v6486_v54, %s4790_s29 }
 0x482   : > { %v3386_v2 = vpop.permute.xlu1 %3385  ;;  %v3420_v48 = vpop.permute.xlu0 %3419 }
 0x483   : > { %3481 = vst.msk [vmem:[#allocation4] sm:$0xff] %vm1387_vm7, %v3386_v2  ;;  %3498 = vst.msk [vmem:[#allocation4 + $0x88] sm:$0xff] %vm1387_vm7, %v3420_v48  ;;  %v3731_v2 = vld [vmem:[#allocation3 + $0x159] sm:$0xff] }
 0x484   : > { %3045 = vrot.lane.b32.xlu1 %v6352_v11, %s4785_s16  ;;  %3972 = vrot.lane.b32.xlu0 %v6435_v28, %s4790_s29  ;;  %v3152_v11 = vld [vmem:[#allocation3 + $0x129] sm:$0xff] }
 0x486   : > { %v3611_v57 = vpop.permute.xlu1 %3610  ;;  %v3388_v36 = vpop.permute.xlu0 %3387 }
 0x487   : > { %3690 = vst.msk [vmem:[#allocation4 + $0x80] sm:$0xff] %vm1581_vm8, %v3611_v57 }
 0x488   : > { %3482 = vst.msk [vmem:[#allocation4 + $0x8] sm:$0xff] %vm1387_vm7, %v3388_v36  ;;  %3237 = vrot.lane.b32.xlu1 %v6343_v4, %s4786_s17  ;;  %3047 = vrot.lane.b32.xlu0 %v6345_v29, %s4785_s16 }
 0x48a   : > { %v3579_v0 = vpop.permute.xlu1 %3578  ;;  %v3613_v22 = vpop.permute.xlu0 %3612 }
 0x48b   : > { %3674 = vst.msk [vmem:[#allocation4] sm:$0xff] %vm1581_vm8, %v3579_v0  ;;  %3691 = vst.msk [vmem:[#allocation4 + $0x88] sm:$0xff] %vm1581_vm8, %v3613_v22 }
 0x48c   : > { %3205 = vrot.lane.b32.xlu1 %v3710_v24, %s4786_s17  ;;  %3239 = vrot.lane.b32.xlu0 %v3152_v11, %s4786_s17  ;;  %v3523_v24 = vld [vmem:[#allocation3 + $0x98] sm:$0xff] }
 0x48d   : > { %v3715_v11 = vld [vmem:[#allocation3 + $0x99] sm:$0xff] }
 0x48e   : > { %v3803_v42 = vpop.permute.xlu1 %3802  ;;  %v3581_v41 = vpop.permute.xlu0 %3580 }
 0x48f   : > { %3882 = vst.msk [vmem:[#allocation4 + $0x80] sm:$0xff] %vm1774_vm9, %v3803_v42 }
 0x490   : > { %3675 = vst.msk [vmem:[#allocation4 + $0x8] sm:$0xff] %vm1581_vm8, %v3581_v41  ;;  %3429 = vrot.lane.b32.xlu1 %v6490_v55, %s4787_s18  ;;  %3207 = vrot.lane.b32.xlu0 %v3711_v59, %s4786_s17  ;;  %v3714_v59 = vld [vmem:[#allocation3 + $0x91] sm:$0xff] }
 0x492   : > { %v3771_v4 = vpop.permute.xlu1 %3770  ;;  %v3805_v29 = vpop.permute.xlu0 %3804 }
 0x493   : > { %3866 = vst.msk [vmem:[#allocation4] sm:$0xff] %vm1774_vm9, %v3771_v4  ;;  %3883 = vst.msk [vmem:[#allocation4 + $0x88] sm:$0xff] %vm1774_vm9, %v3805_v29  ;;  %v3906_v29 = vld [vmem:[#allocation3 + $0x92] sm:$0xff] }
 0x494   : > { %3397 = vrot.lane.b32.xlu1 %v6440_v3, %s4787_s18  ;;  %3431 = vrot.lane.b32.xlu0 %v6486_v54, %s4787_s18 }
 0x496   : > { %v3995_v60 = vpop.permute.xlu1 %3994  ;;  %v3773_v26 = vpop.permute.xlu0 %3772 }
 0x497   : > { %4074 = vst.msk [vmem:[#allocation4 + $0x80] sm:$0xff] %vm1967_vm10, %v3995_v60  ;;  %v3923_v60 = vld [vmem:[#allocation3 + $0x15a] sm:$0xff] }
 0x498   : > { %3867 = vst.msk [vmem:[#allocation4 + $0x8] sm:$0xff] %vm1774_vm9, %v3773_v26  ;;  %3622 = vrot.lane.b32.xlu1 %v6370_v46, %s4788_s19  ;;  %3399 = vrot.lane.b32.xlu0 %v6435_v28, %s4787_s18 }
 0x49a   : > { %v3963_v55 = vpop.permute.xlu1 %3962  ;;  %v3997_v5 = vpop.permute.xlu0 %3996 }
 0x49b   : > { %4058 = vst.msk [vmem:[#allocation4] sm:$0xff] %vm1967_vm10, %v3963_v55  ;;  %4075 = vst.msk [vmem:[#allocation4 + $0x88] sm:$0xff] %vm1967_vm10, %v3997_v5  ;;  %v3907_v55 = vld [vmem:[#allocation3 + $0x9a] sm:$0xff] }
 0x49c   : > { %3590 = vrot.lane.b32.xlu1 %v6231_v31, %s4788_s19  ;;  %3624 = vrot.lane.b32.xlu0 %v6364_v58, %s4788_s19 }
 0x49e   : > { %v3038_v3 = vpop.permute.xlu1 %3037  ;;  %v3965_v54 = vpop.permute.xlu0 %3964  ;;  %v4107_v6 = vld [vmem:[#allocation4 + $0x80] sm:$0xff] }
 0x49f   : > { %3115 = vst.msk [vmem:[#allocation4 + $0x90] sm:$0xff] %vm1001_vm4, %v3038_v3 }
 0x4a0   : > { %4059 = vst.msk [vmem:[#allocation4 + $0x8] sm:$0xff] %vm1967_vm10, %v3965_v54  ;;  %3814 = vrot.lane.b32.xlu1 %v3728_v25, %s4789_s20  ;;  %3592 = vrot.lane.b32.xlu0 %v6229_v30, %s4788_s19 }
 0x4a2   : > { %v3230_v28 = vpop.permute.xlu1 %3229  ;;  %v3040_v31 = vpop.permute.xlu0 %3039  ;;  %v4108_v35 = vld [vmem:[#allocation4 + $0x88] sm:$0xff]  ;;  %v4091_v23 = vld [vmem:[#allocation4] sm:$0xff] }
 0x4a3   : > { %3307 = vst.msk [vmem:[#allocation4 + $0x90] sm:$0xff] %vm1194_vm5, %v3230_v28  ;;  %v4619_v39 = vpack.c.bf16 %v4108_v35, %v4107_v6 }
 0x4a4   : > { %3116 = vst.msk [vmem:[#allocation4 + $0x98] sm:$0xff] %vm1001_vm4, %v3040_v31  ;;  %3782 = vrot.lane.b32.xlu1 %v3712_v43, %s4789_s20  ;;  %3816 = vrot.lane.b32.xlu0 %v3729_v19, %s4789_s20  ;;  %v3347_v31 = vld [vmem:[#allocation3 + $0x152] sm:$0xff] }
 0x4a5   : > { %4621 = vmatprep.subr.msk.bf16.mxu1 %vm6781_vm12, %v4619_v39 }
 0x4a6   : > { %v3198_v30 = vpop.permute.xlu1 %3197  ;;  %v3232_v14 = vpop.permute.xlu0 %3231 }
 0x4a7   : > { %3291 = vst.msk [vmem:[#allocation4 + $0x10] sm:$0xff] %vm1194_vm5, %v3198_v30  ;;  %v4092_v17 = vld [vmem:[#allocation4 + $0x8] sm:$0xff]  ;;  %3308 = vst.msk [vmem:[#allocation4 + $0x98] sm:$0xff] %vm1194_vm5, %v3232_v14 }
 0x4a8   : > { %4006 = vrot.lane.b32.xlu1 %v6500_v37, %s4790_s29  ;;  %v4622_v21 = vpack.c.bf16 %v4092_v17, %v4091_v23  ;;  %3784 = vrot.lane.b32.xlu0 %v3713_v34, %s4789_s20  ;;  %v7260_v30 = vld [vmem:[#allocation11_spill] sm:$0xff]  ;;  %v3524_v17 = vld [vmem:[#allocation3 + $0xa8] sm:$0xff] }
 0x4aa   : > { %v3422_v18 = vpop.permute.xlu1 %3421  ;;  %4624 = vmatpush3.bf16.xpose.msk.msra.mxu1 %vm6781_vm12, %v4622_v21  ;;  %v3200_v16 = vpop.permute.xlu0 %3199 }
 0x4ab   : > { %3499 = vst.msk [vmem:[#allocation4 + $0x90] sm:$0xff] %vm1387_vm7, %v3422_v18 }
 0x4ac   : > { %3292 = vst.msk [vmem:[#allocation4 + $0x18] sm:$0xff] %vm1194_vm5, %v3200_v16  ;;  %3974 = vrot.lane.b32.xlu1 %v6448_v15, %s4790_s29  ;;  %4008 = vrot.lane.b32.xlu0 %v6495_v49, %s4790_s29  ;;  %v3732_v16 = vld [vmem:[#allocation3 + $0x169] sm:$0xff] }
 0x4ae   : > { %v3390_v12 = vpop.permute.xlu1 %3389  ;;  %v3424_v20 = vpop.permute.xlu0 %3423 }
 0x4af   : > { %3483 = vst.msk [vmem:[#allocation4 + $0x10] sm:$0xff] %vm1387_vm7, %v3390_v12  ;;  %3500 = vst.msk [vmem:[#allocation4 + $0x98] sm:$0xff] %vm1387_vm7, %v3424_v20  ;;  %v3525_v12 = vld [vmem:[#allocation3 + $0xb0] sm:$0xff] }
 0x4b0   : > { %3049 = vrot.lane.b32.xlu1 %v6370_v46, %s4785_s16  ;;  %3976 = vrot.lane.b32.xlu0 %v7257_v51, %s4790_s29 }
 0x4b2   : > { %v3615_v33 = vpop.permute.xlu1 %3614  ;;  %v3392_v7 = vpop.permute.xlu0 %3391 }
 0x4b3   : > { %3692 = vst.msk [vmem:[#allocation4 + $0x90] sm:$0xff] %vm1581_vm8, %v3615_v33  ;;  %v3716_v33 = vld [vmem:[#allocation3 + $0xa9] sm:$0xff] }
 0x4b4   : > { %3484 = vst.msk [vmem:[#allocation4 + $0x18] sm:$0xff] %vm1387_vm7, %v3392_v7  ;;  %3241 = vrot.lane.b32.xlu1 %v3728_v25, %s4786_s17  ;;  %3051 = vrot.lane.b32.xlu0 %v6364_v58, %s4785_s16 }
 0x4b6   : > { %v3583_v15 = vpop.permute.xlu1 %3582  ;;  %v3617_v56 = vpop.permute.xlu0 %3616 }
 0x4b7   : > { %3676 = vst.msk [vmem:[#allocation4 + $0x10] sm:$0xff] %vm1581_vm8, %v3583_v15  ;;  %3693 = vst.msk [vmem:[#allocation4 + $0x98] sm:$0xff] %vm1581_vm8, %v3617_v56  ;;  %v3733_v56 = vld [vmem:[#allocation3 + $0x171] sm:$0xff] }
 0x4b8   : > { %3209 = vrot.lane.b32.xlu1 %v3712_v43, %s4786_s17  ;;  %3243 = vrot.lane.b32.xlu0 %v3729_v19, %s4786_s17 }
 0x4ba   : > { %v3807_v46 = vpop.permute.xlu1 %3806  ;;  %v3585_v52 = vpop.permute.xlu0 %3584 }
 0x4bb   : > { %3884 = vst.msk [vmem:[#allocation4 + $0x90] sm:$0xff] %vm1774_vm9, %v3807_v46 }
 0x4bc   : > { %3677 = vst.msk [vmem:[#allocation4 + $0x18] sm:$0xff] %vm1581_vm8, %v3585_v52  ;;  %3433 = vrot.lane.b32.xlu1 %v6500_v37, %s4787_s18  ;;  %3211 = vrot.lane.b32.xlu0 %v3713_v34, %s4786_s17  ;;  %v7258_v37 = vld [vmem:[#allocation9_spill] sm:$0xff]  ;;  %v7261_v34 = vld [vmem:[#allocation10_spill] sm:$0xff] }
 0x4be   : > { %v3775_v58 = vpop.permute.xlu1 %3774  ;;  %v3809_v8 = vpop.permute.xlu0 %3808 }
 0x4bf   : > { %3868 = vst.msk [vmem:[#allocation4 + $0x10] sm:$0xff] %vm1774_vm9, %v3775_v58  ;;  %3885 = vst.msk [vmem:[#allocation4 + $0x98] sm:$0xff] %vm1774_vm9, %v3809_v8  ;;  %v3924_v8 = vld [vmem:[#allocation3 + $0x16a] sm:$0xff] }
 0x4c0   : > { %3401 = vrot.lane.b32.xlu1 %v3329_v47, %s4787_s18  ;;  %3435 = vrot.lane.b32.xlu0 %v6495_v49, %s4787_s18  ;;  %v7259_v49 = vld [vmem:[#allocation8_spill] sm:$0xff] }
 0x4c2   : > { %v3999_v50 = vpop.permute.xlu1 %3998  ;;  %v3777_v40 = vpop.permute.xlu0 %3776 }
 0x4c3   : > { %4076 = vst.msk [vmem:[#allocation4 + $0x90] sm:$0xff] %vm1967_vm10, %v3999_v50 }
 0x4c4   : > { %3869 = vst.msk [vmem:[#allocation4 + $0x18] sm:$0xff] %vm1774_vm9, %v3777_v40  ;;  %3626 = vrot.lane.b32.xlu1 %v7258_v37, %s4788_s19  ;;  %3403 = vrot.lane.b32.xlu0 %v3330_v62, %s4787_s18  ;;  %v3717_v40 = vld [vmem:[#allocation3 + $0xb1] sm:$0xff] }
 0x4c6   : > { %v3967_v45 = vpop.permute.xlu1 %3966  ;;  %v4001_v32 = vpop.permute.xlu0 %4000 }
 0x4c7   : > { %4060 = vst.msk [vmem:[#allocation4 + $0x10] sm:$0xff] %vm1967_vm10, %v3967_v45  ;;  %4077 = vst.msk [vmem:[#allocation4 + $0x98] sm:$0xff] %vm1967_vm10, %v4001_v32  ;;  %v3908_v32 = vld [vmem:[#allocation3 + $0xaa] sm:$0xff] }
 0x4c8   : > { %3594 = vrot.lane.b32.xlu1 %v3522_v53, %s4788_s19  ;;  %3628 = vrot.lane.b32.xlu0 %v7259_v49, %s4788_s19  ;;  %v3925_v53 = vld [vmem:[#allocation3 + $0x172] sm:$0xff] }
 0x4ca   : > { %v3042_v38 = vpop.permute.xlu1 %3041  ;;  %v3969_v44 = vpop.permute.xlu0 %3968  ;;  %v4109_v61 = vld [vmem:[#allocation4 + $0x90] sm:$0xff] }
 0x4cb   : > { %3117 = vst.msk [vmem:[#allocation4 + $0xa0] sm:$0xff] %vm1001_vm4, %v3042_v38 }
 0x4cc   : > { %4061 = vst.msk [vmem:[#allocation4 + $0x18] sm:$0xff] %vm1967_vm10, %v3969_v44  ;;  %3818 = vrot.lane.b32.xlu1 %v3730_v9, %s4789_s20  ;;  %3596 = vrot.lane.b32.xlu0 %v3523_v24, %s4788_s19  ;;  %v2965_v44 = vld [vmem:[#allocation3 + $0x168] sm:$0xff] }
 0x4ce   : > { %v3234_v27 = vpop.permute.xlu1 %3233  ;;  %v3044_v63 = vpop.permute.xlu0 %3043  ;;  %v4110_v10 = vld [vmem:[#allocation4 + $0x98] sm:$0xff]  ;;  %v4093_v0 = vld [vmem:[#allocation4 + $0x10] sm:$0xff] }
 0x4cf   : > { %3309 = vst.msk [vmem:[#allocation4 + $0xa0] sm:$0xff] %vm1194_vm5, %v3234_v27  ;;  %v4625_v48 = vpack.c.bf16 %v4110_v10, %v4109_v61 }
 0x4d0   : > { %3118 = vst.msk [vmem:[#allocation4 + $0xa8] sm:$0xff] %vm1001_vm4, %v3044_v63  ;;  %3786 = vrot.lane.b32.xlu1 %v3714_v59, %s4789_s20  ;;  %3820 = vrot.lane.b32.xlu0 %v3731_v2, %s4789_s20  ;;  %v2966_v63 = vld [vmem:[#allocation3 + $0x170] sm:$0xff] }
 0x4d1   : > { %4627 = vmatprep.subr.msk.bf16.mxu1 %vm6781_vm12, %v4625_v48 }
 0x4d2   : > { %v3202_v57 = vpop.permute.xlu1 %3201  ;;  %v3236_v36 = vpop.permute.xlu0 %3235 }
 0x4d3   : > { %3293 = vst.msk [vmem:[#allocation4 + $0x20] sm:$0xff] %vm1194_vm5, %v3202_v57  ;;  %v4094_v22 = vld [vmem:[#allocation4 + $0x18] sm:$0xff]  ;;  %3310 = vst.msk [vmem:[#allocation4 + $0xa8] sm:$0xff] %vm1194_vm5, %v3236_v36 }
 0x4d4   : > { %4010 = vrot.lane.b32.xlu1 %v6505_v13, %s4790_s29  ;;  %v4628_v42 = vpack.c.bf16 %v4094_v22, %v4093_v0  ;;  %3788 = vrot.lane.b32.xlu0 %v3715_v11, %s4789_s20  ;;  %v3542_v22 = vld [vmem:[#allocation3 + $0x180] sm:$0xff] }
 0x4d6   : > { %v3426_v41 = vpop.permute.xlu1 %3425  ;;  %4630 = vmatpush3.bf16.xpose.msk.msra.mxu1 %vm6781_vm12, %v4628_v42  ;;  %v3204_v4 = vpop.permute.xlu0 %3203 }
 0x4d7   : > { %3501 = vst.msk [vmem:[#allocation4 + $0xa0] sm:$0xff] %vm1387_vm7, %v3426_v41  ;;  %v3526_v41 = vld [vmem:[#allocation3 + $0xc0] sm:$0xff] }
 0x4d8   : > { %3294 = vst.msk [vmem:[#allocation4 + $0x28] sm:$0xff] %vm1194_vm5, %v3204_v4  ;;  %3978 = vrot.lane.b32.xlu1 %v3906_v29, %s4790_s29  ;;  %4012 = vrot.lane.b32.xlu0 %v3923_v60, %s4790_s29  ;;  %v3543_v4 = vld [vmem:[#allocation3 + $0x188] sm:$0xff] }
 0x4da   : > { %v3394_v13 = vpop.permute.xlu1 %3393  ;;  %v3428_v26 = vpop.permute.xlu0 %3427 }
 0x4db   : > { %3485 = vst.msk [vmem:[#allocation4 + $0x20] sm:$0xff] %vm1387_vm7, %v3394_v13  ;;  %3502 = vst.msk [vmem:[#allocation4 + $0xa8] sm:$0xff] %vm1387_vm7, %v3428_v26  ;;  %v3734_v13 = vld [vmem:[#allocation3 + $0x181] sm:$0xff] }
 0x4dc   : > { %3053 = vrot.lane.b32.xlu1 %v7258_v37, %s4785_s16  ;;  %3980 = vrot.lane.b32.xlu0 %v3907_v55, %s4790_s29  ;;  %v3527_v26 = vld [vmem:[#allocation3 + $0xc8] sm:$0xff] }
 0x4de   : > { %v3619_v5 = vpop.permute.xlu1 %3618  ;;  %v3396_v3 = vpop.permute.xlu0 %3395 }
 0x4df   : > { %3694 = vst.msk [vmem:[#allocation4 + $0xa0] sm:$0xff] %vm1581_vm8, %v3619_v5 }
 0x4e0   : > { %3486 = vst.msk [vmem:[#allocation4 + $0x28] sm:$0xff] %vm1387_vm7, %v3396_v3  ;;  %3245 = vrot.lane.b32.xlu1 %v3730_v9, %s4786_s17  ;;  %3055 = vrot.lane.b32.xlu0 %v7259_v49, %s4785_s16  ;;  %v3909_v9 = vld [vmem:[#allocation3 + $0xb2] sm:$0xff]  ;;  %v3718_v3 = vld [vmem:[#allocation3 + $0xc1] sm:$0xff] }
 0x4e2   : > { %v3587_v54 = vpop.permute.xlu1 %3586  ;;  %v3621_v25 = vpop.permute.xlu0 %3620 }
 0x4e3   : > { %3678 = vst.msk [vmem:[#allocation4 + $0x20] sm:$0xff] %vm1581_vm8, %v3587_v54  ;;  %3695 = vst.msk [vmem:[#allocation4 + $0xa8] sm:$0xff] %vm1581_vm8, %v3621_v25 }
 0x4e4   : > { %3213 = vrot.lane.b32.xlu1 %v3714_v59, %s4786_s17  ;;  %3247 = vrot.lane.b32.xlu0 %v3731_v2, %s4786_s17 }
 0x4e6   : > { %v3811_v28 = vpop.permute.xlu1 %3810  ;;  %v3589_v43 = vpop.permute.xlu0 %3588 }
 0x4e7   : > { %3886 = vst.msk [vmem:[#allocation4 + $0xa0] sm:$0xff] %vm1774_vm9, %v3811_v28  ;;  %v3735_v28 = vld [vmem:[#allocation3 + $0x189] sm:$0xff] }
 0x4e8   : > { %3679 = vst.msk [vmem:[#allocation4 + $0x28] sm:$0xff] %vm1581_vm8, %v3589_v43  ;;  %3437 = vrot.lane.b32.xlu1 %v3347_v31, %s4787_s18  ;;  %3215 = vrot.lane.b32.xlu0 %v3715_v11, %s4786_s17 }
 0x4ea   : > { %v3779_v6 = vpop.permute.xlu1 %3778  ;;  %v3813_v35 = vpop.permute.xlu0 %3812 }
 0x4eb   : > { %3870 = vst.msk [vmem:[#allocation4 + $0x20] sm:$0xff] %vm1774_vm9, %v3779_v6  ;;  %3887 = vst.msk [vmem:[#allocation4 + $0xa8] sm:$0xff] %vm1774_vm9, %v3813_v35  ;;  %v3926_v35 = vld [vmem:[#allocation3 + $0x182] sm:$0xff] }
 0x4ec   : > { %3405 = vrot.lane.b32.xlu1 %v3906_v29, %s4787_s18  ;;  %3439 = vrot.lane.b32.xlu0 %v3923_v60, %s4787_s18 }
 0x4ee   : > { %v4003_v19 = vpop.permute.xlu1 %4002  ;;  %v3781_v39 = vpop.permute.xlu0 %3780 }
 0x4ef   : > { %4078 = vst.msk [vmem:[#allocation4 + $0xa0] sm:$0xff] %vm1967_vm10, %v4003_v19 }
 0x4f0   : > { %3871 = vst.msk [vmem:[#allocation4 + $0x28] sm:$0xff] %vm1774_vm9, %v3781_v39  ;;  %3630 = vrot.lane.b32.xlu1 %v7260_v30, %s4788_s19  ;;  %3407 = vrot.lane.b32.xlu0 %v3907_v55, %s4787_s18  ;;  %v3719_v30 = vld [vmem:[#allocation3 + $0xc9] sm:$0xff] }
 0x4f2   : > { %v3971_v14 = vpop.permute.xlu1 %3970  ;;  %v4005_v23 = vpop.permute.xlu0 %4004 }
 0x4f3   : > { %4062 = vst.msk [vmem:[#allocation4 + $0x20] sm:$0xff] %vm1967_vm10, %v3971_v14  ;;  %4079 = vst.msk [vmem:[#allocation4 + $0xa8] sm:$0xff] %vm1967_vm10, %v4005_v23 }
 0x4f4   : > { %3598 = vrot.lane.b32.xlu1 %v3524_v17, %s4788_s19  ;;  %3632 = vrot.lane.b32.xlu0 %v7261_v34, %s4788_s19  ;;  %v3910_v34 = vld [vmem:[#allocation3 + $0xc2] sm:$0xff] }
 0x4f6   : > { %v3046_v21 = vpop.permute.xlu1 %3045  ;;  %v3973_v18 = vpop.permute.xlu0 %3972  ;;  %v4111_v7 = vld [vmem:[#allocation4 + $0xa0] sm:$0xff] }
 0x4f7   : > { %3119 = vst.msk [vmem:[#allocation4 + $0xb0] sm:$0xff] %vm1001_vm4, %v3046_v21  ;;  %v3927_v21 = vld [vmem:[#allocation3 + $0x18a] sm:$0xff] }
 0x4f8   : > { %4063 = vst.msk [vmem:[#allocation4 + $0x28] sm:$0xff] %vm1967_vm10, %v3973_v18  ;;  %3822 = vrot.lane.b32.xlu1 %v3732_v16, %s4789_s20  ;;  %3600 = vrot.lane.b32.xlu0 %v3525_v12, %s4788_s19  ;;  %v3911_v12 = vld [vmem:[#allocation3 + $0xca] sm:$0xff] }
 0x4fa   : > { %v3238_v20 = vpop.permute.xlu1 %3237  ;;  %v3048_v51 = vpop.permute.xlu0 %3047  ;;  %v4112_v15 = vld [vmem:[#allocation4 + $0xa8] sm:$0xff]  ;;  %v4095_v47 = vld [vmem:[#allocation4 + $0x20] sm:$0xff] }
 0x4fb   : > { %3311 = vst.msk [vmem:[#allocation4 + $0xb0] sm:$0xff] %vm1194_vm5, %v3238_v20  ;;  %v4631_v46 = vpack.c.bf16 %v4112_v15, %v4111_v7 }
 0x4fc   : > { %3120 = vst.msk [vmem:[#allocation4 + $0xb8] sm:$0xff] %vm1001_vm4, %v3048_v51  ;;  %3790 = vrot.lane.b32.xlu1 %v3716_v33, %s4789_s20  ;;  %3824 = vrot.lane.b32.xlu0 %v3733_v56, %s4789_s20 }
 0x4fd   : > { %4633 = vmatprep.subr.msk.bf16.mxu1 %vm6781_vm12, %v4631_v46 }
 0x4fe   : > { %v3206_v52 = vpop.permute.xlu1 %3205  ;;  %v3240_v58 = vpop.permute.xlu0 %3239 }
 0x4ff   : > { %3295 = vst.msk [vmem:[#allocation4 + $0x30] sm:$0xff] %vm1194_vm5, %v3206_v52  ;;  %v4096_v50 = vld [vmem:[#allocation4 + $0x28] sm:$0xff]  ;;  %3312 = vst.msk [vmem:[#allocation4 + $0xb8] sm:$0xff] %vm1194_vm5, %v3240_v58 }
 0x500   : > { %4014 = vrot.lane.b32.xlu1 %v3924_v8, %s4790_s29  ;;  %v4634_v37 = vpack.c.bf16 %v4096_v50, %v4095_v47  ;;  %3792 = vrot.lane.b32.xlu0 %v3717_v40, %s4789_s20  ;;  %v3545_v47 = vld [vmem:[#allocation3 + $0x1a0] sm:$0xff] }
 0x502   : > { %v3430_v62 = vpop.permute.xlu1 %3429  ;;  %4636 = vmatpush3.bf16.xpose.msk.msra.mxu1 %vm6781_vm12, %v4634_v37  ;;  %v3208_v45 = vpop.permute.xlu0 %3207 }
 0x503   : > { %3503 = vst.msk [vmem:[#allocation4 + $0xb0] sm:$0xff] %vm1387_vm7, %v3430_v62 }
 0x504   : > { %3296 = vst.msk [vmem:[#allocation4 + $0x38] sm:$0xff] %vm1194_vm5, %v3208_v45  ;;  %3982 = vrot.lane.b32.xlu1 %v3908_v32, %s4790_s29  ;;  %4016 = vrot.lane.b32.xlu0 %v3925_v53, %s4790_s29 }
 0x506   : > { %v3398_v49 = vpop.permute.xlu1 %3397  ;;  %v3432_v38 = vpop.permute.xlu0 %3431 }
 0x507   : > { %3487 = vst.msk [vmem:[#allocation4 + $0x30] sm:$0xff] %vm1387_vm7, %v3398_v49  ;;  %3504 = vst.msk [vmem:[#allocation4 + $0xb8] sm:$0xff] %vm1387_vm7, %v3432_v38  ;;  %v3737_v49 = vld [vmem:[#allocation3 + $0x1a1] sm:$0xff] }
 0x508   : > { %3057 = vrot.lane.b32.xlu1 %v2965_v44, %s4785_s16  ;;  %3984 = vrot.lane.b32.xlu0 %v3909_v9, %s4790_s29  ;;  %v3736_v44 = vld [vmem:[#allocation3 + $0x199] sm:$0xff] }
 0x50a   : > { %v3623_v24 = vpop.permute.xlu1 %3622  ;;  %v3400_v27 = vpop.permute.xlu0 %3399 }
 0x50b   : > { %3696 = vst.msk [vmem:[#allocation4 + $0xb0] sm:$0xff] %vm1581_vm8, %v3623_v24 }
 0x50c   : > { %3488 = vst.msk [vmem:[#allocation4 + $0x38] sm:$0xff] %vm1387_vm7, %v3400_v27  ;;  %3249 = vrot.lane.b32.xlu1 %v3732_v16, %s4786_s17  ;;  %3059 = vrot.lane.b32.xlu0 %v2966_v63, %s4785_s16 }
 0x50e   : > { %v3591_v59 = vpop.permute.xlu1 %3590  ;;  %v3625_v61 = vpop.permute.xlu0 %3624 }
 0x50f   : > { %3680 = vst.msk [vmem:[#allocation4 + $0x30] sm:$0xff] %vm1581_vm8, %v3591_v59  ;;  %3697 = vst.msk [vmem:[#allocation4 + $0xb8] sm:$0xff] %vm1581_vm8, %v3625_v61 }
 0x510   : > { %3217 = vrot.lane.b32.xlu1 %v3716_v33, %s4786_s17  ;;  %3251 = vrot.lane.b32.xlu0 %v3733_v56, %s4786_s17 }
 0x512   : > { %v3815_v10 = vpop.permute.xlu1 %3814  ;;  %v3593_v2 = vpop.permute.xlu0 %3592 }
 0x513   : > { %3888 = vst.msk [vmem:[#allocation4 + $0xb0] sm:$0xff] %vm1774_vm9, %v3815_v10  ;;  %v3721_v10 = vld [vmem:[#allocation3 + $0xe1] sm:$0xff] }
 0x514   : > { %3681 = vst.msk [vmem:[#allocation4 + $0x38] sm:$0xff] %vm1581_vm8, %v3593_v2  ;;  %3441 = vrot.lane.b32.xlu1 %v3924_v8, %s4787_s18  ;;  %3219 = vrot.lane.b32.xlu0 %v3717_v40, %s4786_s17  ;;  %v3544_v40 = vld [vmem:[#allocation3 + $0x198] sm:$0xff] }
 0x516   : > { %v3783_v48 = vpop.permute.xlu1 %3782  ;;  %v3817_v57 = vpop.permute.xlu0 %3816 }
 0x517   : > { %3872 = vst.msk [vmem:[#allocation4 + $0x30] sm:$0xff] %vm1774_vm9, %v3783_v48  ;;  %3889 = vst.msk [vmem:[#allocation4 + $0xb8] sm:$0xff] %vm1774_vm9, %v3817_v57  ;;  %v3720_v57 = vld [vmem:[#allocation3 + $0xd9] sm:$0xff] }
 0x518   : > { %3409 = vrot.lane.b32.xlu1 %v3908_v32, %s4787_s18  ;;  %3443 = vrot.lane.b32.xlu0 %v3925_v53, %s4787_s18  ;;  %v3529_v32 = vld [vmem:[#allocation3 + $0xe0] sm:$0xff]  ;;  %v3528_v53 = vld [vmem:[#allocation3 + $0xd8] sm:$0xff] }
 0x51a   : > { %v4007_v36 = vpop.permute.xlu1 %4006  ;;  %v3785_v0 = vpop.permute.xlu0 %3784 }
 0x51b   : > { %4080 = vst.msk [vmem:[#allocation4 + $0xb0] sm:$0xff] %vm1967_vm10, %v4007_v36 }
 0x51c   : > { %3873 = vst.msk [vmem:[#allocation4 + $0x38] sm:$0xff] %vm1774_vm9, %v3785_v0  ;;  %3634 = vrot.lane.b32.xlu1 %v3542_v22, %s4788_s19  ;;  %3411 = vrot.lane.b32.xlu0 %v3909_v9, %s4787_s18  ;;  %v3929_v0 = vld [vmem:[#allocation3 + $0x1a2] sm:$0xff] }
 0x51e   : > { %v3975_v11 = vpop.permute.xlu1 %3974  ;;  %v4009_v42 = vpop.permute.xlu0 %4008 }
 0x51f   : > { %4064 = vst.msk [vmem:[#allocation4 + $0x30] sm:$0xff] %vm1967_vm10, %v3975_v11  ;;  %4081 = vst.msk [vmem:[#allocation4 + $0xb8] sm:$0xff] %vm1967_vm10, %v4009_v42  ;;  %v3928_v11 = vld [vmem:[#allocation3 + $0x19a] sm:$0xff] }
 0x520   : > { %3602 = vrot.lane.b32.xlu1 %v3526_v41, %s4788_s19  ;;  %3636 = vrot.lane.b32.xlu0 %v3543_v4, %s4788_s19 }
 0x522   : > { %v3050_v29 = vpop.permute.xlu1 %3049  ;;  %v3977_v60 = vpop.permute.xlu0 %3976  ;;  %v4113_v54 = vld [vmem:[#allocation4 + $0xb0] sm:$0xff] }
 0x523   : > { %3121 = vst.msk [vmem:[#allocation4 + $0xc0] sm:$0xff] %vm1001_vm4, %v3050_v29 }
 0x524   : > { %4065 = vst.msk [vmem:[#allocation4 + $0x38] sm:$0xff] %vm1967_vm10, %v3977_v60  ;;  %3826 = vrot.lane.b32.xlu1 %v3734_v13, %s4789_s20  ;;  %3604 = vrot.lane.b32.xlu0 %v3527_v26, %s4788_s19  ;;  %v3913_v60 = vld [vmem:[#allocation3 + $0xe2] sm:$0xff] }
 0x526   : > { %v3242_v55 = vpop.permute.xlu1 %3241  ;;  %v3052_v5 = vpop.permute.xlu0 %3051  ;;  %v4114_v25 = vld [vmem:[#allocation4 + $0xb8] sm:$0xff]  ;;  %v4097_v19 = vld [vmem:[#allocation4 + $0x30] sm:$0xff] }
 0x527   : > { %3313 = vst.msk [vmem:[#allocation4 + $0xc0] sm:$0xff] %vm1194_vm5, %v3242_v55  ;;  %v4637_v43 = vpack.c.bf16 %v4114_v25, %v4113_v54  ;;  %v4791_v54 = vmov 0  }
 0x528   : > { %3122 = vst.msk [vmem:[#allocation4 + $0xc8] sm:$0xff] %vm1001_vm4, %v3052_v5  ;;  %3794 = vrot.lane.b32.xlu1 %v3718_v3, %s4789_s20  ;;  %3828 = vrot.lane.b32.xlu0 %v3735_v28, %s4789_s20  ;;  %v4123_v5 = vld [vmem:[%s7149_s5] sm:$0xf] }
 0x529   : > { %4639 = vmatprep.subr.msk.bf16.mxu1 %vm6781_vm12, %v4637_v43  ;;  %4716 = vset.pattern.permute.xlu0 %v4791_v54 }
 0x52a   : > { %v3210_v31 = vpop.permute.xlu1 %3209  ;;  %v3244_v6 = vpop.permute.xlu0 %3243 }
 0x52b   : > { %3297 = vst.msk [vmem:[#allocation4 + $0x40] sm:$0xff] %vm1194_vm5, %v3210_v31  ;;  %v4098_v39 = vld [vmem:[#allocation4 + $0x38] sm:$0xff]  ;;  %3314 = vst.msk [vmem:[#allocation4 + $0xc8] sm:$0xff] %vm1194_vm5, %v3244_v6 }
 0x52c   : > { %4018 = vrot.lane.b32.xlu1 %v3926_v35, %s4790_s29  ;;  %v4640_v14 = vpack.c.bf16 %v4098_v39, %v4097_v19  ;;  %3796 = vrot.lane.b32.xlu0 %v3719_v30, %s4789_s20 }
 0x52e   : > { %v3434_v23 = vpop.permute.xlu1 %3433  ;;  %4642 = vmatpush3.bf16.xpose.msk.msra.mxu1 %vm6781_vm12, %v4640_v14  ;;  %v3212_v17 = vpop.permute.xlu0 %3211 }
 0x52f   : > { %3505 = vst.msk [vmem:[#allocation4 + $0xc0] sm:$0xff] %vm1387_vm7, %v3434_v23 }
 0x530   : > { %3298 = vst.msk [vmem:[#allocation4 + $0x48] sm:$0xff] %vm1194_vm5, %v3212_v17  ;;  %3986 = vrot.lane.b32.xlu1 %v3910_v34, %s4790_s29  ;;  %4020 = vrot.lane.b32.xlu0 %v3927_v21, %s4790_s29 }
 0x532   : > { %v3402_v18 = vpop.permute.xlu1 %3401  ;;  %v3436_v16 = vpop.permute.xlu0 %3435 }
 0x533   : > { %3489 = vst.msk [vmem:[#allocation4 + $0x40] sm:$0xff] %vm1387_vm7, %v3402_v18  ;;  %3506 = vst.msk [vmem:[#allocation4 + $0xc8] sm:$0xff] %vm1387_vm7, %v3436_v16 }
 0x534   : > { %3061 = vrot.lane.b32.xlu1 %v3542_v22, %s4785_s16  ;;  %3988 = vrot.lane.b32.xlu0 %v3911_v12, %s4790_s29 }
 0x536   : > { %v3627_v20 = vpop.permute.xlu1 %3626  ;;  %v3404_v51 = vpop.permute.xlu0 %3403 }
 0x537   : > { %3698 = vst.msk [vmem:[#allocation4 + $0xc0] sm:$0xff] %vm1581_vm8, %v3627_v20 }
 0x538   : > { %3490 = vst.msk [vmem:[#allocation4 + $0x48] sm:$0xff] %vm1387_vm7, %v3404_v51  ;;  %3031 = vrot.lane.b32.xlu1 %v3527_v26, %s4785_s16  ;;  %3063 = vrot.lane.b32.xlu0 %v3543_v4, %s4785_s16  ;;  %v7010_v4 = vld [vmem:[%s7148_s4] sm:$0xf] }
 0x539   : > { %4551 = vmatprep.mubr.msk.f32.mxu1 %vm2044_vm11, %v7010_v4 }
 0x53a   : > { %v3595_v33 = vpop.permute.xlu1 %3594  ;;  %v3629_v7 = vpop.permute.xlu0 %3628 }
 0x53b   : > { %3682 = vst.msk [vmem:[#allocation4 + $0x40] sm:$0xff] %vm1581_vm8, %v3595_v33  ;;  %3699 = vst.msk [vmem:[#allocation4 + $0xc8] sm:$0xff] %vm1581_vm8, %v3629_v7 }
 0x53c   : > { %3255 = vrot.lane.b32.xlu1 %v3735_v28, %s4786_s17  ;;  %3253 = vrot.lane.b32.xlu0 %v3734_v13, %s4786_s17  ;;  %v3912_v13 = vld [vmem:[#allocation3 + $0xda] sm:$0xff] }
 0x53e   : > { %v3819_v15 = vpop.permute.xlu1 %3818  ;;  %v3597_v56 = vpop.permute.xlu0 %3596 }
 0x53f   : > { %3890 = vst.msk [vmem:[#allocation4 + $0xc0] sm:$0xff] %vm1774_vm9, %v3819_v15 }
 0x540   : > { %3683 = vst.msk [vmem:[#allocation4 + $0x48] sm:$0xff] %vm1581_vm8, %v3597_v56  ;;  %3223 = vrot.lane.b32.xlu1 %v3719_v30, %s4786_s17  ;;  %3221 = vrot.lane.b32.xlu0 %v3718_v3, %s4786_s17  ;;  %s4722_s17 = sshll.u32 %s4792_s25, 4  ;;  %s4723_s17 = int_to_ptr.vmem [resolvable:$false] %s4722_s17 }
 0x542   : > { %v3787_v46 = vpop.permute.xlu1 %3786  ;;  %v3821_v52 = vpop.permute.xlu0 %3820 }
 0x543   : > { %3874 = vst.msk [vmem:[#allocation4 + $0x40] sm:$0xff] %vm1774_vm9, %v3787_v46  ;;  %3891 = vst.msk [vmem:[#allocation4 + $0xc8] sm:$0xff] %vm1774_vm9, %v3821_v52 }
 0x544   : > { %3447 = vrot.lane.b32.xlu1 %v3927_v21, %s4787_s18  ;;  %3445 = vrot.lane.b32.xlu0 %v3926_v35, %s4787_s18 }
 0x546   : > { %v4011_v58 = vpop.permute.xlu1 %4010  ;;  %v3789_v8 = vpop.permute.xlu0 %3788 }
 0x547   : > { %4082 = vst.msk [vmem:[#allocation4 + $0xc0] sm:$0xff] %vm1967_vm10, %v4011_v58 }
 0x548   : > { %3875 = vst.msk [vmem:[#allocation4 + $0x48] sm:$0xff] %vm1774_vm9, %v3789_v8  ;;  %3415 = vrot.lane.b32.xlu1 %v3911_v12, %s4787_s18  ;;  %3413 = vrot.lane.b32.xlu0 %v3910_v34, %s4787_s18  ;;  %s4480_s18 = sshll.u32 %s5096_s9, 3 }
 0x549   : > { %s269_s13 = scalar_lea.vmem %s7145_s1, %s4480_s18  ;;  %s4724_s18 = scalar_lea.vmem %s4723_s17, 256 }
 0x54a   : > { %v3979_v50 = vpop.permute.xlu1 %3978  ;;  %v4013_v37 = vpop.permute.xlu0 %4012 }
 0x54b   : > { %4066 = vst.msk [vmem:[#allocation4 + $0x40] sm:$0xff] %vm1967_vm10, %v3979_v50  ;;  %4083 = vst.msk [vmem:[#allocation4 + $0xc8] sm:$0xff] %vm1967_vm10, %v4013_v37 }
 0x54c   : > { %3640 = vrot.lane.b32.xlu1 %v3545_v47, %s4788_s19  ;;  %3638 = vrot.lane.b32.xlu0 %v3544_v40, %s4788_s19 }
 0x54e   : > { %v3054_v62 = vpop.permute.xlu1 %3053  ;;  %v3981_v45 = vpop.permute.xlu0 %3980  ;;  %v4115_v24 = vld [vmem:[#allocation4 + $0xc0] sm:$0xff] }
 0x54f   : > { %3123 = vst.msk [vmem:[#allocation4 + $0xd0] sm:$0xff] %vm1001_vm4, %v3054_v62 }
 0x550   : > { %4067 = vst.msk [vmem:[#allocation4 + $0x48] sm:$0xff] %vm1967_vm10, %v3981_v45  ;;  %3608 = vrot.lane.b32.xlu1 %v3529_v32, %s4788_s19  ;;  %3606 = vrot.lane.b32.xlu0 %v3528_v53, %s4788_s19 }
 0x552   : > { %v3246_v38 = vpop.permute.xlu1 %3245  ;;  %v3056_v9 = vpop.permute.xlu0 %3055  ;;  %v4116_v27 = vld [vmem:[#allocation4 + $0xc8] sm:$0xff]  ;;  %v4099_v2 = vld [vmem:[#allocation4 + $0x40] sm:$0xff] }
 0x553   : > { %3315 = vst.msk [vmem:[#allocation4 + $0xd0] sm:$0xff] %vm1194_vm5, %v3246_v38  ;;  %v4643_v63 = vpack.c.bf16 %v4116_v27, %v4115_v24 }
 0x554   : > { %3124 = vst.msk [vmem:[#allocation4 + $0xd8] sm:$0xff] %vm1001_vm4, %v3056_v9  ;;  %3832 = vrot.lane.b32.xlu1 %v3737_v49, %s4789_s20  ;;  %3830 = vrot.lane.b32.xlu0 %v3736_v44, %s4789_s20 }
 0x555   : > { %4645 = vmatprep.subr.msk.bf16.mxu1 %vm6781_vm12, %v4643_v63 }
 0x556   : > { %v3214_v59 = vpop.permute.xlu1 %3213  ;;  %v3248_v61 = vpop.permute.xlu0 %3247 }
 0x557   : > { %3299 = vst.msk [vmem:[#allocation4 + $0x50] sm:$0xff] %vm1194_vm5, %v3214_v59  ;;  %v4100_v48 = vld [vmem:[#allocation4 + $0x48] sm:$0xff]  ;;  %3316 = vst.msk [vmem:[#allocation4 + $0xd8] sm:$0xff] %vm1194_vm5, %v3248_v61 }
 0x558   : > { %3800 = vrot.lane.b32.xlu1 %v3721_v10, %s4789_s20  ;;  %v4646_v36 = vpack.c.bf16 %v4100_v48, %v4099_v2  ;;  %3798 = vrot.lane.b32.xlu0 %v3720_v57, %s4789_s20  ;;  %s257_s20 = sand.u32 1, %s4772_s22  }
 0x559   : > { %s4402_s26 = sshll.u32 %s257_s20, 3  ;;  %s4313_s15 = scalar_lea.sflag [#allocation6], %s257_s20 }
 0x55a   : > { %v3438_v22 = vpop.permute.xlu1 %3437  ;;  %4648 = vmatpush3.bf16.xpose.msk.msra.mxu1 %vm6781_vm12, %v4646_v36  ;;  %v3216_v42 = vpop.permute.xlu0 %3215 }
 0x55b   : > { %3507 = vst.msk [vmem:[#allocation4 + $0xd0] sm:$0xff] %vm1387_vm7, %v3438_v22 }
 0x55c   : > { %3300 = vst.msk [vmem:[#allocation4 + $0x58] sm:$0xff] %vm1194_vm5, %v3216_v42  ;;  %4024 = vrot.lane.b32.xlu1 %v3929_v0, %s4790_s29  ;;  %4022 = vrot.lane.b32.xlu0 %v3928_v11, %s4790_s29 }
 0x55e   : > { %v3406_v41 = vpop.permute.xlu1 %3405  ;;  %v3440_v29 = vpop.permute.xlu0 %3439 }
 0x55f   : > { %3491 = vst.msk [vmem:[#allocation4 + $0x50] sm:$0xff] %vm1387_vm7, %v3406_v41  ;;  %3508 = vst.msk [vmem:[#allocation4 + $0xd8] sm:$0xff] %vm1387_vm7, %v3440_v29 }
 0x560   : > { %3992 = vrot.lane.b32.xlu1 %v3913_v60, %s4790_s29  ;;  %3990 = vrot.lane.b32.xlu0 %v3912_v13, %s4790_s29  ;;  %s259_s29 = scalar_lea.vmem [#allocation5], %s4402_s26 }
 0x561   : > { %s4327_s9 = sshll.u32 %s259_s29, 4  ;;  %s7104_s9 = int_to_ptr.vmem [resolvable:$true] %s4327_s9 }
 0x562   : > { %v3631_v26 = vpop.permute.xlu1 %3630  ;;  %v3408_v55 = vpop.permute.xlu0 %3407  ;;  %s4718_s16 = scalar_lea.vmem %s7104_s9, 128  ;;  %p4725_p0 = scmp.lt.s32.totalorder %s7104_s9, %s4723_s17 }
 0x563   : > { %3700 = vst.msk [vmem:[#allocation4 + $0xd0] sm:$0xff] %vm1581_vm8, %v3631_v26  ;;  %p4719_p11 = scmp.ne.s32.totalorder %s7104_s9, %s4718_s16  ;;  %p4726_p1 = scmp.lt.s32.totalorder %s4724_s18, %s4718_s16 }
 0x564   : > { %3492 = vst.msk [vmem:[#allocation4 + $0x58] sm:$0xff] %vm1387_vm7, %v3408_v55  ;;  %4126 = vperm.xlu0 %4716, %v4123_v5  }
 0x565   : > { %p4720_p12 = pnand %p4719_p11, %p4866_p5  ;;  %p4727_p2 = por %p4726_p1, %p4725_p0 }
 0x566   : > { %v3599_v3 = vpop.permute.xlu1 %3598  ;;  %v3633_v25 = vpop.permute.xlu0 %3632 }
 0x567   : > { %3684 = vst.msk [vmem:[#allocation4 + $0x50] sm:$0xff] %vm1581_vm8, %v3599_v3  ;;  %3701 = vst.msk [vmem:[#allocation4 + $0xd8] sm:$0xff] %vm1581_vm8, %v3633_v25  ;;  %p4721_p13 = pneg %p4720_p12 }
 0x569   : > { %p4728_p3 = pnand %p4727_p2, %p4721_p13 }
 0x56a   : > { %v3823_v28 = vpop.permute.xlu1 %3822  ;;  %v3601_v43 = vpop.permute.xlu0 %3600 }
 0x56b   : > { %3892 = vst.msk [vmem:[#allocation4 + $0xd0] sm:$0xff] %vm1774_vm9, %v3823_v28 }
 0x56c   : > { %3685 = vst.msk [vmem:[#allocation4 + $0x58] sm:$0xff] %vm1581_vm8, %v3601_v43 }
 0x56e   : > { %v3791_v31 = vpop.permute.xlu1 %3790  ;;  %v3825_v6 = vpop.permute.xlu0 %3824 }
 0x56f   : > { %3876 = vst.msk [vmem:[#allocation4 + $0x50] sm:$0xff] %vm1774_vm9, %v3791_v31  ;;  %3893 = vst.msk [vmem:[#allocation4 + $0xd8] sm:$0xff] %vm1774_vm9, %v3825_v6 }
 0x572   : > { %v4015_v35 = vpop.permute.xlu1 %4014  ;;  %v3793_v19 = vpop.permute.xlu0 %3792 }
 0x573   : > { %4084 = vst.msk [vmem:[#allocation4 + $0xd0] sm:$0xff] %vm1967_vm10, %v4015_v35 }
 0x574   : > { %3877 = vst.msk [vmem:[#allocation4 + $0x58] sm:$0xff] %vm1774_vm9, %v3793_v19 }
 0x576   : > { %v3983_v39 = vpop.permute.xlu1 %3982  ;;  %v4017_v30 = vpop.permute.xlu0 %4016 }
 0x577   : > { %4068 = vst.msk [vmem:[#allocation4 + $0x50] sm:$0xff] %vm1967_vm10, %v3983_v39  ;;  %4085 = vst.msk [vmem:[#allocation4 + $0xd8] sm:$0xff] %vm1967_vm10, %v4017_v30 }
 0x57a   : > { %v3058_v14 = vpop.permute.xlu1 %3057  ;;  %v3985_v23 = vpop.permute.xlu0 %3984  ;;  %v4117_v21 = vld [vmem:[#allocation4 + $0xd0] sm:$0xff] }
 0x57b   : > { %3125 = vst.msk [vmem:[#allocation4 + $0xe0] sm:$0xff] %vm1001_vm4, %v3058_v14 }
 0x57c   : > { %4069 = vst.msk [vmem:[#allocation4 + $0x58] sm:$0xff] %vm1967_vm10, %v3985_v23 }
 0x57e   : > { %v3250_v17 = vpop.permute.xlu1 %3249  ;;  %v3060_v34 = vpop.permute.xlu0 %3059  ;;  %v4118_v18 = vld [vmem:[#allocation4 + $0xd8] sm:$0xff]  ;;  %v4101_v51 = vld [vmem:[#allocation4 + $0x50] sm:$0xff] }
 0x57f   : > { %3317 = vst.msk [vmem:[#allocation4 + $0xe0] sm:$0xff] %vm1194_vm5, %v3250_v17  ;;  %v4649_v16 = vpack.c.bf16 %v4118_v18, %v4117_v21  ;;  %v4299_v17 = vld [vmem:[%s269_s13] sm:$0xff] }
 0x580   : > { %3126 = vst.msk [vmem:[#allocation4 + $0xe8] sm:$0xff] %vm1001_vm4, %v3060_v34  ;;  %v4301_v18 = vcombine.high %v4299_v17, %v4299_v17 }
 0x581   : > { %4651 = vmatprep.subr.msk.bf16.mxu1 %vm6781_vm12, %v4649_v16 }
 0x582   : > { %v3218_v12 = vpop.permute.xlu1 %3217  ;;  %v3252_v20 = vpop.permute.xlu0 %3251 }
 0x583   : > { %3301 = vst.msk [vmem:[#allocation4 + $0x60] sm:$0xff] %vm1194_vm5, %v3218_v12  ;;  %v4102_v33 = vld [vmem:[#allocation4 + $0x58] sm:$0xff]  ;;  %3318 = vst.msk [vmem:[#allocation4 + $0xe8] sm:$0xff] %vm1194_vm5, %v3252_v20 }
 0x584   : > { %v4652_v7 = vpack.c.bf16 %v4102_v33, %v4101_v51 }
 0x586   : > { %v3442_v15 = vpop.permute.xlu1 %3441  ;;  %4654 = vmatpush3.bf16.xpose.msk.msra.mxu1 %vm6781_vm12, %v4652_v7  ;;  %v3220_v56 = vpop.permute.xlu0 %3219 }
 0x587   : > { %3509 = vst.msk [vmem:[#allocation4 + $0xe0] sm:$0xff] %vm1387_vm7, %v3442_v15 }
 0x588   : > { %3302 = vst.msk [vmem:[#allocation4 + $0x68] sm:$0xff] %vm1194_vm5, %v3220_v56 }
 0x58a   : > { %v3410_v46 = vpop.permute.xlu1 %3409  ;;  %v3444_v52 = vpop.permute.xlu0 %3443 }
 0x58b   : > { %3493 = vst.msk [vmem:[#allocation4 + $0x60] sm:$0xff] %vm1387_vm7, %v3410_v46  ;;  %3510 = vst.msk [vmem:[#allocation4 + $0xe8] sm:$0xff] %vm1387_vm7, %v3444_v52 }
 0x58e   : > { %v3635_v58 = vpop.permute.xlu1 %3634  ;;  %v3412_v8 = vpop.permute.xlu0 %3411 }
 0x58f   : > { %3702 = vst.msk [vmem:[#allocation4 + $0xe0] sm:$0xff] %vm1581_vm8, %v3635_v58 }
 0x590   : > { %3494 = vst.msk [vmem:[#allocation4 + $0x68] sm:$0xff] %vm1387_vm7, %v3412_v8 }
 0x592   : > { %v3603_v47 = vpop.permute.xlu1 %3602  ;;  %v3637_v50 = vpop.permute.xlu0 %3636 }
 0x593   : > { %3686 = vst.msk [vmem:[#allocation4 + $0x60] sm:$0xff] %vm1581_vm8, %v3603_v47  ;;  %3703 = vst.msk [vmem:[#allocation4 + $0xe8] sm:$0xff] %vm1581_vm8, %v3637_v50 }
 0x596   : > { %v3827_v40 = vpop.permute.xlu1 %3826  ;;  %v3605_v37 = vpop.permute.xlu0 %3604 }
 0x597   : > { %3894 = vst.msk [vmem:[#allocation4 + $0xe0] sm:$0xff] %vm1774_vm9, %v3827_v40 }
 0x598   : > { %3687 = vst.msk [vmem:[#allocation4 + $0x68] sm:$0xff] %vm1581_vm8, %v3605_v37 }
 0x59a   : > { %v3795_v62 = vpop.permute.xlu1 %3794  ;;  %v3829_v45 = vpop.permute.xlu0 %3828 }
 0x59b   : > { %3878 = vst.msk [vmem:[#allocation4 + $0x60] sm:$0xff] %vm1774_vm9, %v3795_v62  ;;  %3895 = vst.msk [vmem:[#allocation4 + $0xe8] sm:$0xff] %vm1774_vm9, %v3829_v45 }
 0x59e   : > { %v4019_v32 = vpop.permute.xlu1 %4018  ;;  %v3797_v53 = vpop.permute.xlu0 %3796 }
 0x59f   : > { %4086 = vst.msk [vmem:[#allocation4 + $0xe0] sm:$0xff] %vm1967_vm10, %v4019_v32 }
 0x5a0   : > { %3879 = vst.msk [vmem:[#allocation4 + $0x68] sm:$0xff] %vm1774_vm9, %v3797_v53 }
 0x5a2   : > { %v3987_v49 = vpop.permute.xlu1 %3986  ;;  %v4021_v38 = vpop.permute.xlu0 %4020 }
 0x5a3   : > { %4070 = vst.msk [vmem:[#allocation4 + $0x60] sm:$0xff] %vm1967_vm10, %v3987_v49  ;;  %4087 = vst.msk [vmem:[#allocation4 + $0xe8] sm:$0xff] %vm1967_vm10, %v4021_v38 }
 0x5a6   : > { %v3062_v44 = vpop.permute.xlu1 %3061  ;;  %v3989_v9 = vpop.permute.xlu0 %3988  ;;  %v4119_v63 = vld [vmem:[#allocation4 + $0xe0] sm:$0xff] }
 0x5a7   : > { %3127 = vst.msk [vmem:[#allocation4 + $0xf0] sm:$0xff] %vm1001_vm4, %v3062_v44 }
 0x5a8   : > { %4071 = vst.msk [vmem:[#allocation4 + $0x68] sm:$0xff] %vm1967_vm10, %v3989_v9 }
 0x5aa   : > { %v3032_v24 = vpop.permute.xlu1 %3031  ;;  %v3064_v27 = vpop.permute.xlu0 %3063  ;;  %v4120_v59 = vld [vmem:[#allocation4 + $0xe8] sm:$0xff]  ;;  %v4103_v48 = vld [vmem:[#allocation4 + $0x60] sm:$0xff] }
 0x5ab   : > { %3112 = vst.msk [vmem:[#allocation4 + $0x78] sm:$0xff] %vm1001_vm4, %v3032_v24  ;;  %3128 = vst.msk [vmem:[#allocation4 + $0xf8] sm:$0xff] %vm1001_vm4, %v3064_v27  ;;  %v4655_v61 = vpack.c.bf16 %v4120_v59, %v4119_v63 }
 0x5ad   : > { %4657 = vmatprep.subr.msk.bf16.mxu1 %vm6781_vm12, %v4655_v61 }
 0x5ae   : > { %v3256_v10 = vpop.permute.xlu1 %3255  ;;  %v3254_v2 = vpop.permute.xlu0 %3253 }
 0x5af   : > { %3320 = vst.msk [vmem:[#allocation4 + $0xf8] sm:$0xff] %vm1194_vm5, %v3256_v10  ;;  %v4104_v57 = vld [vmem:[#allocation4 + $0x68] sm:$0xff]  ;;  %3319 = vst.msk [vmem:[#allocation4 + $0xf0] sm:$0xff] %vm1194_vm5, %v3254_v2 }
 0x5b0   : > { %v4658_v36 = vpack.c.bf16 %v4104_v57, %v4103_v48 }
 0x5b2   : > { %v3224_v0 = vpop.permute.xlu1 %3223  ;;  %4660 = vmatpush3.bf16.xpose.msk.msra.mxu1 %vm6781_vm12, %v4658_v36  ;;  %v3222_v22 = vpop.permute.xlu0 %3221 }
 0x5b3   : > { %3304 = vst.msk [vmem:[#allocation4 + $0x78] sm:$0xff] %vm1194_vm5, %v3224_v0  ;;  %3303 = vst.msk [vmem:[#allocation4 + $0x70] sm:$0xff] %vm1194_vm5, %v3222_v22 }
 0x5b6   : > { %v3448_v11 = vpop.permute.xlu1 %3447  ;;  %v3446_v42 = vpop.permute.xlu0 %3445 }
 0x5b7   : > { %3512 = vst.msk [vmem:[#allocation4 + $0xf8] sm:$0xff] %vm1387_vm7, %v3448_v11  ;;  %3511 = vst.msk [vmem:[#allocation4 + $0xf0] sm:$0xff] %vm1387_vm7, %v3446_v42 }
 0x5ba   : > { %v3416_v41 = vpop.permute.xlu1 %3415  ;;  %v3414_v29 = vpop.permute.xlu0 %3413 }
 0x5bb   : > { %3496 = vst.msk [vmem:[#allocation4 + $0x78] sm:$0xff] %vm1387_vm7, %v3416_v41  ;;  %3495 = vst.msk [vmem:[#allocation4 + $0x70] sm:$0xff] %vm1387_vm7, %v3414_v29 }
 0x5be   : > { %v3641_v60 = vpop.permute.xlu1 %3640  ;;  %v3639_v13 = vpop.permute.xlu0 %3638 }
 0x5bf   : > { %3705 = vst.msk [vmem:[#allocation4 + $0xf8] sm:$0xff] %vm1581_vm8, %v3641_v60  ;;  %3704 = vst.msk [vmem:[#allocation4 + $0xf0] sm:$0xff] %vm1581_vm8, %v3639_v13 }
 0x5c2   : > { %v3609_v26 = vpop.permute.xlu1 %3608  ;;  %v3607_v55 = vpop.permute.xlu0 %3606 }
 0x5c3   : > { %3689 = vst.msk [vmem:[#allocation4 + $0x78] sm:$0xff] %vm1581_vm8, %v3609_v26  ;;  %3688 = vst.msk [vmem:[#allocation4 + $0x70] sm:$0xff] %vm1581_vm8, %v3607_v55 }
 0x5c6   : > { %v3833_v5 = vpop.permute.xlu1 %3832  ;;  %v3831_v3 = vpop.permute.xlu0 %3830 }
 0x5c7   : > { %3897 = vst.msk [vmem:[#allocation4 + $0xf8] sm:$0xff] %vm1774_vm9, %v3833_v5  ;;  %3896 = vst.msk [vmem:[#allocation4 + $0xf0] sm:$0xff] %vm1774_vm9, %v3831_v3 }
 0x5ca   : > { %v3801_v54 = vpop.permute.xlu1 %3800  ;;  %v3799_v25 = vpop.permute.xlu0 %3798 }
 0x5cb   : > { %3881 = vst.msk [vmem:[#allocation4 + $0x78] sm:$0xff] %vm1774_vm9, %v3801_v54  ;;  %3880 = vst.msk [vmem:[#allocation4 + $0x70] sm:$0xff] %vm1774_vm9, %v3799_v25 }
 0x5ce   : > { %v4025_v28 = vpop.permute.xlu1 %4024  ;;  %v4023_v43 = vpop.permute.xlu0 %4022 }
 0x5cf   : > { %4089 = vst.msk [vmem:[#allocation4 + $0xf8] sm:$0xff] %vm1967_vm10, %v4025_v28  ;;  %4088 = vst.msk [vmem:[#allocation4 + $0xf0] sm:$0xff] %vm1967_vm10, %v4023_v43 }
 0x5d2   : > { %v3993_v31 = vpop.permute.xlu1 %3992  ;;  %v3991_v6 = vpop.permute.xlu0 %3990 }
 0x5d3   : > { %4073 = vst.msk [vmem:[#allocation4 + $0x78] sm:$0xff] %vm1967_vm10, %v3993_v31  ;;  %4072 = vst.msk [vmem:[#allocation4 + $0x70] sm:$0xff] %vm1967_vm10, %v3991_v6 }
 0x5d6   : > { %v4122_v35 = vld [vmem:[#allocation4 + $0xf8] sm:$0xff]  ;;  %v4121_v19 = vld [vmem:[#allocation4 + $0xf0] sm:$0xff] }
 0x5d7   : > { %v4661_v39 = vpack.c.bf16 %v4122_v35, %v4121_v19 }
 0x5d9   : > { %4663 = vmatprep.subr.msk.bf16.mxu1 %vm6781_vm12, %v4661_v39 }
 0x5da   : > { %v4106_v30 = vld [vmem:[#allocation4 + $0x78] sm:$0xff]  ;;  %v4105_v14 = vld [vmem:[#allocation4 + $0x70] sm:$0xff] }
 0x5db   : > { %v4664_v23 = vpack.c.bf16 %v4106_v30, %v4105_v14 }
 0x5dd   : > { %4666 = vmatpush3.bf16.xpose.msk.msra.mxu1 %vm6781_vm12, %v4664_v23 }
 0x5e3   : > { %v4127_v34 = vpop.permute.xlu0 %4126 }
 0x5e4   : > { %4552 = vmatmul.mubr.msk.f32.vlgmr.msra.gmra.mrb[0].mxu1 %vm2044_vm11, %v7010_v4 }
 0x6b7   : > { %v4294_v21 = vpop.f32.mrb[0].mxu1 }
 0x6b8   : > { %v4295_v16 = vadd.f32 %v4294_v21, %v4127_v34  ;;  %v4296_v12 = vpop.f32.mrb[1].mxu1 }
 0x6b9   : > { %v4297_v1 = vadd.f32 %v4296_v12, %v4127_v34 }
 0x6ba   : > { %v4303_v20 = vadd.f32 %v4299_v17, %v4295_v16 }
 0x6bb   : > { %v4304_v51 = vadd.f32 %v4301_v18, %v4297_v1 }
 0x6bc   : > { %v4305_v33 = vmax.f32 %v4303_v20, 0.0 }
 0x6bd   : > { %v4306_v4 = vmax.f32 %v4304_v51, 0.0 }
 0x6bf   : > { %v4309_v7 = vcombine.low %v4305_v33, %v4306_v4 }
 0x6c1   : > { %4311 = vst [vmem:[%s259_s29] sm:$0xff] %v4309_v7 }
 0x6c2   : > { %4731 = shalt.err (!%p4728_p3)
}
 0x6c3   : > { %s4732_s19 = scalar_lea.hbm %s7102_s14, 128  ;;  %s4736_s20 = scalar_lea.hbm %s7150_s6, 256 }
 0x6c4   : > { %p4733_p4 = scmp.ne.s32.totalorder %s7102_s14, %s4732_s19  ;;  %p4737_p9 = scmp.lt.u32.totalorder %s7102_s14, %s7150_s6 }
 0x6c5   : > { %p4738_p10 = scmp.lt.u32.totalorder %s4736_s20, %s4732_s19  ;;  %p4740_p12 = scmp.lt.u32.totalorder %s4732_s19, %s7102_s14 }
 0x6c6   : > { %p4734_p7 = pnand %p4733_p4, %p4866_p5 }
 0x6c7   : > { %p4739_p11 = por %p4738_p10, %p4737_p9 }
 0x6c8   : > { %p4735_p8 = pneg %p4734_p7 }
 0x6c9   : > { %p4741_p13 = por %p4740_p12, %p4739_p11 }
 0x6cb   : > { %p4742_p0 = pnand %p4741_p13, %p4735_p8 }
 0x6cd   : > { %4745 = shalt.err (!%p4742_p0)
}
 0x6ce   : > { %4667 = dma.vmem_to_hbm [thread:$0]  (%p4866_p5), %s7104_s9, 128, %s7102_s14, %s4313_s15  }
 0x6cf PF: > { %p4673_p1 = scmp.ge.s32.totalorder %s4780_s24, 2  ;;  %s4339_s29 = sand.u32 1, %s4768_s21  }
 0x6d0   : > { %s4340_s10 = scalar_lea.sflag [#allocation6], %s4339_s29 }
 0x6d1   : > { %p4670_p2 = pnand %p4673_p1, %p4870_p6 }
 0x6d3   : > { %4763 = dma.done.wait (!%p4670_p2), %s4340_s10, 128  }
 0x6d4   : > { %4765 = vsyncadd (!%p4670_p2), %s4340_s10, 4294967168  ;;  %p16_p3 = scmp.ge.s32.totalorder %s4853_s27, 4   ;;  %s7262_s21 = smov %s4772_s22 }
 0x6d5   : > { %s7263_s22 = smov %s4776_s23  ;;  %s7264_s23 = smov %s4864_s30 }
 0x6d6   : > { %s7265_s24 = smov %s4853_s27  ;;  %18 = sbr.rel (!%p16_p3) target bundleno = 3 (0x3), region = 86 }
 0x6dd   :  { %4345 = vsyncpa [#allocation6], 1 }
 0x6de   :  { %4347 = vsyncpa [#allocation6 + $0x1], 1 }

</bundles_post_ra>
